<compile_context>
chip_gen: v7x
topology: tpu7x:2x2x1
jax: 0.10.0
libtpu: 0.0.40
codegen_flags: <defaults>
</compile_context>

<pallas_src>
import jax
import jax.numpy as jnp
from jax.experimental import pallas as pl
from jax.experimental.pallas import tpu as pltpu

LEAKY_SLOPE = 0.01   # nn.LeakyReLU default
BN_EPS = 1e-5        # nn.BatchNorm default
TILE_S = 128         # sample rows per grid step (lane-dense output, MXU row fill)


# ---------------------------------------------------------------------------
# Fused Pallas kernel: conv stack (dense GEMMs, done once) + per-tile MLP head
# ---------------------------------------------------------------------------
def _selector_fused_kernel(x_ref, sg_ref, smp_ref,
                           d1_ref, c1_ref, d2_ref, c2_ref, d3_ref, c3_ref,
                           w1f_ref, w1sg_ref, w1q_ref, t1_ref, w2_ref, b2_ref,
                           o_ref, base_ref):
    def leaky(v):
        return jnp.where(v >= 0.0, v, LEAKY_SLOPE * v)

    def mm(act, w_ref):  # bf16 MXU operands, f32 accumulation
        return jnp.dot(act.astype(w_ref.dtype), w_ref[...],
                       preferred_element_type=jnp.float32)

    # --- batch-invariant part: compute once, keep in VMEM scratch across tiles ---
    @pl.when(pl.program_id(0) == 0)
    def _():
        h = leaky(mm(x_ref[...], d1_ref) + c1_ref[...])          # (bs, 16*8*8)
        h = leaky(mm(h, d2_ref) + c2_ref[...])                    # (bs, 32*4*4)
        f = leaky(mm(h, d3_ref) + c3_ref[...])                    # (bs, 64*2*2) NCHW-flat
        # Linear1 env-feature + start/goal slices, BN1d shift folded into t1
        base_ref[...] = mm(f, w1f_ref) + mm(sg_ref[...], w1sg_ref) + t1_ref[...]

    # --- per-sample-tile part (weights resident, base broadcast per batch row) ---
    w1q = w1q_ref[...]                       # (state_dim, h_dim) bf16
    w2 = w2_ref[...]                         # (1, h_dim) f32
    b2 = b2_ref[...]                         # (1, 1) f32
    bs = o_ref.shape[0]
    for b in range(bs):                      # static, tiny unrolled loop
        smp_b = smp_ref[b]                   # (TILE_S, state_dim) bf16
        base_b = base_ref[pl.ds(b, 1), :]    # (1, h_dim) f32, broadcast over rows
        hb = leaky(base_b + jnp.dot(smp_b, w1q,
                                    preferred_element_type=jnp.float32))
        yb = jnp.sum(hb * w2, axis=-1, keepdims=True) + b2        # (TILE_S, 1)
        sb = 0.5 * (jnp.tanh(0.5 * yb) + 1.0)                     # sigmoid, f32
        o_ref[b, :] = sb[:, 0]               # lane-dense row store


# ---------------------------------------------------------------------------
# Forward (jit this): thin glue + one gridded pallas_call
# ---------------------------------------------------------------------------
def selector_small_forward(packed, occ_grid, start, goal, samples):
    """occ_grid: (bs, 1, H, W) NCHW; start/goal: (bs, dim); samples: (bs, ns, dim)."""
    bs = occ_grid.shape[0]
    ns = samples.shape[1]
    sd = samples.shape[2]
    h_dim = packed["w1q"].shape[1]

    x_flat = occ_grid.reshape(bs, -1).astype(jnp.bfloat16)                # NCHW flat
    sg = jnp.concatenate([start, goal], axis=-1).astype(jnp.bfloat16)     # (bs, 2*dim)

    # Pad samples to a multiple of TILE_S rows (lane-dense output, full MXU M fill);
    # padded rows are zeros and are sliced off after the call.
    ns_pad = ((ns + TILE_S - 1) // TILE_S) * TILE_S
    smp = samples.astype(jnp.bfloat16)
    if ns_pad != ns:
        smp = jnp.pad(smp, ((0, 0), (0, ns_pad - ns), (0, 0)))
    num_tiles = ns_pad // TILE_S

    weights = (packed["d1"], packed["c1"], packed["d2"], packed["c2"],
               packed["d3"], packed["c3"], packed["w1f"], packed["w1sg"],
               packed["w1q"], packed["t1"], packed["w2"], packed["b2"])

    def const_spec(a):
        # Constant block index -> DMA'd once, resident in VMEM across all grid steps.
        return pl.BlockSpec(a.shape, lambda t, nd=a.ndim: (0,) * nd)

    in_specs = (
        [const_spec(x_flat), const_spec(sg),
         pl.BlockSpec((bs, TILE_S, sd), lambda t: (0, t, 0))]
        + [const_spec(w) for w in weights])

    # Advisory cost estimate so XLA can overlap this small custom call.
    flops = 2 * bs * sum(w.shape[0] * w.shape[1]
                         for w in (packed["d1"], packed["d2"], packed["d3"],
                                   packed["w1f"], packed["w1sg"]))
    flops += 2 * bs * ns_pad * (sd * h_dim + h_dim)
    bytes_accessed = sum(int(a.size) * a.dtype.itemsize
                         for a in (x_flat, sg, smp) + weights) + bs * ns_pad * 4

    y = pl.pallas_call(
        _selector_fused_kernel,
        out_shape=jax.ShapeDtypeStruct((bs, ns_pad), jnp.float32),
        grid=(num_tiles,),
        in_specs=in_specs,
        out_specs=pl.BlockSpec((bs, TILE_S), lambda t: (0, t)),
        scratch_shapes=[pltpu.VMEM((bs, h_dim), jnp.float32)],
        compiler_params=pltpu.CompilerParams(
            dimension_semantics=("arbitrary",)),   # base scratch carried across tiles
        cost_estimate=pl.CostEstimate(
            flops=int(flops), transcendentals=int(bs * ns_pad),
            bytes_accessed=int(bytes_accessed)),
    )(x_flat, sg, smp, *weights)
    return y[:, :ns]


# ---------------------------------------------------------------------------
# Parameter init (torch-like shapes) and one-time packing
# ---------------------------------------------------------------------------
def _conv_out(h, k, s, p):
    return (h + 2 * p - k) // s + 1


def _conv_to_dense(w_oihw, hin, win, stride, pad):
    """Dense matrix D s.t. flat_out(NCHW) = flat_in(NCHW) @ D  (no bias)."""
    cout, cin, k, _ = w_oihw.shape
    hout = _conv_out(hin, k, stride, pad)
    wout = _conv_out(win, k, stride, pad)
    kk = jnp.arange(k)
    ih, oh = jnp.arange(hin), jnp.arange(hout)
    iw, ow = jnp.arange(win), jnp.arange(wout)
    sh = (ih[None, :, None] == (stride * oh[None, None, :]
                                + kk[:, None, None] - pad)).astype(jnp.float32)
    sw = (iw[None, :, None] == (stride * ow[None, None, :]
                                + kk[:, None, None] - pad)).astype(jnp.float32)
    d6 = jnp.einsum('ocij,iha,jwb->chwoab', w_oihw, sh, sw)
    return d6.reshape(cin * hin * win, cout * hout * wout), hout, wout


def _pack_conv_layer(w_oihw, b, bn, hin, win, stride, pad):
    """Fold conv bias (+ optional eval-mode BN) into the dense conv matrix."""
    cout = w_oihw.shape[0]
    d2d, hout, wout = _conv_to_dense(w_oihw, hin, win, stride, pad)
    if bn is None:
        s = jnp.ones((cout,), jnp.float32)
        t = jnp.zeros((cout,), jnp.float32)
    else:
        gamma, beta, rmean, rvar = bn
        s = gamma / jnp.sqrt(rvar + BN_EPS)
        t = beta - rmean * s
    rep = hout * wout
    s_flat = jnp.repeat(s, rep)
    shift = (jnp.repeat(b, rep) * s_flat + jnp.repeat(t, rep)).reshape(1, -1)
    d_packed = (d2d * s_flat[None, :]).astype(jnp.bfloat16)
    return d_packed, shift.astype(jnp.float32), hout, wout


def init_params(key, state_dim, goal_dim, occ_grid_dim, h_dim):
    """Raw parameters with the same shapes/semantics as the torch module."""
    cm = 16
    keys = iter(jax.random.split(key, 32))

    def u(shape, lo=-0.1, hi=0.1):
        return jax.random.uniform(next(keys), shape, jnp.float32, lo, hi)

    p = {}
    # conv1: Conv2d(1, 16, 4, 2, 1) -> LeakyReLU (no BN)
    p["w_c1"], p["b_c1"] = u((cm, occ_grid_dim[0], 4, 4)), u((cm,))
    # conv2: Conv2d(16, 32, 3, 2, 1) -> BN2d(32) -> LeakyReLU
    p["w_c2"], p["b_c2"] = u((cm * 2, cm, 3, 3)), u((cm * 2,))
    p["g_c2"], p["be_c2"] = u((cm * 2,), 0.5, 1.5), u((cm * 2,))
    p["m_c2"], p["v_c2"] = u((cm * 2,)), u((cm * 2,), 0.5, 1.5)
    # conv3: Conv2d(32, 64, 3, 2, 1) -> BN2d(64) -> LeakyReLU
    p["w_c3"], p["b_c3"] = u((cm * 4, cm * 2, 3, 3)), u((cm * 4,))
    p["g_c3"], p["be_c3"] = u((cm * 4,), 0.5, 1.5), u((cm * 4,))
    p["m_c3"], p["v_c3"] = u((cm * 4,)), u((cm * 4,), 0.5, 1.5)

    h1 = _conv_out(occ_grid_dim[1], 4, 2, 1)
    w1 = _conv_out(occ_grid_dim[2], 4, 2, 1)
    h2, w2 = _conv_out(h1, 3, 2, 1), _conv_out(w1, 3, 2, 1)
    h3, w3 = _conv_out(h2, 3, 2, 1), _conv_out(w2, 3, 2, 1)
    flat_fts = cm * 4 * h3 * w3

    d_in = state_dim * 2 + goal_dim + flat_fts
    # layers: Linear(d_in, h_dim) -> BN1d(h_dim) -> LeakyReLU
    p["w1"], p["b1"] = u((d_in, h_dim)), u((h_dim,))      # w1 == torch Linear.weight.T
    p["g1"], p["be1"] = u((h_dim,), 0.5, 1.5), u((h_dim,))
    p["m1"], p["v1"] = u((h_dim,)), u((h_dim,), 0.5, 1.5)
    # head: Linear(h_dim, 1) -> Sigmoid
    p["w2"], p["b2"] = u((h_dim, 1)), u((1,))
    return p


def pack_params(raw, state_dim, goal_dim, occ_grid_dim, h_dim):
    """One-time repacking: conv->dense GEMM mats, BN/bias folding, bf16 casts."""
    cin, h0, w0 = occ_grid_dim
    d1, c1, h1, w1sz = _pack_conv_layer(raw["w_c1"], raw["b_c1"], None, h0, w0, 2, 1)
    d2, c2, h2, w2sz = _pack_conv_layer(
        raw["w_c2"], raw["b_c2"],
        (raw["g_c2"], raw["be_c2"], raw["m_c2"], raw["v_c2"]), h1, w1sz, 2, 1)
    d3, c3, h3, w3sz = _pack_conv_layer(
        raw["w_c3"], raw["b_c3"],
        (raw["g_c3"], raw["be_c3"], raw["m_c3"], raw["v_c3"]), h2, w2sz, 2, 1)
    flat_fts = raw["w_c3"].shape[0] * h3 * w3sz

    # Linear1 + BN1d fold: h = xcat @ (w1*s1) + (b1*s1 + t1)
    s1 = raw["g1"] / jnp.sqrt(raw["v1"] + BN_EPS)
    t1 = raw["be1"] - raw["m1"] * s1
    w1s = raw["w1"] * s1[None, :]
    t1p = (raw["b1"] * s1 + t1).reshape(1, -1).astype(jnp.float32)
    n_sg = state_dim + goal_dim
    packed = {
        "d1": d1, "c1": c1, "d2": d2, "c2": c2, "d3": d3, "c3": c3,
        "w1f": w1s[:flat_fts].astype(jnp.bfloat16),                  # env-feature slice
        "w1sg": w1s[flat_fts:flat_fts + n_sg].astype(jnp.bfloat16),  # start+goal slice
        "w1q": w1s[flat_fts + n_sg:].astype(jnp.bfloat16),           # per-sample slice
        "t1": t1p,
        "w2": raw["w2"].reshape(1, h_dim).astype(jnp.float32),
        "b2": raw["b2"].reshape(1, 1).astype(jnp.float32),
    }
    return packed


# ---------------------------------------------------------------------------
# Pure-JAX f32 reference (independent path: lax.conv, no packing) for validation
# ---------------------------------------------------------------------------
def _reference_forward(raw, occ_grid, start, goal, samples):
    bs = occ_grid.shape[0]
    ns = samples.shape[1]

    def leaky(v):
        return jnp.where(v >= 0.0, v, LEAKY_SLOPE * v)

    def bn2d(x, g, b, m, v):
        s = g / jnp.sqrt(v + BN_EPS)
        return x * s.reshape(1, -1, 1, 1) + (b - m * s).reshape(1, -1, 1, 1)

    def conv(x, w, b, stride):
        y = jax.lax.conv_general_dilated(
            x, w, (stride, stride), ((1, 1), (1, 1)),
            dimension_numbers=("NCHW", "OIHW", "NCHW"))
        return y + b.reshape(1, -1, 1, 1)

    h = leaky(conv(occ_grid, raw["w_c1"], raw["b_c1"], 2))
    h = leaky(bn2d(conv(h, raw["w_c2"], raw["b_c2"], 2),
                   raw["g_c2"], raw["be_c2"], raw["m_c2"], raw["v_c2"]))
    h = leaky(bn2d(conv(h, raw["w_c3"], raw["b_c3"], 2),
                   raw["g_c3"], raw["be_c3"], raw["m_c3"], raw["v_c3"]))
    f = h.reshape(bs, -1)

    f_rep = jnp.repeat(f[:, None, :], ns, axis=1).reshape(bs * ns, -1)
    st_rep = jnp.repeat(start[:, None, :], ns, axis=1).reshape(bs * ns, -1)
    gl_rep = jnp.repeat(goal[:, None, :], ns, axis=1).reshape(bs * ns, -1)
    x = jnp.concatenate([f_rep, st_rep, gl_rep, samples.reshape(bs * ns, -1)], -1)

    y = x @ raw["w1"] + raw["b1"]
    s1 = raw["g1"] / jnp.sqrt(raw["v1"] + BN_EPS)
    y = leaky(y * s1 + (raw["be1"] - raw["m1"] * s1))
    y = y @ raw["w2"] + raw["b2"]
    return jax.nn.sigmoid(y).reshape(bs, ns)


# ---------------------------------------------------------------------------
if __name__ == "__main__":
    state_dim, goal_dim = 8, 8
    occ_grid_dim = [1, 16, 16]      # small spatial size (16 -> 8 -> 4 -> 2)
    h_dim = 512
    bs, ns = 2, 200                 # ns padded to 256 -> 2 sample tiles (exercises grid)

    key = jax.random.PRNGKey(0)
    kp, k1, k2, k3, k4 = jax.random.split(key, 5)
    raw = init_params(kp, state_dim, goal_dim, occ_grid_dim, h_dim)
    packed = pack_params(raw, state_dim, goal_dim, occ_grid_dim, h_dim)

    occ_grid = jax.random.uniform(
        k1, (bs, occ_grid_dim[0], occ_grid_dim[1], occ_grid_dim[2]), jnp.float32)
    start = jax.random.normal(k2, (bs, state_dim), jnp.float32)
    goal = jax.random.normal(k3, (bs, goal_dim), jnp.float32)
    samples = jax.random.normal(k4, (bs, ns, state_dim), jnp.float32)

    fwd = jax.jit(selector_small_forward)
    y = jax.block_until_ready(fwd(packed, occ_grid, start, goal, samples))

    assert y.shape == (bs, ns)
    assert bool(jnp.all(jnp.isfinite(y)))
    assert bool(jnp.all((y >= 0.0) & (y <= 1.0)))

    y_ref = _reference_forward(raw, occ_grid, start, goal, samples)
    err = float(jnp.max(jnp.abs(y - y_ref)))
    assert err < 5e-2, f"max |err| vs f32 reference = {err}"   # bf16 MXU drift budget

    print("KERNEL_OK")
</pallas_src>

<mosaic_0001>
module attributes {stable_mosaic.version = 11 : i64} {
  func.func @_selector_fused_kernel(%arg0: i32, %arg1: memref<2x256xbf16, #tpu.memory_space<vmem>>, %arg2: memref<2x16xbf16, #tpu.memory_space<vmem>>, %arg3: memref<2x128x8xbf16, #tpu.memory_space<vmem>>, %arg4: memref<256x1024xbf16, #tpu.memory_space<vmem>>, %arg5: memref<1x1024xf32, #tpu.memory_space<vmem>>, %arg6: memref<1024x512xbf16, #tpu.memory_space<vmem>>, %arg7: memref<1x512xf32, #tpu.memory_space<vmem>>, %arg8: memref<512x256xbf16, #tpu.memory_space<vmem>>, %arg9: memref<1x256xf32, #tpu.memory_space<vmem>>, %arg10: memref<256x512xbf16, #tpu.memory_space<vmem>>, %arg11: memref<16x512xbf16, #tpu.memory_space<vmem>>, %arg12: memref<8x512xbf16, #tpu.memory_space<vmem>>, %arg13: memref<1x512xf32, #tpu.memory_space<vmem>>, %arg14: memref<1x512xf32, #tpu.memory_space<vmem>>, %arg15: memref<1x1xf32, #tpu.memory_space<vmem>>, %arg16: memref<2x128xf32, #tpu.memory_space<vmem>>, %arg17: memref<2x512xf32, #tpu.memory_space<vmem>>) attributes {dimension_semantics = [#tpu.dimension_semantics<arbitrary>], iteration_bounds = array<i64: 2>, scalar_prefetch = 0 : i64, scratch_operands = 1 : i64, tpu.core_type = #tpu.core_type<tc>, window_params = [{pipeline_mode = #tpu.pipeline_mode<synchronous>, transform_indices = @transform_0, window_bounds = array<i64: 2, 256>}, {pipeline_mode = #tpu.pipeline_mode<synchronous>, transform_indices = @transform_1, window_bounds = array<i64: 2, 16>}, {transform_indices = @transform_2, window_bounds = array<i64: 2, 128, 8>}, {pipeline_mode = #tpu.pipeline_mode<synchronous>, transform_indices = @transform_3, window_bounds = array<i64: 256, 1024>}, {pipeline_mode = #tpu.pipeline_mode<synchronous>, transform_indices = @transform_4, window_bounds = array<i64: 1, 1024>}, {pipeline_mode = #tpu.pipeline_mode<synchronous>, transform_indices = @transform_5, window_bounds = array<i64: 1024, 512>}, {pipeline_mode = #tpu.pipeline_mode<synchronous>, transform_indices = @transform_6, window_bounds = array<i64: 1, 512>}, {pipeline_mode = #tpu.pipeline_mode<synchronous>, transform_indices = @transform_7, window_bounds = array<i64: 512, 256>}, {pipeline_mode = #tpu.pipeline_mode<synchronous>, transform_indices = @transform_8, window_bounds = array<i64: 1, 256>}, {pipeline_mode = #tpu.pipeline_mode<synchronous>, transform_indices = @transform_9, window_bounds = array<i64: 256, 512>}, {pipeline_mode = #tpu.pipeline_mode<synchronous>, transform_indices = @transform_10, window_bounds = array<i64: 16, 512>}, {pipeline_mode = #tpu.pipeline_mode<synchronous>, transform_indices = @transform_11, window_bounds = array<i64: 8, 512>}, {pipeline_mode = #tpu.pipeline_mode<synchronous>, transform_indices = @transform_12, window_bounds = array<i64: 1, 512>}, {pipeline_mode = #tpu.pipeline_mode<synchronous>, transform_indices = @transform_13, window_bounds = array<i64: 1, 512>}, {pipeline_mode = #tpu.pipeline_mode<synchronous>, transform_indices = @transform_14, window_bounds = array<i64: 1, 1>}, {transform_indices = @transform_15, window_bounds = array<i64: 2, 128>}]} {
    %c0_i32 = arith.constant 0 : i32
    %0 = arith.cmpi eq, %arg0, %c0_i32 : i32
    %1 = arith.extui %0 : i1 to i32
    %c0_i32_0 = arith.constant 0 : i32
    %2 = arith.cmpi ne, %1, %c0_i32_0 : i32
    scf.if %2 {
      %c0_32 = arith.constant 0 : index
      %c0_33 = arith.constant 0 : index
      %62 = vector.load %arg1[%c0_32, %c0_33] : memref<2x256xbf16, #tpu.memory_space<vmem>>, vector<2x256xbf16>
      %c0_34 = arith.constant 0 : index
      %c0_35 = arith.constant 0 : index
      %63 = vector.load %arg4[%c0_34, %c0_35] : memref<256x1024xbf16, #tpu.memory_space<vmem>>, vector<256x1024xbf16>
      %cst_36 = arith.constant dense<0.000000e+00> : vector<2x1024xf32>
      %64 = tpu.matmul %62, %63, %cst_36 {dimension_numbers = #tpu.dot_dimension_numbers<[1], [0], [0], [1], [0, 0, 1, 1], [], []>} : vector<2x256xbf16>, vector<256x1024xbf16>, vector<2x1024xf32> -> vector<2x1024xf32>
      %c0_37 = arith.constant 0 : index
      %c0_38 = arith.constant 0 : index
      %65 = vector.load %arg5[%c0_37, %c0_38] : memref<1x1024xf32, #tpu.memory_space<vmem>>, vector<1x1024xf32>
      %66 = vector.broadcast %65 : vector<1x1024xf32> to vector<2x1024xf32>
      %67 = arith.addf %64, %66 : vector<2x1024xf32>
      %cst_39 = arith.constant 0.000000e+00 : f32
      %68 = vector.broadcast %cst_39 : f32 to vector<2x1024xf32>
      %69 = arith.cmpf oge, %67, %68 : vector<2x1024xf32>
      %cst_40 = arith.constant 0.00999999977 : f32
      %70 = vector.broadcast %cst_40 : f32 to vector<2x1024xf32>
      %71 = arith.mulf %70, %67 : vector<2x1024xf32>
      %72 = arith.select %69, %67, %71 : vector<2x1024xi1>, vector<2x1024xf32>
      %73 = arith.truncf %72 : vector<2x1024xf32> to vector<2x1024xbf16>
      %c0_41 = arith.constant 0 : index
      %c0_42 = arith.constant 0 : index
      %74 = vector.load %arg6[%c0_41, %c0_42] : memref<1024x512xbf16, #tpu.memory_space<vmem>>, vector<1024x512xbf16>
      %cst_43 = arith.constant dense<0.000000e+00> : vector<2x512xf32>
      %75 = tpu.matmul %73, %74, %cst_43 {dimension_numbers = #tpu.dot_dimension_numbers<[1], [0], [0], [1], [0, 0, 1, 1], [], []>} : vector<2x1024xbf16>, vector<1024x512xbf16>, vector<2x512xf32> -> vector<2x512xf32>
      %c0_44 = arith.constant 0 : index
      %c0_45 = arith.constant 0 : index
      %76 = vector.load %arg7[%c0_44, %c0_45] : memref<1x512xf32, #tpu.memory_space<vmem>>, vector<1x512xf32>
      %77 = vector.broadcast %76 : vector<1x512xf32> to vector<2x512xf32>
      %78 = arith.addf %75, %77 : vector<2x512xf32>
      %cst_46 = arith.constant 0.000000e+00 : f32
      %79 = vector.broadcast %cst_46 : f32 to vector<2x512xf32>
      %80 = arith.cmpf oge, %78, %79 : vector<2x512xf32>
      %cst_47 = arith.constant 0.00999999977 : f32
      %81 = vector.broadcast %cst_47 : f32 to vector<2x512xf32>
      %82 = arith.mulf %81, %78 : vector<2x512xf32>
      %83 = arith.select %80, %78, %82 : vector<2x512xi1>, vector<2x512xf32>
      %84 = arith.truncf %83 : vector<2x512xf32> to vector<2x512xbf16>
      %c0_48 = arith.constant 0 : index
      %c0_49 = arith.constant 0 : index
      %85 = vector.load %arg8[%c0_48, %c0_49] : memref<512x256xbf16, #tpu.memory_space<vmem>>, vector<512x256xbf16>
      %cst_50 = arith.constant dense<0.000000e+00> : vector<2x256xf32>
      %86 = tpu.matmul %84, %85, %cst_50 {dimension_numbers = #tpu.dot_dimension_numbers<[1], [0], [0], [1], [0, 0, 1, 1], [], []>} : vector<2x512xbf16>, vector<512x256xbf16>, vector<2x256xf32> -> vector<2x256xf32>
      %c0_51 = arith.constant 0 : index
      %c0_52 = arith.constant 0 : index
      %87 = vector.load %arg9[%c0_51, %c0_52] : memref<1x256xf32, #tpu.memory_space<vmem>>, vector<1x256xf32>
      %88 = vector.broadcast %87 : vector<1x256xf32> to vector<2x256xf32>
      %89 = arith.addf %86, %88 : vector<2x256xf32>
      %cst_53 = arith.constant 0.000000e+00 : f32
      %90 = vector.broadcast %cst_53 : f32 to vector<2x256xf32>
      %91 = arith.cmpf oge, %89, %90 : vector<2x256xf32>
      %cst_54 = arith.constant 0.00999999977 : f32
      %92 = vector.broadcast %cst_54 : f32 to vector<2x256xf32>
      %93 = arith.mulf %92, %89 : vector<2x256xf32>
      %94 = arith.select %91, %89, %93 : vector<2x256xi1>, vector<2x256xf32>
      %95 = arith.truncf %94 : vector<2x256xf32> to vector<2x256xbf16>
      %c0_55 = arith.constant 0 : index
      %c0_56 = arith.constant 0 : index
      %96 = vector.load %arg10[%c0_55, %c0_56] : memref<256x512xbf16, #tpu.memory_space<vmem>>, vector<256x512xbf16>
      %cst_57 = arith.constant dense<0.000000e+00> : vector<2x512xf32>
      %97 = tpu.matmul %95, %96, %cst_57 {dimension_numbers = #tpu.dot_dimension_numbers<[1], [0], [0], [1], [0, 0, 1, 1], [], []>} : vector<2x256xbf16>, vector<256x512xbf16>, vector<2x512xf32> -> vector<2x512xf32>
      %c0_58 = arith.constant 0 : index
      %c0_59 = arith.constant 0 : index
      %98 = vector.load %arg2[%c0_58, %c0_59] : memref<2x16xbf16, #tpu.memory_space<vmem>>, vector<2x16xbf16>
      %c0_60 = arith.constant 0 : index
      %c0_61 = arith.constant 0 : index
      %99 = vector.load %arg11[%c0_60, %c0_61] : memref<16x512xbf16, #tpu.memory_space<vmem>>, vector<16x512xbf16>
      %cst_62 = arith.constant dense<0.000000e+00> : vector<2x512xf32>
      %100 = tpu.matmul %98, %99, %cst_62 {dimension_numbers = #tpu.dot_dimension_numbers<[1], [0], [0], [1], [0, 0, 1, 1], [], []>} : vector<2x16xbf16>, vector<16x512xbf16>, vector<2x512xf32> -> vector<2x512xf32>
      %101 = arith.addf %97, %100 : vector<2x512xf32>
      %c0_63 = arith.constant 0 : index
      %c0_64 = arith.constant 0 : index
      %102 = vector.load %arg13[%c0_63, %c0_64] : memref<1x512xf32, #tpu.memory_space<vmem>>, vector<1x512xf32>
      %103 = vector.broadcast %102 : vector<1x512xf32> to vector<2x512xf32>
      %104 = arith.addf %101, %103 : vector<2x512xf32>
      %c0_65 = arith.constant 0 : index
      %c0_66 = arith.constant 0 : index
      %105 = vector.load %arg17[%c0_65, %c0_66] : memref<2x512xf32, #tpu.memory_space<vmem>>, vector<2x512xf32>
      tpu.vector_store %arg17[%c0_65, %c0_66], %104 {strides = array<i32>} : memref<2x512xf32, #tpu.memory_space<vmem>>, vector<2x512xf32>,
    } else {
    }
    %c0 = arith.constant 0 : index
    %c0_1 = arith.constant 0 : index
    %3 = vector.load %arg12[%c0, %c0_1] : memref<8x512xbf16, #tpu.memory_space<vmem>>, vector<8x512xbf16>
    %c0_2 = arith.constant 0 : index
    %c0_3 = arith.constant 0 : index
    %4 = vector.load %arg14[%c0_2, %c0_3] : memref<1x512xf32, #tpu.memory_space<vmem>>, vector<1x512xf32>
    %c0_4 = arith.constant 0 : index
    %c0_5 = arith.constant 0 : index
    %5 = vector.load %arg15[%c0_4, %c0_5] : memref<1x1xf32, #tpu.memory_space<vmem>>, vector<1x1xf32>
    %c0_6 = arith.constant 0 : index
    %c0_7 = arith.constant 0 : index
    %c0_8 = arith.constant 0 : index
    %6 = vector.load %arg3[%c0_6, %c0_7, %c0_8] : memref<2x128x8xbf16, #tpu.memory_space<vmem>>, vector<1x128x8xbf16>
    %7 = vector.shape_cast %6 : vector<1x128x8xbf16> to vector<128x8xbf16>
    %c0_9 = arith.constant 0 : index
    %c0_10 = arith.constant 0 : index
    %8 = vector.load %arg17[%c0_9, %c0_10] : memref<2x512xf32, #tpu.memory_space<vmem>>, vector<1x512xf32>
    %cst = arith.constant dense<0.000000e+00> : vector<128x512xf32>
    %9 = tpu.matmul %7, %3, %cst {dimension_numbers = #tpu.dot_dimension_numbers<[1], [0], [0], [1], [0, 0, 1, 1], [], []>} : vector<128x8xbf16>, vector<8x512xbf16>, vector<128x512xf32> -> vector<128x512xf32>
    %10 = vector.broadcast %8 : vector<1x512xf32> to vector<128x512xf32>
    %11 = arith.addf %10, %9 : vector<128x512xf32>
    %cst_11 = arith.constant 0.000000e+00 : f32
    %12 = vector.broadcast %cst_11 : f32 to vector<128x512xf32>
    %13 = arith.cmpf oge, %11, %12 : vector<128x512xf32>
    %cst_12 = arith.constant 0.00999999977 : f32
    %14 = vector.broadcast %cst_12 : f32 to vector<128x512xf32>
    %15 = arith.mulf %14, %11 : vector<128x512xf32>
    %16 = arith.select %13, %11, %15 : vector<128x512xi1>, vector<128x512xf32>
    %17 = vector.broadcast %4 : vector<1x512xf32> to vector<128x512xf32>
    %18 = arith.mulf %16, %17 : vector<128x512xf32>
    %cst_13 = arith.constant dense<0.000000e+00> : vector<128xf32>
    %19 = vector.multi_reduction <add>, %18, %cst_13 [1] : vector<128x512xf32> to vector<128xf32>
    %20 = vector.shape_cast %19 : vector<128xf32> to vector<128x1xf32>
    %21 = vector.broadcast %5 : vector<1x1xf32> to vector<128x1xf32>
    %22 = arith.addf %20, %21 : vector<128x1xf32>
    %cst_14 = arith.constant 5.000000e-01 : f32
    %23 = vector.broadcast %cst_14 : f32 to vector<128x1xf32>
    %24 = arith.mulf %23, %22 : vector<128x1xf32>
    %25 = math.tanh %24 : vector<128x1xf32>
    %cst_15 = arith.constant 1.000000e+00 : f32
    %26 = vector.broadcast %cst_15 : f32 to vector<128x1xf32>
    %27 = arith.addf %25, %26 : vector<128x1xf32>
    %cst_16 = arith.constant 5.000000e-01 : f32
    %28 = vector.broadcast %cst_16 : f32 to vector<128x1xf32>
    %29 = arith.mulf %28, %27 : vector<128x1xf32>
    %30 = vector.shape_cast %29 : vector<128x1xf32> to vector<128xf32>
    %c0_17 = arith.constant 0 : index
    %c0_18 = arith.constant 0 : index
    %31 = vector.load %arg16[%c0_17, %c0_18] : memref<2x128xf32, #tpu.memory_space<vmem>>, vector<1x128xf32>
    %32 = vector.shape_cast %31 : vector<1x128xf32> to vector<128xf32>
    %33 = vector.shape_cast %30 : vector<128xf32> to vector<1x128xf32>
    tpu.vector_store %arg16[%c0_17, %c0_18], %33 {strides = array<i32>} : memref<2x128xf32, #tpu.memory_space<vmem>>, vector<1x128xf32>,
    %c1 = arith.constant 1 : index
    %c0_19 = arith.constant 0 : index
    %c0_20 = arith.constant 0 : index
    %34 = vector.load %arg3[%c1, %c0_19, %c0_20] : memref<2x128x8xbf16, #tpu.memory_space<vmem>>, vector<1x128x8xbf16>
    %35 = vector.shape_cast %34 : vector<1x128x8xbf16> to vector<128x8xbf16>
    %c1_21 = arith.constant 1 : index
    %c0_22 = arith.constant 0 : index
    %36 = vector.load %arg17[%c1_21, %c0_22] : memref<2x512xf32, #tpu.memory_space<vmem>>, vector<1x512xf32>
    %cst_23 = arith.constant dense<0.000000e+00> : vector<128x512xf32>
    %37 = tpu.matmul %35, %3, %cst_23 {dimension_numbers = #tpu.dot_dimension_numbers<[1], [0], [0], [1], [0, 0, 1, 1], [], []>} : vector<128x8xbf16>, vector<8x512xbf16>, vector<128x512xf32> -> vector<128x512xf32>
    %38 = vector.broadcast %36 : vector<1x512xf32> to vector<128x512xf32>
    %39 = arith.addf %38, %37 : vector<128x512xf32>
    %cst_24 = arith.constant 0.000000e+00 : f32
    %40 = vector.broadcast %cst_24 : f32 to vector<128x512xf32>
    %41 = arith.cmpf oge, %39, %40 : vector<128x512xf32>
    %cst_25 = arith.constant 0.00999999977 : f32
    %42 = vector.broadcast %cst_25 : f32 to vector<128x512xf32>
    %43 = arith.mulf %42, %39 : vector<128x512xf32>
    %44 = arith.select %41, %39, %43 : vector<128x512xi1>, vector<128x512xf32>
    %45 = vector.broadcast %4 : vector<1x512xf32> to vector<128x512xf32>
    %46 = arith.mulf %44, %45 : vector<128x512xf32>
    %cst_26 = arith.constant dense<0.000000e+00> : vector<128xf32>
    %47 = vector.multi_reduction <add>, %46, %cst_26 [1] : vector<128x512xf32> to vector<128xf32>
    %48 = vector.shape_cast %47 : vector<128xf32> to vector<128x1xf32>
    %49 = vector.broadcast %5 : vector<1x1xf32> to vector<128x1xf32>
    %50 = arith.addf %48, %49 : vector<128x1xf32>
    %cst_27 = arith.constant 5.000000e-01 : f32
    %51 = vector.broadcast %cst_27 : f32 to vector<128x1xf32>
    %52 = arith.mulf %51, %50 : vector<128x1xf32>
    %53 = math.tanh %52 : vector<128x1xf32>
    %cst_28 = arith.constant 1.000000e+00 : f32
    %54 = vector.broadcast %cst_28 : f32 to vector<128x1xf32>
    %55 = arith.addf %53, %54 : vector<128x1xf32>
    %cst_29 = arith.constant 5.000000e-01 : f32
    %56 = vector.broadcast %cst_29 : f32 to vector<128x1xf32>
    %57 = arith.mulf %56, %55 : vector<128x1xf32>
    %58 = vector.shape_cast %57 : vector<128x1xf32> to vector<128xf32>
    %c1_30 = arith.constant 1 : index
    %c0_31 = arith.constant 0 : index
    %59 = vector.load %arg16[%c1_30, %c0_31] : memref<2x128xf32, #tpu.memory_space<vmem>>, vector<1x128xf32>
    %60 = vector.shape_cast %59 : vector<1x128xf32> to vector<128xf32>
    %61 = vector.shape_cast %58 : vector<128xf32> to vector<1x128xf32>
    tpu.vector_store %arg16[%c1_30, %c0_31], %61 {strides = array<i32>} : memref<2x128xf32, #tpu.memory_space<vmem>>, vector<1x128xf32>,
    return
  }
  func.func @transform_0(%arg0: i32) -> (i32, i32) {
    %c0_i32 = arith.constant 0 : i32
    %c0_i32_0 = arith.constant 0 : i32
    %c0_i32_1 = arith.constant 0 : i32
    return %c0_i32, %c0_i32_0 : i32, i32
  }
  func.func @transform_1(%arg0: i32) -> (i32, i32) {
    %c0_i32 = arith.constant 0 : i32
    %c0_i32_0 = arith.constant 0 : i32
    %c0_i32_1 = arith.constant 0 : i32
    return %c0_i32, %c0_i32_0 : i32, i32
  }
  func.func @transform_2(%arg0: i32) -> (i32, i32, i32) {
    %c0_i32 = arith.constant 0 : i32
    %c0_i32_0 = arith.constant 0 : i32
    %c0_i32_1 = arith.constant 0 : i32
    return %c0_i32, %arg0, %c0_i32_0 : i32, i32, i32
  }
  func.func @transform_3(%arg0: i32) -> (i32, i32) {
    %c0_i32 = arith.constant 0 : i32
    %c0_i32_0 = arith.constant 0 : i32
    %c0_i32_1 = arith.constant 0 : i32
    return %c0_i32, %c0_i32_0 : i32, i32
  }
  func.func @transform_4(%arg0: i32) -> (i32, i32) {
    %c0_i32 = arith.constant 0 : i32
    %c0_i32_0 = arith.constant 0 : i32
    %c0_i32_1 = arith.constant 0 : i32
    return %c0_i32, %c0_i32_0 : i32, i32
  }
  func.func @transform_5(%arg0: i32) -> (i32, i32) {
    %c0_i32 = arith.constant 0 : i32
    %c0_i32_0 = arith.constant 0 : i32
    %c0_i32_1 = arith.constant 0 : i32
    return %c0_i32, %c0_i32_0 : i32, i32
  }
  func.func @transform_6(%arg0: i32) -> (i32, i32) {
    %c0_i32 = arith.constant 0 : i32
    %c0_i32_0 = arith.constant 0 : i32
    %c0_i32_1 = arith.constant 0 : i32
    return %c0_i32, %c0_i32_0 : i32, i32
  }
  func.func @transform_7(%arg0: i32) -> (i32, i32) {
    %c0_i32 = arith.constant 0 : i32
    %c0_i32_0 = arith.constant 0 : i32
    %c0_i32_1 = arith.constant 0 : i32
    return %c0_i32, %c0_i32_0 : i32, i32
  }
  func.func @transform_8(%arg0: i32) -> (i32, i32) {
    %c0_i32 = arith.constant 0 : i32
    %c0_i32_0 = arith.constant 0 : i32
    %c0_i32_1 = arith.constant 0 : i32
    return %c0_i32, %c0_i32_0 : i32, i32
  }
  func.func @transform_9(%arg0: i32) -> (i32, i32) {
    %c0_i32 = arith.constant 0 : i32
    %c0_i32_0 = arith.constant 0 : i32
    %c0_i32_1 = arith.constant 0 : i32
    return %c0_i32, %c0_i32_0 : i32, i32
  }
  func.func @transform_10(%arg0: i32) -> (i32, i32) {
    %c0_i32 = arith.constant 0 : i32
    %c0_i32_0 = arith.constant 0 : i32
    %c0_i32_1 = arith.constant 0 : i32
    return %c0_i32, %c0_i32_0 : i32, i32
  }
  func.func @transform_11(%arg0: i32) -> (i32, i32) {
    %c0_i32 = arith.constant 0 : i32
    %c0_i32_0 = arith.constant 0 : i32
    %c0_i32_1 = arith.constant 0 : i32
    return %c0_i32, %c0_i32_0 : i32, i32
  }
  func.func @transform_12(%arg0: i32) -> (i32, i32) {
    %c0_i32 = arith.constant 0 : i32
    %c0_i32_0 = arith.constant 0 : i32
    %c0_i32_1 = arith.constant 0 : i32
    return %c0_i32, %c0_i32_0 : i32, i32
  }
  func.func @transform_13(%arg0: i32) -> (i32, i32) {
    %c0_i32 = arith.constant 0 : i32
    %c0_i32_0 = arith.constant 0 : i32
    %c0_i32_1 = arith.constant 0 : i32
    return %c0_i32, %c0_i32_0 : i32, i32
  }
  func.func @transform_14(%arg0: i32) -> (i32, i32) {
    %c0_i32 = arith.constant 0 : i32
    %c0_i32_0 = arith.constant 0 : i32
    %c0_i32_1 = arith.constant 0 : i32
    return %c0_i32, %c0_i32_0 : i32, i32
  }
  func.func @transform_15(%arg0: i32) -> (i32, i32) {
    %c0_i32 = arith.constant 0 : i32
    %c0_i32_0 = arith.constant 0 : i32
    return %c0_i32, %arg0 : i32, i32
  }
}

</mosaic_0001>

<bundles_post_ra>
// kernel: selector_small_forward.1
= control target key start
LH: loop header
LB: loop body
LE: loop exit
PB: predicated region body
PF: predicated region fallthrough
CT: control target
= control target key end

     0   :  { %s10269_s0 = inlined_call_operand.vmem [shape: bf16[2,256], index: 0, kind: input, shape index: {}]   ;;  %s10270_s1 = inlined_call_operand.vmem [shape: bf16[2,16], index: 1, kind: input, shape index: {}]   ;;  %s10271_s2 = inlined_call_operand.vmem [shape: bf16[2,256,8], index: 2, kind: input, shape index: {}]   ;;  %s10272_s3 = inlined_call_operand.hbm [shape: bf16[256,1024], index: 3, kind: input, shape index: {}]   ;;  %s10273_s4 = inlined_call_operand.vmem [shape: f32[1,1024], index: 4, kind: input, shape index: {}]   ;;  %s10274_s5 = inlined_call_operand.hbm [shape: bf16[1024,512], index: 5, kind: input, shape index: {}]   ;;  %s10275_s6 = inlined_call_operand.vmem [shape: f32[1,512], index: 6, kind: input, shape index: {}]   ;;  %s10276_s7 = inlined_call_operand.vmem [shape: bf16[512,256], index: 7, kind: input, shape index: {}]   ;;  %s10277_s8 = inlined_call_operand.vmem [shape: f32[1,256], index: 8, kind: input, shape index: {}]   ;;  %s10278_s9 = inlined_call_operand.hbm [shape: bf16[256,512], index: 9, kind: input, shape index: {}]   ;;  %s10279_s10 = inlined_call_operand.vmem [shape: bf16[16,512], index: 10, kind: input, shape index: {}]   ;;  %s10280_s11 = inlined_call_operand.vmem [shape: bf16[8,512], index: 11, kind: input, shape index: {}]   ;;  %s10281_s12 = inlined_call_operand.vmem [shape: f32[1,512], index: 12, kind: input, shape index: {}]   ;;  %s10282_s13 = inlined_call_operand.vmem [shape: f32[1,512], index: 13, kind: input, shape index: {}]   ;;  %s10283_s14 = inlined_call_operand.<no memory space> [shape: f32[1,1], index: 14, kind: input, shape index: {}]   ;;  %s10284_s15 = inlined_call_operand.hbm [shape: f32[2,256], index: 15, kind: output, shape index: {}]  }
   0x1   :  { %10301 = sst [smem:[#allocation34_spill]] %s10274_s5  ;;  %v20_v0 = vstv %s10283_s14 }
   0x2   :  { %10302 = sst [smem:[#allocation35_spill]] %s10277_s8  ;;  %21 = vst [vmem:[#allocation3] sm:$0x1] %v20_v0 }
   0x3   :  { %10303 = sst [smem:[#allocation36_spill]] %s10280_s11 }
   0x4   :  { %10304 = sst [smem:[#allocation37_spill]] %s10281_s12 }
   0x5   :  { %10305 = sst [smem:[#allocation38_spill]] %s10282_s13 }
   0x6   :  { %10306 = sst [smem:[#allocation39_spill]] %s10284_s15 }
   0x7   :  { %22 = vsyncpa [#allocation6], 0 }
   0x8   :  { %23 = vsyncpa [#allocation9], 0 }
   0x9   :  { %24 = vsyncpa [#allocation7], 0 }
   0xa   :  { %26 = vsyncpa [#allocation7 + $0x1], 0  ;;  %s8506_s20 = smov 0   ;;  %s8508_s21 = smov 0  }
   0xb   :  { %s8510_s22 = smov 0   ;;  %s8512_s23 = smov 0  }
   0xc LB: > { %10307 = sst [smem:[#allocation15_spill]] %s8397_s20  ;;  %s8527_s14 = sadd.s32 4294967295, %s8409_s23   ;;  %s8409_s23 = sphi %s8512_s23, %s10373_s23   ;;  %s8405_s22 = sphi %s8510_s22, %s10377_s22   ;;  %s8401_s21 = sphi %s8508_s21, %s10376_s21   ;;  %s8397_s20 = sphi %s8506_s20, %s10375_s20  }
   0xd   : > { %s6862_s24 = sadd.s32 4294967294, %s8409_s23   ;;  %s8531_s25 = sadd.s32 1, %s8409_s23  }
   0xe   : > { %10308 = sst [smem:[#allocation16_spill]] %s8531_s25  ;;  %s81_s26 = sadd.s32 1, %s8405_s22 }
   0xf   : > { %s78_s27 = ssub.s32 %s8409_s23, %s8531_s25  ;;  %p88_p0 = scmp.ne.s32.totalorder %s8405_s22, %s8401_s21 }
  0x10   : > { %p79_p1 = scmp.eq.s32.totalorder %s78_s27, 0  ;;  %p89_p2 = scmp.eq.s32.totalorder %s8409_s23, 0 }
  0x11   : > { %p370_p3 = scmp.eq.s32.totalorder %s8527_s14, 1  ;;  %p375_p4 = scmp.ne.s32.totalorder %s8401_s21, %s8397_s20 }
  0x12   : > { %s8543_s28 = scalar_select %p79_p1, %s8405_s22, %s81_s26  }
  0x13   : > { %p8545_p5 = por %p89_p2, %p88_p0  ;;  %p8549_p6 = por %p370_p3, %p88_p0 }
  0x14   : > { %10309 = sst [smem:[#allocation17_spill]] %s8543_s28  ;;  %p376_p7 = scmp.eq.s32.totalorder %s6862_s24, 1 }
  0x15   : > { %s10310_s29 = scalar_select %p8545_p5, 1, 0 }
  0x16   : > { %s10311_s30 = scalar_select %p8549_p6, 1, 0 }
  0x17   : > { %p6863_p8 = scmp.ge.s32.totalorder %s8409_s23, 1  ;;  %p383_p9 = scmp.lt.s32.totalorder %s8409_s23, 3 }
  0x18   : > { %10312 = sst [smem:[#allocation18_spill]] %s10311_s30  ;;  %p8556_p11 = por %p376_p7, %p375_p4 }
  0x19   : > { %p10292_p12 = scmp.eq.s32.totalorder %s8527_s14, 0  ;;  %p8561_p13 = pnand %p6863_p8, %p383_p9 }
  0x1a   : > { %s10313_s16 = scalar_select %p8556_p11, 1, 0 }
  0x1b   : > { %s10315_s17 = scalar_select %p8561_p13, 1, 0 }
  0x1c   : > { %10314 = sst [smem:[#allocation19_spill]] %s10313_s16  ;;  %s8411_s18 = smov [#allocation8]  }
  0x1d   : > { %s417_s19 = sshll.u32 %s8411_s18, 4  ;;  %p7523_p0 = pneg %p8561_p13  ;;  %s418_s19 = int_to_ptr.vmem [resolvable:$true] %s417_s19 }
  0x1e   : > { %s8412_s26 = smov [#allocation5]   ;;  %s10317_s5 = sld [smem:[#allocation34_spill]] }
  0x1f   : > { %p8569_p1 = pnand %p10292_p12, %p7523_p0  ;;  %s401_s27 = sshll.u32 %s8412_s26, 4  ;;  %s8573_s27 = int_to_ptr.vmem [resolvable:$true] %s401_s27 }
  0x21   : > { %p8583_p3 = pneg %p8569_p1 }
  0x24   : > { %s8255_s16 = scalar_lea.hbm %s10317_s5, 32768 }
  0x25   : > { %p8256_p2 = scmp.ne.s32.totalorder %s10317_s5, %s8255_s16  ;;  %p8262_p8 = scmp.lt.u32.totalorder %s8255_s16, %s10317_s5 }
  0x27   : > { %p8258_p4 = pnand %p8583_p3, %p8256_p2 }
  0x29   : > { %p8259_p7 = pneg %p8258_p4 }
  0x2b   : > { %p8264_p9 = pnand %p8262_p8, %p8259_p7 }
  0x2d   : > { %8267 = shalt.err (!%p8264_p9)
}
  0x2e   : > { %s8268_s25 = scalar_lea.vmem %s418_s19, 32768  ;;  %p8276_p11 = scmp.lt.s32.totalorder %s418_s19, %s418_s19 }
  0x2f   : > { %p8269_p0 = scmp.ne.s32.totalorder %s418_s19, %s8268_s25  ;;  %p8277_p6 = scmp.lt.s32.totalorder %s8268_s25, %s8268_s25 }
  0x31   : > { %p8271_p10 = pnand %p8269_p0, %p8583_p3  ;;  %p8278_p13 = por %p8277_p6, %p8276_p11 }
  0x33   : > { %p8272_p12 = pneg %p8271_p10 }
  0x35   : > { %p8279_p5 = pnand %p8278_p13, %p8272_p12 }
  0x37   : > { %8282 = shalt.err (!%p8279_p5)
}
  0x38   : > { %s10296_s15 = smov 256   ;;  %s10297_s20 = smov 16  }
  0x39   : > { %7529 = dma.hbm_to_vmem [thread:$0]  (!%p8569_p1), %s10317_s5, 32768, %s418_s19, [#allocation9], %s10296_s15, %s10296_s15, %s10297_s20  }
  0x3a   : > { %s8283_s13 = scalar_lea.hbm %s10272_s3, 16384 }
  0x3b   : > { %p8284_p5 = scmp.ne.s32.totalorder %s10272_s3, %s8283_s13  ;;  %p8290_p11 = scmp.lt.u32.totalorder %s8283_s13, %s10272_s3 }
  0x3d   : > { %p8286_p6 = pnand %p8284_p5, %p8583_p3 }
  0x3f   : > { %p8287_p10 = pneg %p8286_p6 }
  0x41   : > { %p8292_p12 = pnand %p8290_p11, %p8287_p10 }
  0x43   : > { %8295 = shalt.err (!%p8292_p12)
}
  0x44   : > { %s8296_s19 = scalar_lea.vmem %s8573_s27, 16384  ;;  %p8304_p7 = scmp.lt.s32.totalorder %s8573_s27, %s8573_s27 }
  0x45   : > { %p8297_p13 = scmp.ne.s32.totalorder %s8573_s27, %s8296_s19  ;;  %p8305_p8 = scmp.lt.s32.totalorder %s8296_s19, %s8296_s19 }
  0x47   : > { %p8299_p2 = pnand %p8297_p13, %p8583_p3  ;;  %p8306_p9 = por %p8305_p8, %p8304_p7 }
  0x49   : > { %p8300_p4 = pneg %p8299_p2 }
  0x4b   : > { %p8307_p0 = pnand %p8306_p9, %p8300_p4 }
  0x4d   : > { %8310 = shalt.err (!%p8307_p0)
}
  0x4e   : > { %s8415_s11 = smov 512   ;;  %s8416_s8 = smov 32  }
  0x4f   : > { %7526 = dma.hbm_to_vmem [thread:$0]  (!%p8569_p1), %s10272_s3, 16384, %s8573_s27, [#allocation6], %s8415_s11, %s8415_s11, %s8416_s8  }
  0x50   : > { %s8417_s28 = smov [#allocation10]   ;;  %s8311_s25 = scalar_lea.hbm %s10278_s9, 8192 }
  0x51   : > { %s439_s30 = sshll.u32 %s8417_s28, 4  ;;  %p8312_p5 = scmp.ne.s32.totalorder %s10278_s9, %s8311_s25  ;;  %s440_s30 = int_to_ptr.vmem [resolvable:$true] %s439_s30 }
  0x52   : > { %p8318_p11 = scmp.lt.u32.totalorder %s8311_s25, %s10278_s9 }
  0x53   : > { %p8314_p6 = pnand %p8312_p5, %p8583_p3 }
  0x55   : > { %p8315_p10 = pneg %p8314_p6 }
  0x57   : > { %p8320_p12 = pnand %p8318_p11, %p8315_p10 }
  0x59   : > { %8323 = shalt.err (!%p8320_p12)
}
  0x5a   : > { %s8324_s27 = scalar_lea.vmem %s440_s30, 8192  ;;  %p8332_p7 = scmp.lt.s32.totalorder %s440_s30, %s440_s30 }
  0x5b   : > { %p8325_p13 = scmp.ne.s32.totalorder %s440_s30, %s8324_s27  ;;  %p8333_p8 = scmp.lt.s32.totalorder %s8324_s27, %s8324_s27 }
  0x5d   : > { %p8327_p2 = pnand %p8325_p13, %p8583_p3  ;;  %p8334_p9 = por %p8333_p8, %p8332_p7 }
  0x5f   : > { %p8328_p4 = pneg %p8327_p2 }
  0x61   : > { %p8335_p0 = pnand %p8334_p9, %p8328_p4 }
  0x63   : > { %8338 = shalt.err (!%p8335_p0)
}
  0x64   : > { %s10319_s15 = smov 16   ;;  %s10320_s11 = smov 256  }
  0x65   : > { %7532 = dma.hbm_to_vmem [thread:$0]  (!%p8569_p1), %s10278_s9, 8192, %s440_s30, [#allocation9], %s10320_s11, %s10320_s11, %s10319_s15  }
  0x66   : > { %p6867_p5 = scmp.ge.s32.totalorder %s8409_s23, 2 }
  0x67   : > { %p10321_p3 = scmp.ne.s32.totalorder (!%p6867_p5), %s10310_s29, 0 }
  0x68   : > { %464 = sbr.rel (%p6867_p5) target bundleno = 123 (0x7b), region = 72 }
  0x6f   : > { %467 = sbr.rel (!%p10321_p3) target bundleno = 123 (0x7b), region = 76  ;;  %s469_s18 = sand.u32 (%p10321_p3), 1, %s8405_s22  }
  0x70   : > { %s7474_s8 = sshll.u32 (%p10321_p3), %s8409_s23, 6  ;;  %s6868_s24 = sshll.u32 (%p10321_p3), %s469_s18, 7 }
  0x71   : > { %s8656_s28 = scalar_lea.vmem (%p10321_p3), %s10271_s2, %s7474_s8  ;;  %s471_s29 = scalar_lea.vmem (%p10321_p3), [#allocation4], %s6868_s24 }
  0x72   : > { %v490_v1 = vld [vmem:[%s8656_s28] sm:$0xff] (%p10321_p3)   ;;  %v494_v2 = vld [vmem:[%s8656_s28 + $0x8] sm:$0xff] (%p10321_p3)   ;;  %v498_v3 = vld [vmem:[%s8656_s28 + $0x10] sm:$0xff] (%p10321_p3)  }
  0x73   : > { %491 = vst [vmem:[%s471_s29] sm:$0xff] (%p10321_p3), %v490_v1   ;;  %495 = vst [vmem:[%s471_s29 + $0x8] sm:$0xff] (%p10321_p3), %v494_v2   ;;  %v502_v4 = vld [vmem:[%s8656_s28 + $0x18] sm:$0xff] (%p10321_p3)   ;;  %v506_v5 = vld [vmem:[%s8656_s28 + $0x20] sm:$0xff] (%p10321_p3)  }
  0x74   : > { %499 = vst [vmem:[%s471_s29 + $0x10] sm:$0xff] (%p10321_p3), %v498_v3   ;;  %v510_v6 = vld [vmem:[%s8656_s28 + $0x28] sm:$0xff] (%p10321_p3)   ;;  %503 = vst [vmem:[%s471_s29 + $0x18] sm:$0xff] (%p10321_p3), %v502_v4   ;;  %v514_v7 = vld [vmem:[%s8656_s28 + $0x30] sm:$0xff] (%p10321_p3)  }
  0x75   : > { %507 = vst [vmem:[%s471_s29 + $0x20] sm:$0xff] (%p10321_p3), %v506_v5   ;;  %511 = vst [vmem:[%s471_s29 + $0x28] sm:$0xff] (%p10321_p3), %v510_v6   ;;  %v518_v8 = vld [vmem:[%s8656_s28 + $0x38] sm:$0xff] (%p10321_p3)   ;;  %v522_v9 = vld [vmem:[%s8656_s28 + $0x80] sm:$0xff] (%p10321_p3)  }
  0x76   : > { %515 = vst [vmem:[%s471_s29 + $0x30] sm:$0xff] %v514_v7   ;;  %519 = vst [vmem:[%s471_s29 + $0x38] sm:$0xff] %v518_v8   ;;  %v526_v10 = vld [vmem:[%s8656_s28 + $0x88] sm:$0xff]   ;;  %v530_v11 = vld [vmem:[%s8656_s28 + $0x90] sm:$0xff]  }
  0x77   : > { %523 = vst [vmem:[%s471_s29 + $0x40] sm:$0xff] %v522_v9   ;;  %v534_v12 = vld [vmem:[%s8656_s28 + $0x98] sm:$0xff]   ;;  %527 = vst [vmem:[%s471_s29 + $0x48] sm:$0xff] %v526_v10   ;;  %v538_v13 = vld [vmem:[%s8656_s28 + $0xa0] sm:$0xff]  }
  0x78   : > { %531 = vst [vmem:[%s471_s29 + $0x50] sm:$0xff] %v530_v11   ;;  %535 = vst [vmem:[%s471_s29 + $0x58] sm:$0xff] %v534_v12   ;;  %v542_v14 = vld [vmem:[%s8656_s28 + $0xa8] sm:$0xff]   ;;  %v546_v15 = vld [vmem:[%s8656_s28 + $0xb0] sm:$0xff]  }
  0x79   : > { %539 = vst [vmem:[%s471_s29 + $0x60] sm:$0xff] %v538_v13   ;;  %543 = vst [vmem:[%s471_s29 + $0x68] sm:$0xff] %v542_v14   ;;  %v550_v16 = vld [vmem:[%s8656_s28 + $0xb8] sm:$0xff]  }
  0x7a   : > { %547 = vst [vmem:[%s471_s29 + $0x70] sm:$0xff] %v546_v15   ;;  %551 = vst [vmem:[%s471_s29 + $0x78] sm:$0xff] %v550_v16  }
  0x7b PF: > { %p10322_p1 = scmp.ne.s32.totalorder %s10315_s17, 0 }
  0x7d   : > { %643 = sbr.rel (%p10322_p1) target bundleno = 2143 (0x85f), region = 117 }
  0x84   : > { %s8677_s30 = sand.u32 1, %s8401_s21   ;;  %p10323_p6 = scmp.eq.s32.totalorder %s8527_s14, 0 }
  0x85   : > { %s6872_s16 = sshll.u32 %s8677_s30, 7 }
  0x86   : > { %s8680_s26 = scalar_lea.vmem [#allocation4], %s6872_s16 }
  0x87   : > { %8384 = dma.done.wait (%p10323_p6), [#allocation6], 16384   ;;  %p10324_p10 = pmov %p10323_p6 }
  0x88   : > { %p10325_p11 = pmov %p10323_p6 }
  0x89   : > { %8386 = vsyncadd (%p10324_p10), [#allocation6], 4294950912 }
  0x8a   : > { %8388 = dma.done.wait (%p10325_p11), [#allocation9], 40960   ;;  %p10326_p12 = pmov %p10323_p6 }
  0x8b   : > { %s6876_s17 = sshll.u32 %s8677_s30, 1  ;;  %p10327_p13 = scmp.ne.s32.totalorder %s8527_s14, 0 }
  0x8c   : > { %8390 = vsyncadd (%p10326_p12), [#allocation9], 4294926336  ;;  %s8691_s25 = scalar_lea.vmem [#allocation11], %s6876_s17  ;;  %v712_v17 = vld [vmem:[#allocation5] sm:$0xff] (!%p10327_p13)  ;;  %v842_v26 = vlaneseq (!%p10327_p13)  ;;  %v8418_v27 = vmov (!%p10327_p13), 1966171168  }
  0x8d   : > { %710 = sbr.rel (%p10327_p13) target bundleno = 1415 (0x587), region = 137  ;;  %v716_v18 = vld [vmem:[#allocation5 + $0x20] sm:$0xff] (!%p10327_p13)  ;;  %v892_v28 = vunpack.c.l.s4 (!%p10327_p13), %v8418_v27  ;;  %v713_v39 = vld [vmem:[#allocation5 + $0x8] sm:$0xff] (!%p10327_p13)  ;;  %vm4220_vm8 = vcmask (!%p10327_p13), 130048   ;;  %s10328_s28 = sld [smem:[#allocation35_spill]] (!%p10327_p13) }
  0x8e   : > { %v720_v19 = vld [vmem:[#allocation5 + $0x40] sm:$0xff] (!%p10327_p13)  ;;  %v6880_v20 = vcombine.high (!%p10327_p13), %v712_v17, %v716_v18  ;;  %v6879_v21 = vcombine.low (!%p10327_p13), %v712_v17, %v716_v18  ;;  %v8695_v33 = vshrl.u32 (!%p10327_p13), %v842_v26, 7  ;;  %v717_v41 = vld [vmem:[#allocation5 + $0x28] sm:$0xff] (!%p10327_p13)  ;;  %s10329_s17 = sld [smem:[#allocation37_spill]] (!%p10327_p13) }
  0x8f   : > { %v724_v22 = vld [vmem:[#allocation5 + $0x60] sm:$0xff] (!%p10327_p13)  ;;  %v893_v34 = vunpack.c.0.s8 (!%p10327_p13), %v892_v28  ;;  %v8703_v42 = vld.sshfl [vmem:[%s10269_s0] sm:$0x11 pattern:$0x75316420] (!%p10327_p13)  ;;  %v721_v43 = vld [vmem:[#allocation5 + $0x48] sm:$0xff] (!%p10327_p13)  ;;  %v6882_v45 = vcombine.high (!%p10327_p13), %v713_v39, %v717_v41  ;;  %v6881_v46 = vcombine.low (!%p10327_p13), %v713_v39, %v717_v41 }
  0x90   : > { %v6888_v23 = vcombine.high (!%p10327_p13), %v720_v19, %v724_v22  ;;  %v728_v24 = vld [vmem:[#allocation5 + $0x80] sm:$0xff] (!%p10327_p13)  ;;  %1547 = vmatprep.subr.bf16.mxu0 (!%p10327_p13), %v6880_v20  ;;  %v6887_v29 = vcombine.low (!%p10327_p13), %v720_v19, %v724_v22  ;;  %v890_v47 = vcombine.high (!%p10327_p13), %v8703_v42, %v8703_v42  ;;  %v725_v48 = vld [vmem:[#allocation5 + $0x68] sm:$0xff] (!%p10327_p13) }
  0x91   : > { %v732_v25 = vld [vmem:[#allocation5 + $0xa0] sm:$0xff] (!%p10327_p13)  ;;  %1548 = vmatpush1.bf16.msra.mxu0 (!%p10327_p13), %v6879_v21  ;;  %v8698_v40 = vsub.s32 (!%p10327_p13), %v893_v34, %v8695_v33  ;;  %v6890_v50 = vcombine.high (!%p10327_p13), %v721_v43, %v725_v48  ;;  %v729_v51 = vld [vmem:[#allocation5 + $0x88] sm:$0xff] (!%p10327_p13)  ;;  %1588 = vmatprep.subr.bf16.mxu1 (!%p10327_p13), %v6882_v45  ;;  %v6889_v56 = vcombine.low (!%p10327_p13), %v721_v43, %v725_v48 }
  0x92   : > { %1549 = vmatprep.subr.bf16.mxu0 (!%p10327_p13), %v6888_v23  ;;  %v6896_v30 = vcombine.high (!%p10327_p13), %v728_v24, %v732_v25  ;;  %v736_v31 = vld [vmem:[#allocation5 + $0xc0] sm:$0xff] (!%p10327_p13)  ;;  %v6895_v35 = vcombine.low (!%p10327_p13), %v728_v24, %v732_v25  ;;  %v733_v52 = vld [vmem:[#allocation5 + $0xa8] sm:$0xff] (!%p10327_p13)  ;;  %1589 = vmatpush1.bf16.msra.mxu1 (!%p10327_p13), %v6881_v46 }
  0x93   : > { %v740_v32 = vld [vmem:[#allocation5 + $0xe0] sm:$0xff] (!%p10327_p13)  ;;  %v8708_v55 = vrot.slane (!%p10327_p13), %v890_v47, %v8698_v40  ;;  %v6898_v58 = vcombine.high (!%p10327_p13), %v729_v51, %v733_v52  ;;  %1590 = vmatprep.subr.bf16.mxu1 (!%p10327_p13), %v6890_v50  ;;  %v737_v60 = vld [vmem:[#allocation5 + $0xc8] sm:$0xff] (!%p10327_p13)  ;;  %v6897_v0 = vcombine.low (!%p10327_p13), %v729_v51, %v733_v52 }
  0x94   : > { %v6904_v36 = vcombine.high %v736_v31, %v740_v32  ;;  %v744_v37 = vld [vmem:[#allocation5 + $0x100] sm:$0xff]  ;;  %v6903_v44 = vcombine.low %v736_v31, %v740_v32  ;;  %v741_v61 = vld [vmem:[#allocation5 + $0xe8] sm:$0xff] }
  0x95   : > { %1550 = vmatpush1.bf16.msra.mxu0 %v6887_v29  ;;  %v748_v38 = vld [vmem:[#allocation5 + $0x120] sm:$0xff]  ;;  %1579 = vmatprep.mubr.bf16.mxu0 %v8708_v55  ;;  %v6906_v2 = vcombine.high %v737_v60, %v741_v61  ;;  %v745_v4 = vld [vmem:[#allocation5 + $0x108] sm:$0xff]  ;;  %v6905_v8 = vcombine.low %v737_v60, %v741_v61 }
  0x96   : > { %1551 = vmatprep.subr.bf16.mxu0 %v6896_v30  ;;  %v6912_v49 = vcombine.high %v744_v37, %v748_v38  ;;  %v752_v53 = vld [vmem:[#allocation5 + $0x140] sm:$0xff]  ;;  %v6911_v57 = vcombine.low %v744_v37, %v748_v38  ;;  %1620 = vmatprep.mubr.bf16.mxu1 %v8708_v55  ;;  %v749_v5 = vld [vmem:[#allocation5 + $0x128] sm:$0xff] }
  0x97   : > { %v756_v54 = vld [vmem:[#allocation5 + $0x160] sm:$0xff]  ;;  %1591 = vmatpush1.bf16.msra.mxu1 %v6889_v56  ;;  %v6914_v10 = vcombine.high %v745_v4, %v749_v5  ;;  %v753_v12 = vld [vmem:[#allocation5 + $0x148] sm:$0xff]  ;;  %v6913_v16 = vcombine.low %v745_v4, %v749_v5 }
  0x98   : > { %v6920_v59 = vcombine.high %v752_v53, %v756_v54  ;;  %v760_v62 = vld [vmem:[#allocation5 + $0x180] sm:$0xff]  ;;  %v6919_v1 = vcombine.low %v752_v53, %v756_v54  ;;  %1592 = vmatprep.subr.bf16.mxu1 %v6898_v58  ;;  %v757_v13 = vld [vmem:[#allocation5 + $0x168] sm:$0xff] }
  0x99   : > { %1552 = vmatpush1.bf16.msra.mxu0 %v6895_v35  ;;  %v764_v63 = vld [vmem:[#allocation5 + $0x1a0] sm:$0xff]  ;;  %v6922_v18 = vcombine.high %v753_v12, %v757_v13  ;;  %v761_v20 = vld [vmem:[#allocation5 + $0x188] sm:$0xff]  ;;  %v6921_v24 = vcombine.low %v753_v12, %v757_v13 }
  0x9a   : > { %1553 = vmatprep.subr.bf16.mxu0 %v6904_v36  ;;  %v6928_v3 = vcombine.high %v760_v62, %v764_v63  ;;  %v768_v6 = vld [vmem:[#allocation5 + $0x1c0] sm:$0xff]  ;;  %v6927_v9 = vcombine.low %v760_v62, %v764_v63  ;;  %v765_v21 = vld [vmem:[#allocation5 + $0x1a8] sm:$0xff] }
  0x9b   : > { %v772_v7 = vld [vmem:[#allocation5 + $0x1e0] sm:$0xff]  ;;  %1593 = vmatpush1.bf16.msra.mxu1 %v6897_v0  ;;  %v6930_v26 = vcombine.high %v761_v20, %v765_v21  ;;  %v769_v28 = vld [vmem:[#allocation5 + $0x1c8] sm:$0xff]  ;;  %v6929_v32 = vcombine.low %v761_v20, %v765_v21 }
  0x9c   : > { %1594 = vmatprep.subr.bf16.mxu1 %v6906_v2  ;;  %v6936_v11 = vcombine.high %v768_v6, %v772_v7  ;;  %v776_v14 = vld [vmem:[#allocation5 + $0x200] sm:$0xff]  ;;  %v6935_v17 = vcombine.low %v768_v6, %v772_v7  ;;  %v773_v29 = vld [vmem:[#allocation5 + $0x1e8] sm:$0xff] }
  0x9d   : > { %1554 = vmatpush1.bf16.msra.mxu0 %v6903_v44  ;;  %v780_v15 = vld [vmem:[#allocation5 + $0x220] sm:$0xff]  ;;  %v6938_v35 = vcombine.high %v769_v28, %v773_v29  ;;  %v777_v37 = vld [vmem:[#allocation5 + $0x208] sm:$0xff]  ;;  %v6937_v43 = vcombine.low %v769_v28, %v773_v29  ;;  %v8714_v28 = vrot.slane %v8703_v42, %v8698_v40 }
  0x9e   : > { %1555 = vmatprep.subr.bf16.mxu0 %v6912_v49  ;;  %v6944_v19 = vcombine.high %v776_v14, %v780_v15  ;;  %v784_v22 = vld [vmem:[#allocation5 + $0x240] sm:$0xff]  ;;  %v6943_v25 = vcombine.low %v776_v14, %v780_v15  ;;  %v781_v38 = vld [vmem:[#allocation5 + $0x228] sm:$0xff] }
  0x9f   : > { %1595 = vmatpush1.bf16.msra.mxu1 %v6905_v8  ;;  %v788_v23 = vld [vmem:[#allocation5 + $0x260] sm:$0xff]  ;;  %v6946_v45 = vcombine.high %v777_v37, %v781_v38  ;;  %v785_v47 = vld [vmem:[#allocation5 + $0x248] sm:$0xff]  ;;  %v6945_v51 = vcombine.low %v777_v37, %v781_v38  ;;  %v734_v37 = vld [vmem:[#allocation5 + $0xb0] sm:$0xff] }
  0xa0   : > { %1596 = vmatprep.subr.bf16.mxu1 %v6914_v10  ;;  %v6952_v27 = vcombine.high %v784_v22, %v788_v23  ;;  %v792_v30 = vld [vmem:[#allocation5 + $0x280] sm:$0xff]  ;;  %v6951_v34 = vcombine.low %v784_v22, %v788_v23  ;;  %v789_v48 = vld [vmem:[#allocation5 + $0x268] sm:$0xff] }
  0xa1   : > { %1556 = vmatpush1.bf16.msra.mxu0 %v6911_v57  ;;  %v796_v31 = vld [vmem:[#allocation5 + $0x2a0] sm:$0xff]  ;;  %v6954_v53 = vcombine.high %v785_v47, %v789_v48  ;;  %v793_v56 = vld [vmem:[#allocation5 + $0x288] sm:$0xff]  ;;  %v6953_v60 = vcombine.low %v785_v47, %v789_v48 }
  0xa2   : > { %1557 = vmatprep.subr.bf16.mxu0 %v6920_v59  ;;  %v6960_v36 = vcombine.high %v792_v30, %v796_v31  ;;  %v800_v39 = vld [vmem:[#allocation5 + $0x2c0] sm:$0xff]  ;;  %v6959_v44 = vcombine.low %v792_v30, %v796_v31  ;;  %v797_v57 = vld [vmem:[#allocation5 + $0x2a8] sm:$0xff] }
  0xa3   : > { %1597 = vmatpush1.bf16.msra.mxu1 %v6913_v16  ;;  %v804_v41 = vld [vmem:[#allocation5 + $0x2e0] sm:$0xff]  ;;  %v6962_v62 = vcombine.high %v793_v56, %v797_v57  ;;  %v801_v0 = vld [vmem:[#allocation5 + $0x2c8] sm:$0xff]  ;;  %v6961_v4 = vcombine.low %v793_v56, %v797_v57 }
  0xa4   : > { %1598 = vmatprep.subr.bf16.mxu1 %v6922_v18  ;;  %v6968_v46 = vcombine.high %v800_v39, %v804_v41  ;;  %v808_v49 = vld [vmem:[#allocation5 + $0x300] sm:$0xff]  ;;  %v6967_v52 = vcombine.low %v800_v39, %v804_v41  ;;  %v809_v8 = vld [vmem:[#allocation5 + $0x308] sm:$0xff]  ;;  %v714_v18 = vld [vmem:[#allocation5 + $0x10] sm:$0xff] }
  0xa5   : > { %1558 = vmatpush1.bf16.msra.mxu0 %v6919_v1  ;;  %v812_v50 = vld [vmem:[#allocation5 + $0x320] sm:$0xff]  ;;  %v805_v1 = vld [vmem:[#allocation5 + $0x2e8] sm:$0xff]  ;;  %v715_v41 = vld [vmem:[#allocation5 + $0x18] sm:$0xff] }
  0xa6   : > { %1559 = vmatprep.subr.bf16.mxu0 %v6928_v3  ;;  %v6976_v54 = vcombine.high %v808_v49, %v812_v50  ;;  %v816_v58 = vld [vmem:[#allocation5 + $0x340] sm:$0xff]  ;;  %v6975_v61 = vcombine.low %v808_v49, %v812_v50  ;;  %v6970_v6 = vcombine.high %v801_v0, %v805_v1  ;;  %v6969_v12 = vcombine.low %v801_v0, %v805_v1  ;;  %v817_v16 = vld [vmem:[#allocation5 + $0x348] sm:$0xff]  ;;  %v723_v50 = vld [vmem:[#allocation5 + $0x58] sm:$0xff] }
  0xa7   : > { %1599 = vmatpush1.bf16.msra.mxu1 %v6921_v24  ;;  %v820_v59 = vld [vmem:[#allocation5 + $0x360] sm:$0xff]  ;;  %v825_v23 = vld [vmem:[#allocation5 + $0x388] sm:$0xff]  ;;  %v762_v1 = vld [vmem:[#allocation5 + $0x190] sm:$0xff] }
  0xa8   : > { %1600 = vmatprep.subr.bf16.mxu1 %v6930_v26  ;;  %v6984_v63 = vcombine.high %v816_v58, %v820_v59  ;;  %v824_v2 = vld [vmem:[#allocation5 + $0x380] sm:$0xff]  ;;  %v6983_v5 = vcombine.low %v816_v58, %v820_v59  ;;  %v829_v24 = vld [vmem:[#allocation5 + $0x3a8] sm:$0xff]  ;;  %v722_v26 = vld [vmem:[#allocation5 + $0x50] sm:$0xff] }
  0xa9   : > { %1560 = vmatpush1.bf16.msra.mxu0 %v6927_v9  ;;  %v828_v3 = vld [vmem:[#allocation5 + $0x3a0] sm:$0xff]  ;;  %v813_v9 = vld [vmem:[#allocation5 + $0x328] sm:$0xff]  ;;  %v6994_v30 = vcombine.high %v825_v23, %v829_v24  ;;  %v6993_v38 = vcombine.low %v825_v23, %v829_v24  ;;  %v731_v59 = vld [vmem:[#allocation5 + $0x98] sm:$0xff] }
  0xaa   : > { %1561 = vmatprep.subr.bf16.mxu0 %v6936_v11  ;;  %v6992_v7 = vcombine.high %v824_v2, %v828_v3  ;;  %v832_v10 = vld [vmem:[#allocation5 + $0x3c0] sm:$0xff]  ;;  %v6991_v13 = vcombine.low %v824_v2, %v828_v3  ;;  %v6978_v14 = vcombine.high %v809_v8, %v813_v9  ;;  %v6977_v20 = vcombine.low %v809_v8, %v813_v9  ;;  %v766_v2 = vld [vmem:[#allocation5 + $0x1b0] sm:$0xff]  ;;  %v747_v8 = vld [vmem:[#allocation5 + $0x118] sm:$0xff] }
  0xab   : > { %1601 = vmatpush1.bf16.msra.mxu1 %v6929_v32  ;;  %v836_v11 = vld [vmem:[#allocation5 + $0x3e0] sm:$0xff]  ;;  %v833_v32 = vld [vmem:[#allocation5 + $0x3c8] sm:$0xff]  ;;  %v751_v9 = vld [vmem:[#allocation5 + $0x138] sm:$0xff] }
  0xac   : > { %1602 = vmatprep.subr.bf16.mxu1 %v6938_v35  ;;  %v7000_v15 = vcombine.high %v832_v10, %v836_v11  ;;  %v6999_v21 = vcombine.low %v832_v10, %v836_v11  ;;  %v770_v11 = vld [vmem:[#allocation5 + $0x1d0] sm:$0xff]  ;;  %v763_v23 = vld [vmem:[#allocation5 + $0x198] sm:$0xff] }
  0xad   : > { %1562 = vmatpush1.bf16.msra.mxu0 %v6935_v17  ;;  %v821_v17 = vld [vmem:[#allocation5 + $0x368] sm:$0xff]  ;;  %v767_v24 = vld [vmem:[#allocation5 + $0x1b8] sm:$0xff] }
  0xae   : > { %1563 = vmatprep.subr.bf16.mxu0 %v6944_v19  ;;  %v718_v19 = vld [vmem:[#allocation5 + $0x30] sm:$0xff]  ;;  %v6986_v22 = vcombine.high %v817_v16, %v821_v17  ;;  %v6985_v29 = vcombine.low %v817_v16, %v821_v17  ;;  %v759_v16 = vld [vmem:[#allocation5 + $0x178] sm:$0xff]  ;;  %v6931_v17 = vcombine.low %v762_v1, %v766_v2 }
  0xaf   : > { %1603 = vmatpush1.bf16.msra.mxu1 %v6937_v43  ;;  %v6883_v31 = vcombine.low %v714_v18, %v718_v19  ;;  %v719_v43 = vld [vmem:[#allocation5 + $0x38] sm:$0xff] }
  0xb0   : > { %1604 = vmatprep.subr.bf16.mxu1 %v6946_v45  ;;  %v742_v45 = vld [vmem:[#allocation5 + $0xf0] sm:$0xff]  ;;  %v6886_v48 = vcombine.high %v715_v41, %v719_v43 }
  0xb1   : > { %1564 = vmatpush1.bf16.msra.mxu0 %v6943_v25  ;;  %v6884_v25 = vcombine.high %v714_v18, %v718_v19  ;;  %v778_v18 = vld [vmem:[#allocation5 + $0x210] sm:$0xff] }
  0xb2   : > { %1565 = vmatprep.subr.bf16.mxu0 %v6952_v27  ;;  %v726_v27 = vld [vmem:[#allocation5 + $0x70] sm:$0xff] }
  0xb3   : > { %1605 = vmatpush1.bf16.msra.mxu1 %v6945_v51  ;;  %v6892_v35 = vcombine.high %v722_v26, %v726_v27  ;;  %v6891_v40 = vcombine.low %v722_v26, %v726_v27  ;;  %v727_v51 = vld [vmem:[#allocation5 + $0x78] sm:$0xff]  ;;  %v782_v19 = vld [vmem:[#allocation5 + $0x230] sm:$0xff] }
  0xb4   : > { %1606 = vmatprep.subr.bf16.mxu1 %v6954_v53  ;;  %v750_v53 = vld [vmem:[#allocation5 + $0x130] sm:$0xff]  ;;  %v6894_v57 = vcombine.high %v723_v50, %v727_v51 }
  0xb5   : > { %1566 = vmatpush1.bf16.msra.mxu0 %v6951_v34  ;;  %v837_v34 = vld [vmem:[#allocation5 + $0x3e8] sm:$0xff]  ;;  %v786_v26 = vld [vmem:[#allocation5 + $0x250] sm:$0xff] }
  0xb6   : > { %1567 = vmatprep.subr.bf16.mxu0 %v6960_v36  ;;  %v730_v36 = vld [vmem:[#allocation5 + $0x90] sm:$0xff]  ;;  %v7002_v39 = vcombine.high %v833_v32, %v837_v34 }
  0xb7   : > { %1607 = vmatpush1.bf16.msra.mxu1 %v6953_v60  ;;  %v6900_v42 = vcombine.high %v730_v36, %v734_v37  ;;  %v6899_v47 = vcombine.low %v730_v36, %v734_v37  ;;  %v735_v60 = vld [vmem:[#allocation5 + $0xb8] sm:$0xff]  ;;  %v790_v27 = vld [vmem:[#allocation5 + $0x270] sm:$0xff] }
  0xb8   : > { %1608 = vmatprep.subr.bf16.mxu1 %v6962_v62  ;;  %v758_v62 = vld [vmem:[#allocation5 + $0x170] sm:$0xff]  ;;  %v6902_v3 = vcombine.high %v731_v59, %v735_v60 }
  0xb9   : > { %1568 = vmatpush1.bf16.msra.mxu0 %v6959_v44  ;;  %v738_v44 = vld [vmem:[#allocation5 + $0xd0] sm:$0xff] }
  0xba   : > { %1569 = vmatprep.subr.bf16.mxu0 %v6968_v46  ;;  %v7001_v46 = vcombine.low %v833_v32, %v837_v34  ;;  %v6908_v49 = vcombine.high %v738_v44, %v742_v45  ;;  %v6907_v56 = vcombine.low %v738_v44, %v742_v45  ;;  %v771_v32 = vld [vmem:[#allocation5 + $0x1d8] sm:$0xff]  ;;  %v794_v36 = vld [vmem:[#allocation5 + $0x290] sm:$0xff] }
  0xbb   : > { %1609 = vmatpush1.bf16.msra.mxu1 %v6961_v4  ;;  %v739_v4 = vld [vmem:[#allocation5 + $0xd8] sm:$0xff]  ;;  %v798_v37 = vld [vmem:[#allocation5 + $0x2b0] sm:$0xff] }
  0xbc   : > { %1610 = vmatprep.subr.bf16.mxu1 %v6970_v6  ;;  %v775_v34 = vld [vmem:[#allocation5 + $0x1f8] sm:$0xff]  ;;  %v802_v44 = vld [vmem:[#allocation5 + $0x2d0] sm:$0xff] }
  0xbd   : > { %1570 = vmatpush1.bf16.msra.mxu0 %v6967_v52  ;;  %v746_v52 = vld [vmem:[#allocation5 + $0x110] sm:$0xff] }
  0xbe   : > { %1571 = vmatprep.subr.bf16.mxu0 %v6976_v54  ;;  %v6885_v54 = vcombine.low %v715_v41, %v719_v43  ;;  %v6916_v58 = vcombine.high %v746_v52, %v750_v53  ;;  %v6915_v0 = vcombine.low %v746_v52, %v750_v53  ;;  %v783_v41 = vld [vmem:[#allocation5 + $0x238] sm:$0xff]  ;;  %v6955_v43 = vcombine.low %v786_v26, %v790_v27  ;;  %v806_v45 = vld [vmem:[#allocation5 + $0x2f0] sm:$0xff] }
  0xbf   : > { %1611 = vmatpush1.bf16.msra.mxu1 %v6969_v12  ;;  %v774_v12 = vld [vmem:[#allocation5 + $0x1f0] sm:$0xff] }
  0xc0   : > { %1612 = vmatprep.subr.bf16.mxu1 %v6978_v14  ;;  %v810_v52 = vld [vmem:[#allocation5 + $0x310] sm:$0xff] }
  0xc1   : > { %1572 = vmatpush1.bf16.msra.mxu0 %v6975_v61  ;;  %v754_v61 = vld [vmem:[#allocation5 + $0x150] sm:$0xff] }
  0xc2   : > { %1573 = vmatprep.subr.bf16.mxu0 %v6984_v63  ;;  %v6893_v63 = vcombine.low %v723_v50, %v727_v51  ;;  %v6924_v6 = vcombine.high %v754_v61, %v758_v62  ;;  %v6923_v10 = vcombine.low %v754_v61, %v758_v62  ;;  %v791_v50 = vld [vmem:[#allocation5 + $0x278] sm:$0xff]  ;;  %v6963_v51 = vcombine.low %v794_v36, %v798_v37  ;;  %v814_v53 = vld [vmem:[#allocation5 + $0x330] sm:$0xff] }
  0xc3   : > { %1613 = vmatpush1.bf16.msra.mxu1 %v6977_v20  ;;  %v6918_v20 = vcombine.high %v747_v8, %v751_v9  ;;  %v818_v61 = vld [vmem:[#allocation5 + $0x350] sm:$0xff] }
  0xc4   : > { %1614 = vmatprep.subr.bf16.mxu1 %v6986_v22  ;;  %v6917_v22 = vcombine.low %v747_v8, %v751_v9  ;;  %v822_v62 = vld [vmem:[#allocation5 + $0x370] sm:$0xff] }
  0xc5   : > { %1574 = vmatpush1.bf16.msra.mxu0 %v6983_v5  ;;  %v743_v5 = vld [vmem:[#allocation5 + $0xf8] sm:$0xff]  ;;  %v6988_v8 = vcombine.high %v818_v61, %v822_v62 }
  0xc6   : > { %1575 = vmatprep.subr.bf16.mxu0 %v6992_v7  ;;  %v6901_v7 = vcombine.low %v731_v59, %v735_v60  ;;  %v6909_v14 = vcombine.low %v739_v4, %v743_v5  ;;  %v799_v59 = vld [vmem:[#allocation5 + $0x2b8] sm:$0xff]  ;;  %v6971_v60 = vcombine.low %v802_v44, %v806_v45 }
  0xc7   : > { %1615 = vmatpush1.bf16.msra.mxu1 %v6985_v29 }
  0xc8   : > { %1616 = vmatprep.subr.bf16.mxu1 %v6994_v30  ;;  %v6948_v30 = vcombine.high %v778_v18, %v782_v19 }
  0xc9   : > { %1576 = vmatpush1.bf16.msra.mxu0 %v6991_v13  ;;  %v6932_v13 = vcombine.high %v762_v1, %v766_v2  ;;  %v803_v2 = vld [vmem:[#allocation5 + $0x2d8] sm:$0xff] }
  0xca   : > { %1577 = vmatprep.subr.bf16.mxu0 %v7000_v15  ;;  %v755_v15 = vld [vmem:[#allocation5 + $0x158] sm:$0xff] }
  0xcb   : > { %1617 = vmatpush1.bf16.msra.mxu1 %v6993_v38  ;;  %v6926_v29 = vcombine.high %v755_v15, %v759_v16  ;;  %v6934_v38 = vcombine.high %v763_v23, %v767_v24 }
  0xcc   : > { %1618 = vmatprep.subr.bf16.mxu1 %v7002_v39  ;;  %v6956_v39 = vcombine.high %v786_v26, %v790_v27 }
  0xcd   : > { %1578 = vmatpush1.bf16.msra.mxu0 %v6999_v21  ;;  %v6940_v21 = vcombine.high %v770_v11, %v774_v12 }
  0xce   : > { %1629 = vmatprep.subr.bf16.mxu0 %v6884_v25  ;;  %v6939_v25 = vcombine.low %v770_v11, %v774_v12  ;;  %v815_v11 = vld [vmem:[#allocation5 + $0x338] sm:$0xff]  ;;  %v6987_v12 = vcombine.low %v818_v61, %v822_v62  ;;  %v7629_v62 = vld [vmem:[#allocation8 + $0xe0] ss:$16 sps:$4 sm:$0xff]  }
  0xcf   : > { %1619 = vmatpush1.bf16.msra.mxu1 %v7001_v46  ;;  %v6942_v46 = vcombine.high %v771_v32, %v775_v34  ;;  %v7622_v61 = vld [vmem:[#allocation8 + $0xac] ss:$16 sps:$4 sm:$0xff]  }
  0xd0   : > { %1580 = vmatmul.mubr.bf16.vlgmr.msra.gmra.mrb[0].mxu0 %v8714_v28  ;;  %1670 = vmatprep.subr.bf16.mxu1 %v6886_v48  ;;  %v6941_v48 = vcombine.low %v771_v32, %v775_v34  ;;  %v839_v32 = vld [vmem:[#allocation5 + $0x3f8] sm:$0xff]  ;;  %v7595_v34 = vld [vmem:[#allocation8 + $0x24] ss:$16 sps:$4 sm:$0xff]  }
  0xd1   : > { %1630 = vmatpush1.bf16.msra.mxu0 %v6883_v31  ;;  %1661 = vmatprep.mubr.bf16.mxu0 %v8708_v55  ;;  %v6925_v31 = vcombine.low %v755_v15, %v759_v16 }
  0xd2   : > { %1631 = vmatprep.subr.bf16.mxu0 %v6892_v35  ;;  %1621 = vmatmul.mubr.bf16.vlgmr.msra.gmra.mrb[0].mxu1 %v8714_v28  ;;  %v6947_v35 = vcombine.low %v778_v18, %v782_v19  ;;  %v823_v18 = vld [vmem:[#allocation5 + $0x378] sm:$0xff] }
  0xd3   : > { %1671 = vmatpush1.bf16.msra.mxu1 %v6885_v54  ;;  %1702 = vmatprep.mubr.bf16.mxu1 %v8708_v55  ;;  %v6910_v55 = vcombine.high %v739_v4, %v743_v5  ;;  %v6979_v4 = vcombine.low %v810_v52, %v814_v53  ;;  %v826_v5 = vld [vmem:[#allocation5 + $0x390] sm:$0xff] }
  0xd4   : > { %1672 = vmatprep.subr.bf16.mxu1 %v6894_v57 }
  0xd5   : > { %1632 = vmatpush1.bf16.msra.mxu0 %v6891_v40  ;;  %v6933_v40 = vcombine.low %v763_v23, %v767_v24  ;;  %v827_v23 = vld [vmem:[#allocation5 + $0x398] sm:$0xff] }
  0xd6   : > { %1633 = vmatprep.subr.bf16.mxu0 %v6900_v42  ;;  %v779_v42 = vld [vmem:[#allocation5 + $0x218] sm:$0xff] }
  0xd7   : > { %1673 = vmatpush1.bf16.msra.mxu1 %v6893_v63  ;;  %v6950_v54 = vcombine.high %v779_v42, %v783_v41  ;;  %v6949_v57 = vcombine.low %v779_v42, %v783_v41  ;;  %v831_v24 = vld [vmem:[#allocation5 + $0x3b8] sm:$0xff]  ;;  %v7599_v42 = vld [vmem:[#allocation8 + $0x40] ss:$16 sps:$4 sm:$0xff]  }
  0xd8   : > { %1674 = vmatprep.subr.bf16.mxu1 %v6902_v3  ;;  %v807_v3 = vld [vmem:[#allocation5 + $0x2f8] sm:$0xff] }
  0xd9   : > { %1634 = vmatpush1.bf16.msra.mxu0 %v6899_v47  ;;  %v6964_v47 = vcombine.high %v794_v36, %v798_v37  ;;  %v6973_v16 = vcombine.low %v803_v2, %v807_v3  ;;  %v7593_v36 = vld [vmem:[#allocation8 + $0x20] ss:$16 sps:$4 sm:$0xff]   ;;  %v6997_v37 = vcombine.low %v827_v23, %v831_v24 }
  0xda   : > { %1635 = vmatprep.subr.bf16.mxu0 %v6908_v49  ;;  %v787_v49 = vld [vmem:[#allocation5 + $0x258] sm:$0xff] }
  0xdb   : > { %1675 = vmatpush1.bf16.msra.mxu1 %v6901_v7  ;;  %v6958_v63 = vcombine.high %v787_v49, %v791_v50  ;;  %v6957_v1 = vcombine.low %v787_v49, %v791_v50  ;;  %v7604_v49 = vld [vmem:[#allocation8 + $0x4c] ss:$16 sps:$4 sm:$0xff]   ;;  %v7611_v50 = vld [vmem:[#allocation8 + $0x80] ss:$16 sps:$4 sm:$0xff]  }
  0xdc   : > { %1676 = vmatprep.subr.bf16.mxu1 %v6910_v55  ;;  %v834_v55 = vld [vmem:[#allocation5 + $0x3d0] sm:$0xff] }
  0xdd   : > { %1636 = vmatpush1.bf16.msra.mxu0 %v6907_v56  ;;  %v6972_v56 = vcombine.high %v802_v44, %v806_v45  ;;  %v7590_v44 = vld [vmem:[#allocation8 + $0x8] ss:$16 sps:$4 sm:$0xff]   ;;  %v7598_v45 = vld [vmem:[#allocation8 + $0x2c] ss:$16 sps:$4 sm:$0xff]  }
  0xde   : > { %1637 = vmatprep.subr.bf16.mxu0 %v6916_v58  ;;  %v795_v58 = vld [vmem:[#allocation5 + $0x298] sm:$0xff] }
  0xdf   : > { %1677 = vmatpush1.bf16.msra.mxu1 %v6909_v14  ;;  %v6966_v7 = vcombine.high %v795_v58, %v799_v59  ;;  %v6965_v9 = vcombine.low %v795_v58, %v799_v59  ;;  %v6974_v14 = vcombine.high %v803_v2, %v807_v3  ;;  %v7616_v58 = vld [vmem:[#allocation8 + $0x8c] ss:$16 sps:$4 sm:$0xff]   ;;  %v7623_v59 = vld [vmem:[#allocation8 + $0xc0] ss:$16 sps:$4 sm:$0xff]   ;;  %v7626_v3 = vld [vmem:[#allocation8 + $0xc8] ss:$16 sps:$4 sm:$0xff]  }
  0xe0   : > { %1678 = vmatprep.subr.bf16.mxu1 %v6918_v20  ;;  %v7635_v2 = vld [vmem:[#allocation8 + $0x100] ss:$16 sps:$4 sm:$0xff]  }
  0xe1   : > { %1638 = vmatpush1.bf16.msra.mxu0 %v6915_v0  ;;  %v6980_v0 = vcombine.high %v810_v52, %v814_v53  ;;  %v7602_v52 = vld [vmem:[#allocation8 + $0x48] ss:$16 sps:$4 sm:$0xff]   ;;  %v7610_v53 = vld [vmem:[#allocation8 + $0x6c] ss:$16 sps:$4 sm:$0xff]  }
  0xe2   : > { %1639 = vmatprep.subr.bf16.mxu0 %v6924_v6  ;;  %v830_v6 = vld [vmem:[#allocation5 + $0x3b0] sm:$0xff] }
  0xe3   : > { %1679 = vmatpush1.bf16.msra.mxu1 %v6917_v22  ;;  %v6996_v15 = vcombine.high %v826_v5, %v830_v6  ;;  %v6995_v19 = vcombine.low %v826_v5, %v830_v6  ;;  %v7634_v5 = vld [vmem:[#allocation8 + $0xec] ss:$16 sps:$4 sm:$0xff]   ;;  %v7641_v6 = vld [vmem:[#allocation8 + $0x120] ss:$16 sps:$4 sm:$0xff]  }
  0xe4   : > { %1680 = vmatprep.subr.bf16.mxu1 %v6926_v29  ;;  %v7587_v29 = vld [vmem:[#allocation8] ss:$16 sps:$4 sm:$0xff]  }
  0xe5   : > { %1640 = vmatpush1.bf16.msra.mxu0 %v6923_v10  ;;  %v811_v10 = vld [vmem:[#allocation5 + $0x318] sm:$0xff] }
  0xe6   : > { %1641 = vmatprep.subr.bf16.mxu0 %v6932_v13  ;;  %v838_v13 = vld [vmem:[#allocation5 + $0x3f0] sm:$0xff]  ;;  %v6982_v20 = vcombine.high %v811_v10, %v815_v11  ;;  %v6981_v22 = vcombine.low %v811_v10, %v815_v11  ;;  %v7638_v11 = vld [vmem:[#allocation8 + $0x108] ss:$16 sps:$4 sm:$0xff]  }
  0xe7   : > { %1681 = vmatpush1.bf16.msra.mxu1 %v6925_v31  ;;  %v7003_v26 = vcombine.low %v834_v55, %v838_v13  ;;  %v835_v31 = vld [vmem:[#allocation5 + $0x3d8] sm:$0xff]  ;;  %v7647_v10 = vld [vmem:[#allocation8 + $0x140] ss:$16 sps:$4 sm:$0xff]  }
  0xe8   : > { %1682 = vmatprep.subr.bf16.mxu1 %v6934_v38  ;;  %v7601_v38 = vld [vmem:[#allocation8 + $0x44] ss:$16 sps:$4 sm:$0xff]   ;;  %v7005_v41 = vcombine.low %v835_v31, %v839_v32 }
  0xe9   : > { %1642 = vmatpush1.bf16.msra.mxu0 %v6931_v17  ;;  %v819_v17 = vld [vmem:[#allocation5 + $0x358] sm:$0xff] }
  0xea   : > { %1643 = vmatprep.subr.bf16.mxu0 %v6940_v21  ;;  %v7004_v21 = vcombine.high %v834_v55, %v838_v13  ;;  %v6990_v27 = vcombine.high %v819_v17, %v823_v18  ;;  %v7646_v55 = vld [vmem:[#allocation8 + $0x12c] ss:$16 sps:$4 sm:$0xff]   ;;  %v7653_v13 = vld [vmem:[#allocation8 + $0x160] ss:$16 sps:$4 sm:$0xff]  }
  0xeb   : > { %1683 = vmatpush1.bf16.msra.mxu1 %v6933_v40  ;;  %v7592_v40 = vld [vmem:[#allocation8 + $0xc] ss:$16 sps:$4 sm:$0xff]  }
  0xec   : > { %1684 = vmatprep.subr.bf16.mxu1 %v6942_v46  ;;  %v7605_v46 = vld [vmem:[#allocation8 + $0x60] ss:$16 sps:$4 sm:$0xff]  }
  0xed   : > { %1644 = vmatpush1.bf16.msra.mxu0 %v6939_v25  ;;  %v7589_v25 = vld [vmem:[#allocation8 + $0x4] ss:$16 sps:$4 sm:$0xff]  }
  0xee   : > { %1645 = vmatprep.subr.bf16.mxu0 %v6948_v30  ;;  %v6989_v30 = vcombine.low %v819_v17, %v823_v18  ;;  %v7659_v17 = vld [vmem:[#allocation8 + $0x180] ss:$16 sps:$4 sm:$0xff]   ;;  %v7650_v18 = vld [vmem:[#allocation8 + $0x148] ss:$16 sps:$4 sm:$0xff]  }
  0xef   : > { %1685 = vmatpush1.bf16.msra.mxu1 %v6941_v48  ;;  %v7596_v48 = vld [vmem:[#allocation8 + $0x28] ss:$16 sps:$4 sm:$0xff]  }
  0xf0   : > { %1686 = vmatprep.subr.bf16.mxu1 %v6950_v54  ;;  %v7617_v54 = vld [vmem:[#allocation8 + $0xa0] ss:$16 sps:$4 sm:$0xff]  }
  0xf1   : > { %1646 = vmatpush1.bf16.msra.mxu0 %v6947_v35  ;;  %v6998_v35 = vcombine.high %v827_v23, %v831_v24  ;;  %v7673_v23 = vld [vmem:[#allocation8 + $0x1c4] ss:$16 sps:$4 sm:$0xff]   ;;  %v7664_v24 = vld [vmem:[#allocation8 + $0x18c] ss:$16 sps:$4 sm:$0xff]  }
  0xf2   : > { %1647 = vmatprep.subr.bf16.mxu0 %v6956_v39  ;;  %v7006_v39 = vcombine.high %v835_v31, %v839_v32  ;;  %v7685_v31 = vld [vmem:[#allocation8 + $0x204] ss:$16 sps:$4 sm:$0xff]   ;;  %v7668_v32 = vld [vmem:[#allocation8 + $0x1a8] ss:$16 sps:$4 sm:$0xff]  }
  0xf3   : > { %1687 = vmatpush1.bf16.msra.mxu1 %v6949_v57  ;;  %v7625_v57 = vld [vmem:[#allocation8 + $0xc4] ss:$16 sps:$4 sm:$0xff]  }
  0xf4   : > { %1688 = vmatprep.subr.bf16.mxu1 %v6958_v63  ;;  %v7620_v63 = vld [vmem:[#allocation8 + $0xa8] ss:$16 sps:$4 sm:$0xff]  }
  0xf5   : > { %1648 = vmatpush1.bf16.msra.mxu0 %v6955_v43  ;;  %v7607_v43 = vld [vmem:[#allocation8 + $0x64] ss:$16 sps:$4 sm:$0xff]  }
  0xf6   : > { %1649 = vmatprep.subr.bf16.mxu0 %v6964_v47  ;;  %v7613_v47 = vld [vmem:[#allocation8 + $0x84] ss:$16 sps:$4 sm:$0xff]  }
  0xf7   : > { %1689 = vmatpush1.bf16.msra.mxu1 %v6957_v1  ;;  %v7628_v1 = vld [vmem:[#allocation8 + $0xcc] ss:$16 sps:$4 sm:$0xff]  }
  0xf8   : > { %1690 = vmatprep.subr.bf16.mxu1 %v6966_v7  ;;  %v7632_v7 = vld [vmem:[#allocation8 + $0xe8] ss:$16 sps:$4 sm:$0xff]  }
  0xf9   : > { %1650 = vmatpush1.bf16.msra.mxu0 %v6963_v51  ;;  %v7619_v51 = vld [vmem:[#allocation8 + $0xa4] ss:$16 sps:$4 sm:$0xff]  }
  0xfa   : > { %1651 = vmatprep.subr.bf16.mxu0 %v6972_v56  ;;  %v7608_v56 = vld [vmem:[#allocation8 + $0x68] ss:$16 sps:$4 sm:$0xff]  }
  0xfb   : > { %1691 = vmatpush1.bf16.msra.mxu1 %v6965_v9  ;;  %v7640_v9 = vld [vmem:[#allocation8 + $0x10c] ss:$16 sps:$4 sm:$0xff]  }
  0xfc   : > { %1692 = vmatprep.subr.bf16.mxu1 %v6974_v14  ;;  %v7644_v14 = vld [vmem:[#allocation8 + $0x128] ss:$16 sps:$4 sm:$0xff]  }
  0xfd   : > { %1652 = vmatpush1.bf16.msra.mxu0 %v6971_v60  ;;  %v7631_v60 = vld [vmem:[#allocation8 + $0xe4] ss:$16 sps:$4 sm:$0xff]  }
  0xfe   : > { %1653 = vmatprep.subr.bf16.mxu0 %v6980_v0  ;;  %v7637_v0 = vld [vmem:[#allocation8 + $0x104] ss:$16 sps:$4 sm:$0xff]  }
  0xff   : > { %1693 = vmatpush1.bf16.msra.mxu1 %v6973_v16  ;;  %v7652_v16 = vld [vmem:[#allocation8 + $0x14c] ss:$16 sps:$4 sm:$0xff]  }
 0x100   : > { %1694 = vmatprep.subr.bf16.mxu1 %v6982_v20  ;;  %v7658_v20 = vld [vmem:[#allocation8 + $0x16c] ss:$16 sps:$4 sm:$0xff]  }
 0x101   : > { %1654 = vmatpush1.bf16.msra.mxu0 %v6979_v4  ;;  %v7643_v4 = vld [vmem:[#allocation8 + $0x124] ss:$16 sps:$4 sm:$0xff]  }
 0x102   : > { %1655 = vmatprep.subr.bf16.mxu0 %v6988_v8  ;;  %v7649_v8 = vld [vmem:[#allocation8 + $0x144] ss:$16 sps:$4 sm:$0xff]  }
 0x103   : > { %1695 = vmatpush1.bf16.msra.mxu1 %v6981_v22  ;;  %v7656_v22 = vld [vmem:[#allocation8 + $0x168] ss:$16 sps:$4 sm:$0xff]  }
 0x104   : > { %1696 = vmatprep.subr.bf16.mxu1 %v6990_v27  ;;  %v7679_v27 = vld [vmem:[#allocation8 + $0x1e4] ss:$16 sps:$4 sm:$0xff]  }
 0x105   : > { %1656 = vmatpush1.bf16.msra.mxu0 %v6987_v12  ;;  %v7655_v12 = vld [vmem:[#allocation8 + $0x164] ss:$16 sps:$4 sm:$0xff]  }
 0x106   : > { %1657 = vmatprep.subr.bf16.mxu0 %v6996_v15  ;;  %v7661_v15 = vld [vmem:[#allocation8 + $0x184] ss:$16 sps:$4 sm:$0xff]  }
 0x107   : > { %1697 = vmatpush1.bf16.msra.mxu1 %v6989_v30  ;;  %v7677_v30 = vld [vmem:[#allocation8 + $0x1e0] ss:$16 sps:$4 sm:$0xff]  }
 0x108   : > { %1698 = vmatprep.subr.bf16.mxu1 %v6998_v35  ;;  %v7674_v35 = vld [vmem:[#allocation8 + $0x1c8] ss:$16 sps:$4 sm:$0xff]  }
 0x109   : > { %1658 = vmatpush1.bf16.msra.mxu0 %v6995_v19  ;;  %v7667_v19 = vld [vmem:[#allocation8 + $0x1a4] ss:$16 sps:$4 sm:$0xff]  }
 0x10a   : > { %1659 = vmatprep.subr.bf16.mxu0 %v7004_v21  ;;  %v7665_v21 = vld [vmem:[#allocation8 + $0x1a0] ss:$16 sps:$4 sm:$0xff]  }
 0x10b   : > { %1699 = vmatpush1.bf16.msra.mxu1 %v6997_v37  ;;  %v7680_v37 = vld [vmem:[#allocation8 + $0x1e8] ss:$16 sps:$4 sm:$0xff]  }
 0x10c   : > { %1700 = vmatprep.subr.bf16.mxu1 %v7006_v39  ;;  %v8723_v39 = vsub.s32 0, %v8695_v33 }
 0x10d   : > { %1660 = vmatpush1.bf16.msra.mxu0 %v7003_v26  ;;  %v7662_v26 = vld [vmem:[#allocation8 + $0x188] ss:$16 sps:$4 sm:$0xff]  }
 0x10e   : > { %3301 = vmatprep.subr.bf16.mxu0 %v7589_v25  ;;  %v7671_v25 = vld [vmem:[#allocation8 + $0x1c0] ss:$16 sps:$4 sm:$0xff]  }
 0x10f   : > { %1701 = vmatpush1.bf16.msra.mxu1 %v7005_v41 }
 0x110   : > { %1662 = vmatmul.mubr.bf16.vlgmr.msra.gmra.mrb[4].mxu0 %v8714_v28  ;;  %3465 = vmatprep.subr.bf16.mxu1 %v7592_v40  ;;  %v8728_v40 = vld [vmem:[%s10273_s4] sm:$0xff] }
 0x111   : > { %3302 = vmatpush1.bf16.msra.mxu0 %v7587_v29  ;;  %v7670_v29 = vld [vmem:[#allocation8 + $0x1ac] ss:$16 sps:$4 sm:$0xff]   ;;  %v845_v41 = vrot.slane %v8728_v40, %v8723_v39 }
 0x112   : > { %3303 = vmatprep.subr.bf16.mxu0 %v7595_v34  ;;  %1703 = vmatmul.mubr.bf16.vlgmr.msra.gmra.mrb[4].mxu1 %v8714_v28  ;;  %v7614_v28 = vld [vmem:[#allocation8 + $0x88] ss:$16 sps:$4 sm:$0xff]   ;;  %v7676_v34 = vld [vmem:[#allocation8 + $0x1cc] ss:$16 sps:$4 sm:$0xff]  }
 0x113   : > { %3466 = vmatpush1.bf16.msra.mxu1 %v7590_v44 }
 0x114   : > { %3467 = vmatprep.subr.bf16.mxu1 %v7598_v45 }
 0x115   : > { %3304 = vmatpush1.bf16.msra.mxu0 %v7593_v36  ;;  %v7682_v36 = vld [vmem:[#allocation8 + $0x1ec] ss:$16 sps:$4 sm:$0xff]  }
 0x116   : > { %3305 = vmatprep.subr.bf16.mxu0 %v7601_v38  ;;  %v7688_v38 = vld [vmem:[#allocation8 + $0x20c] ss:$16 sps:$4 sm:$0xff]  }
 0x117   : > { %3468 = vmatpush1.bf16.msra.mxu1 %v7596_v48 }
 0x118   : > { %3469 = vmatprep.subr.bf16.mxu1 %v7604_v49 }
 0x119   : > { %3306 = vmatpush1.bf16.msra.mxu0 %v7599_v42  ;;  %v8731_v42 = vsub.s32 1, %v8695_v33 }
 0x11a   : > { %3307 = vmatprep.subr.bf16.mxu0 %v7607_v43 }
 0x11b   : > { %3470 = vmatpush1.bf16.msra.mxu1 %v7602_v52  ;;  %v849_v43 = vrot.slane %v8728_v40, %v8731_v42 }
 0x11c   : > { %3471 = vmatprep.subr.bf16.mxu1 %v7610_v53  ;;  %v8738_v53 = vsub.s32 3, %v8695_v33 }
 0x11d   : > { %3308 = vmatpush1.bf16.msra.mxu0 %v7605_v46 }
 0x11e   : > { %3309 = vmatprep.subr.bf16.mxu0 %v7613_v47 }
 0x11f   : > { %3472 = vmatpush1.bf16.msra.mxu1 %v7608_v56 }
 0x120   : > { %3473 = vmatprep.subr.bf16.mxu1 %v7616_v58  ;;  %v7686_v58 = vld [vmem:[#allocation8 + $0x208] ss:$16 sps:$4 sm:$0xff]  }
 0x121   : > { %3310 = vmatpush1.bf16.msra.mxu0 %v7611_v50 }
 0x122   : > { %3311 = vmatprep.subr.bf16.mxu0 %v7619_v51 }
 0x123   : > { %3474 = vmatpush1.bf16.msra.mxu1 %v7614_v28  ;;  %v7691_v28 = vld [vmem:[#allocation8 + $0x224] ss:$16 sps:$4 sm:$0xff]  }
 0x124   : > { %3475 = vmatprep.subr.bf16.mxu1 %v7622_v61  ;;  %v857_v61 = vrot.slane %v8728_v40, %v8738_v53 }
 0x125   : > { %3312 = vmatpush1.bf16.msra.mxu0 %v7617_v54 }
 0x126   : > { %3313 = vmatprep.subr.bf16.mxu0 %v7625_v57  ;;  %v7683_v57 = vld [vmem:[#allocation8 + $0x200] ss:$16 sps:$4 sm:$0xff]  }
 0x127   : > { %3476 = vmatpush1.bf16.msra.mxu1 %v7620_v63  ;;  %v7692_v63 = vld [vmem:[#allocation8 + $0x228] ss:$16 sps:$4 sm:$0xff]  }
 0x128   : > { %3477 = vmatprep.subr.bf16.mxu1 %v7628_v1  ;;  %v7697_v1 = vld [vmem:[#allocation8 + $0x244] ss:$16 sps:$4 sm:$0xff]  }
 0x129   : > { %3314 = vmatpush1.bf16.msra.mxu0 %v7623_v59 }
 0x12a   : > { %3315 = vmatprep.subr.bf16.mxu0 %v7631_v60  ;;  %v7694_v60 = vld [vmem:[#allocation8 + $0x22c] ss:$16 sps:$4 sm:$0xff]  }
 0x12b   : > { %3478 = vmatpush1.bf16.msra.mxu1 %v7626_v3 }
 0x12c   : > { %3479 = vmatprep.subr.bf16.mxu1 %v7634_v5 }
 0x12d   : > { %3316 = vmatpush1.bf16.msra.mxu0 %v7629_v62  ;;  %v7689_v62 = vld [vmem:[#allocation8 + $0x220] ss:$16 sps:$4 sm:$0xff]  }
 0x12e   : > { %3317 = vmatprep.subr.bf16.mxu0 %v7637_v0 }
 0x12f   : > { %3480 = vmatpush1.bf16.msra.mxu1 %v7632_v7 }
 0x130   : > { %3481 = vmatprep.subr.bf16.mxu1 %v7640_v9 }
 0x131   : > { %3318 = vmatpush1.bf16.msra.mxu0 %v7635_v2  ;;  %v7700_v2 = vld [vmem:[#allocation8 + $0x24c] ss:$16 sps:$4 sm:$0xff]  }
 0x132   : > { %3319 = vmatprep.subr.bf16.mxu0 %v7643_v4 }
 0x133   : > { %3482 = vmatpush1.bf16.msra.mxu1 %v7638_v11  ;;  %v7706_v11 = vld [vmem:[#allocation8 + $0x26c] ss:$16 sps:$4 sm:$0xff]  }
 0x134   : > { %3483 = vmatprep.subr.bf16.mxu1 %v7646_v55 }
 0x135   : > { %3320 = vmatpush1.bf16.msra.mxu0 %v7641_v6  ;;  %v7695_v6 = vld [vmem:[#allocation8 + $0x240] ss:$16 sps:$4 sm:$0xff]  }
 0x136   : > { %3321 = vmatprep.subr.bf16.mxu0 %v7649_v8  ;;  %v7698_v8 = vld [vmem:[#allocation8 + $0x248] ss:$16 sps:$4 sm:$0xff]  }
 0x137   : > { %3484 = vmatpush1.bf16.msra.mxu1 %v7644_v14  ;;  %v7704_v14 = vld [vmem:[#allocation8 + $0x268] ss:$16 sps:$4 sm:$0xff]  }
 0x138   : > { %3485 = vmatprep.subr.bf16.mxu1 %v7652_v16  ;;  %v7712_v16 = vld [vmem:[#allocation8 + $0x28c] ss:$16 sps:$4 sm:$0xff]  }
 0x139   : > { %3322 = vmatpush1.bf16.msra.mxu0 %v7647_v10  ;;  %v7703_v10 = vld [vmem:[#allocation8 + $0x264] ss:$16 sps:$4 sm:$0xff]  }
 0x13a   : > { %3323 = vmatprep.subr.bf16.mxu0 %v7655_v12 }
 0x13b   : > { %3486 = vmatpush1.bf16.msra.mxu1 %v7650_v18  ;;  %v7710_v18 = vld [vmem:[#allocation8 + $0x288] ss:$16 sps:$4 sm:$0xff]  }
 0x13c   : > { %3487 = vmatprep.subr.bf16.mxu1 %v7658_v20  ;;  %v7718_v20 = vld [vmem:[#allocation8 + $0x2ac] ss:$16 sps:$4 sm:$0xff]  }
 0x13d   : > { %3324 = vmatpush1.bf16.msra.mxu0 %v7653_v13  ;;  %v7701_v13 = vld [vmem:[#allocation8 + $0x260] ss:$16 sps:$4 sm:$0xff]  }
 0x13e   : > { %3325 = vmatprep.subr.bf16.mxu0 %v7661_v15  ;;  %v7709_v15 = vld [vmem:[#allocation8 + $0x284] ss:$16 sps:$4 sm:$0xff]  }
 0x13f   : > { %3488 = vmatpush1.bf16.msra.mxu1 %v7656_v22  ;;  %v7716_v22 = vld [vmem:[#allocation8 + $0x2a8] ss:$16 sps:$4 sm:$0xff]  }
 0x140   : > { %3489 = vmatprep.subr.bf16.mxu1 %v7664_v24  ;;  %v7724_v24 = vld [vmem:[#allocation8 + $0x2cc] ss:$16 sps:$4 sm:$0xff]  }
 0x141   : > { %3326 = vmatpush1.bf16.msra.mxu0 %v7659_v17  ;;  %v7707_v17 = vld [vmem:[#allocation8 + $0x280] ss:$16 sps:$4 sm:$0xff]  }
 0x142   : > { %3327 = vmatprep.subr.bf16.mxu0 %v7667_v19  ;;  %v7715_v19 = vld [vmem:[#allocation8 + $0x2a4] ss:$16 sps:$4 sm:$0xff]  }
 0x143   : > { %3490 = vmatpush1.bf16.msra.mxu1 %v7662_v26  ;;  %v7722_v26 = vld [vmem:[#allocation8 + $0x2c8] ss:$16 sps:$4 sm:$0xff]  }
 0x144   : > { %3491 = vmatprep.subr.bf16.mxu1 %v7670_v29  ;;  %v7730_v29 = vld [vmem:[#allocation8 + $0x2ec] ss:$16 sps:$4 sm:$0xff]  }
 0x145   : > { %3328 = vmatpush1.bf16.msra.mxu0 %v7665_v21  ;;  %v7713_v21 = vld [vmem:[#allocation8 + $0x2a0] ss:$16 sps:$4 sm:$0xff]  }
 0x146   : > { %3329 = vmatprep.subr.bf16.mxu0 %v7673_v23  ;;  %v7721_v23 = vld [vmem:[#allocation8 + $0x2c4] ss:$16 sps:$4 sm:$0xff]  }
 0x147   : > { %3492 = vmatpush1.bf16.msra.mxu1 %v7668_v32  ;;  %v7733_v32 = vld [vmem:[#allocation8 + $0x304] ss:$16 sps:$4 sm:$0xff]  }
 0x148   : > { %3493 = vmatprep.subr.bf16.mxu1 %v7676_v34  ;;  %v7736_v34 = vld [vmem:[#allocation8 + $0x30c] ss:$16 sps:$4 sm:$0xff]  }
 0x149   : > { %3330 = vmatpush1.bf16.msra.mxu0 %v7671_v25  ;;  %v7719_v25 = vld [vmem:[#allocation8 + $0x2c0] ss:$16 sps:$4 sm:$0xff]  }
 0x14a   : > { %3331 = vmatprep.subr.bf16.mxu0 %v7679_v27  ;;  %v7727_v27 = vld [vmem:[#allocation8 + $0x2e4] ss:$16 sps:$4 sm:$0xff]  }
 0x14b   : > { %3494 = vmatpush1.bf16.msra.mxu1 %v7674_v35  ;;  %v7731_v35 = vld [vmem:[#allocation8 + $0x300] ss:$16 sps:$4 sm:$0xff]  }
 0x14c   : > { %3495 = vmatprep.subr.bf16.mxu1 %v7682_v36  ;;  %v7734_v36 = vld [vmem:[#allocation8 + $0x308] ss:$16 sps:$4 sm:$0xff]  }
 0x14d   : > { %3332 = vmatpush1.bf16.msra.mxu0 %v7677_v30  ;;  %v7725_v30 = vld [vmem:[#allocation8 + $0x2e0] ss:$16 sps:$4 sm:$0xff]  }
 0x14e   : > { %3342 = vmatprep.subr.bf16.mxu0 %v7685_v31  ;;  %v7728_v31 = vld [vmem:[#allocation8 + $0x2e8] ss:$16 sps:$4 sm:$0xff]  }
 0x14f   : > { %3496 = vmatpush1.bf16.msra.mxu1 %v7680_v37  ;;  %v7739_v37 = vld [vmem:[#allocation8 + $0x324] ss:$16 sps:$4 sm:$0xff]  }
 0x150   : > { %3506 = vmatprep.subr.bf16.mxu1 %v7688_v38  ;;  %v7742_v38 = vld [vmem:[#allocation8 + $0x32c] ss:$16 sps:$4 sm:$0xff]  }
 0x1a3   : > { %v1581_v44 = vpop.f32.mrb[0].mxu0 }
 0x1a4   : > { %v1582_v45 = vadd.f32 %v1581_v44, %v845_v41  ;;  %v1583_v46 = vpop.f32.mrb[1].mxu0  ;;  %v7737_v41 = vld [vmem:[#allocation8 + $0x320] ss:$16 sps:$4 sm:$0xff]   ;;  %v7745_v44 = vld [vmem:[#allocation8 + $0x344] ss:$16 sps:$4 sm:$0xff]  }
 0x1a5   : > { %v1584_v47 = vadd.f32 %v1583_v46, %v849_v43  ;;  %v1585_v48 = vpop.f32.mrb[2].mxu0  ;;  %v8742_v0 = vpop.f32.mrb[0].mxu1  ;;  %v7740_v43 = vld [vmem:[#allocation8 + $0x328] ss:$16 sps:$4 sm:$0xff]   ;;  %v7743_v46 = vld [vmem:[#allocation8 + $0x340] ss:$16 sps:$4 sm:$0xff]  }
 0x1a6   : > { %vm1711_vm0 = vcmp.ge.f32.partialorder %v1582_v45, 0.0  ;;  %v1719_v49 = vmul.f32 0.01, %v1582_v45  ;;  %v1586_v50 = vpop.f32.mrb[3].mxu0  ;;  %v1624_v3 = vpop.f32.mrb[1].mxu1 }
 0x1a7   : > { %vm1712_vm1 = vcmp.ge.f32.partialorder %v1584_v47, 0.0  ;;  %v1720_v51 = vmul.f32 0.01, %v1584_v47  ;;  %v1625_v4 = vadd.f32 %v1624_v3, %v857_v61  ;;  %v1626_v5 = vpop.f32.mrb[2].mxu1  ;;  %v7751_v48 = vld [vmem:[#allocation8 + $0x364] ss:$16 sps:$4 sm:$0xff]  }
 0x1a8   : > { %v1727_v52 = vsel %vm1711_vm0, %v1582_v45, %v1719_v49  ;;  %v1627_v7 = vpop.f32.mrb[3].mxu1  ;;  %v7748_v45 = vld [vmem:[#allocation8 + $0x34c] ss:$16 sps:$4 sm:$0xff]   ;;  %v7749_v50 = vld [vmem:[#allocation8 + $0x360] ss:$16 sps:$4 sm:$0xff]   ;;  %v864_v61 = vsub.s32 5, %v8695_v33 }
 0x1a9   : > { %v1728_v54 = vsel %vm1712_vm1, %v1584_v47, %v1720_v51  ;;  %v1735_v59 = vpack.c.bf16 %v1727_v52, %v1727_v52  ;;  %vm1714_vm2 = vcmp.ge.f32.partialorder %v1625_v4, 0.0  ;;  %v1722_v9 = vmul.f32 0.01, %v1625_v4  ;;  %v7746_v47 = vld [vmem:[#allocation8 + $0x348] ss:$16 sps:$4 sm:$0xff]  }
 0x1aa   : > { %v1736_v56 = vpack.c.bf16 %v1728_v54, %v1728_v54  ;;  %v7754_v49 = vld [vmem:[#allocation8 + $0x36c] ss:$16 sps:$4 sm:$0xff]   ;;  %v7752_v51 = vld [vmem:[#allocation8 + $0x368] ss:$16 sps:$4 sm:$0xff]   ;;  %v7757_v52 = vld [vmem:[#allocation8 + $0x384] ss:$16 sps:$4 sm:$0xff]  }
 0x1ab   : > { %v1730_v12 = vsel %vm1714_vm2, %v1625_v4, %v1722_v9  ;;  %v7760_v54 = vld [vmem:[#allocation8 + $0x38c] ss:$16 sps:$4 sm:$0xff]   ;;  %v865_v4 = vrot.slane %v8728_v40, %v864_v61  ;;  %v7767_v5 = vld [vmem:[#allocation8 + $0x3c0] ss:$16 sps:$4 sm:$0xff]   ;;  %v7775_v7 = vld [vmem:[#allocation8 + $0x3e4] ss:$16 sps:$4 sm:$0xff]  }
 0x1ac   : > { %3333 = vmatprep.mubr.bf16.mxu0 %v1736_v56  ;;  %3497 = vmatprep.mubr.bf16.mxu1 %v1736_v56  ;;  %v1738_v55 = vpack.c.bf16 %v1730_v12, %v1730_v12  ;;  %v8745_v56 = vsub.s32 2, %v8695_v33  ;;  %v7773_v12 = vld [vmem:[#allocation8 + $0x3e0] ss:$16 sps:$4 sm:$0xff]  }
 0x1ad   : > { %3334 = vmatmul.mubr.bf16.vlgmr.msra.gmra.mrb[8].mxu0 %v1735_v59  ;;  %3498 = vmatmul.mubr.bf16.vlgmr.msra.gmra.mrb[8].mxu1 %v1735_v59  ;;  %v7763_v59 = vld [vmem:[#allocation8 + $0x3a4] ss:$16 sps:$4 sm:$0xff]   ;;  %v7821_v61 = vld [vmem:[#allocation8 + $0x4e0] ss:$16 sps:$4 sm:$0xff]  }
 0x1ae   : > { %3343 = vmatpush1.bf16.msra.mxu0 %v7683_v57  ;;  %3507 = vmatpush1.bf16.msra.mxu1 %v7686_v58  ;;  %v7755_v57 = vld [vmem:[#allocation8 + $0x380] ss:$16 sps:$4 sm:$0xff]   ;;  %v7758_v58 = vld [vmem:[#allocation8 + $0x388] ss:$16 sps:$4 sm:$0xff]  }
 0x1af   : > { %3344 = vmatprep.subr.bf16.mxu0 %v7691_v28  ;;  %3508 = vmatprep.subr.bf16.mxu1 %v7694_v60  ;;  %v7766_v28 = vld [vmem:[#allocation8 + $0x3ac] ss:$16 sps:$4 sm:$0xff]   ;;  %v853_v60 = vrot.slane %v8728_v40, %v8745_v56 }
 0x1b0   : > { %3374 = vmatprep.mubr.bf16.mxu0 %v1738_v55  ;;  %3538 = vmatprep.mubr.bf16.mxu1 %v1738_v55 }
 0x1b1   : > { %v1623_v3 = vadd.f32 %v8742_v0, %v853_v60  ;;  %v7776_v0 = vld [vmem:[#allocation8 + $0x3e8] ss:$16 sps:$4 sm:$0xff]   ;;  %v7826_v60 = vld [vmem:[#allocation8 + $0x4ec] ss:$16 sps:$4 sm:$0xff]  }
 0x1b2   : > { %3345 = vmatpush1.bf16.msra.mxu0 %v7689_v62  ;;  %3509 = vmatpush1.bf16.msra.mxu1 %v7692_v63  ;;  %v7761_v62 = vld [vmem:[#allocation8 + $0x3a0] ss:$16 sps:$4 sm:$0xff]   ;;  %v7764_v63 = vld [vmem:[#allocation8 + $0x3a8] ss:$16 sps:$4 sm:$0xff]  }
 0x1b3   : > { %3346 = vmatprep.subr.bf16.mxu0 %v7697_v1  ;;  %3510 = vmatprep.subr.bf16.mxu1 %v7700_v2  ;;  %v7769_v1 = vld [vmem:[#allocation8 + $0x3c4] ss:$16 sps:$4 sm:$0xff]   ;;  %v7772_v2 = vld [vmem:[#allocation8 + $0x3cc] ss:$16 sps:$4 sm:$0xff]   ;;  %vm1713_vm3 = vcmp.ge.f32.partialorder %v1623_v3, 0.0 }
 0x1b6   : > { %3347 = vmatpush1.bf16.msra.mxu0 %v7695_v6  ;;  %3511 = vmatpush1.bf16.msra.mxu1 %v7698_v8  ;;  %v7770_v6 = vld [vmem:[#allocation8 + $0x3c8] ss:$16 sps:$4 sm:$0xff]   ;;  %v7778_v8 = vld [vmem:[#allocation8 + $0x3ec] ss:$16 sps:$4 sm:$0xff]  }
 0x1b7   : > { %3348 = vmatprep.subr.bf16.mxu0 %v7703_v10  ;;  %3512 = vmatprep.subr.bf16.mxu1 %v7706_v11  ;;  %v1721_v10 = vmul.f32 0.01, %v1623_v3 }
 0x1ba   : > { %3349 = vmatpush1.bf16.msra.mxu0 %v7701_v13  ;;  %3513 = vmatpush1.bf16.msra.mxu1 %v7704_v14  ;;  %v7781_v14 = vld [vmem:[#allocation8 + $0x404] ss:$16 sps:$4 sm:$0xff]  }
 0x1bb   : > { %3350 = vmatprep.subr.bf16.mxu0 %v7709_v15  ;;  %3514 = vmatprep.subr.bf16.mxu1 %v7712_v16  ;;  %v7784_v16 = vld [vmem:[#allocation8 + $0x40c] ss:$16 sps:$4 sm:$0xff]  }
 0x1be   : > { %3351 = vmatpush1.bf16.msra.mxu0 %v7707_v17  ;;  %3515 = vmatpush1.bf16.msra.mxu1 %v7710_v18  ;;  %v1729_v18 = vsel %vm1713_vm3, %v1623_v3, %v1721_v10  ;;  %v7830_v3 = vld [vmem:[#allocation8 + $0x508] ss:$16 sps:$4 sm:$0xff]   ;;  %v7844_v10 = vld [vmem:[#allocation8 + $0x54c] ss:$16 sps:$4 sm:$0xff]  }
 0x1bf   : > { %3352 = vmatprep.subr.bf16.mxu0 %v7715_v19  ;;  %3516 = vmatprep.subr.bf16.mxu1 %v7718_v20  ;;  %v7779_v20 = vld [vmem:[#allocation8 + $0x400] ss:$16 sps:$4 sm:$0xff]  }
 0x1c2   : > { %3353 = vmatpush1.bf16.msra.mxu0 %v7713_v21  ;;  %3517 = vmatpush1.bf16.msra.mxu1 %v7716_v22  ;;  %v7782_v21 = vld [vmem:[#allocation8 + $0x408] ss:$16 sps:$4 sm:$0xff]   ;;  %v1737_v22 = vpack.c.bf16 %v1729_v18, %v1729_v18  ;;  %v872_v18 = vsub.s32 7, %v8695_v33 }
 0x1c3   : > { %3354 = vmatprep.subr.bf16.mxu0 %v7721_v23  ;;  %3518 = vmatprep.subr.bf16.mxu1 %v7724_v24  ;;  %v7787_v23 = vld [vmem:[#allocation8 + $0x424] ss:$16 sps:$4 sm:$0xff]   ;;  %v7790_v24 = vld [vmem:[#allocation8 + $0x42c] ss:$16 sps:$4 sm:$0xff]  }
 0x1c6   : > { %3355 = vmatpush1.bf16.msra.mxu0 %v7719_v25  ;;  %3519 = vmatpush1.bf16.msra.mxu1 %v7722_v26  ;;  %v7785_v26 = vld [vmem:[#allocation8 + $0x420] ss:$16 sps:$4 sm:$0xff]  }
 0x1c7   : > { %3356 = vmatprep.subr.bf16.mxu0 %v7727_v27  ;;  %3520 = vmatprep.subr.bf16.mxu1 %v7730_v29  ;;  %v7788_v27 = vld [vmem:[#allocation8 + $0x428] ss:$16 sps:$4 sm:$0xff]  }
 0x1ca   : > { %3357 = vmatpush1.bf16.msra.mxu0 %v7725_v30  ;;  %3521 = vmatpush1.bf16.msra.mxu1 %v7728_v31  ;;  %v7793_v30 = vld [vmem:[#allocation8 + $0x444] ss:$16 sps:$4 sm:$0xff]   ;;  %v7796_v31 = vld [vmem:[#allocation8 + $0x44c] ss:$16 sps:$4 sm:$0xff]  }
 0x1cb   : > { %3358 = vmatprep.subr.bf16.mxu0 %v7733_v32  ;;  %3522 = vmatprep.subr.bf16.mxu1 %v7736_v34 }
 0x1ce   : > { %3359 = vmatpush1.bf16.msra.mxu0 %v7731_v35  ;;  %3523 = vmatpush1.bf16.msra.mxu1 %v7734_v36  ;;  %v7791_v36 = vld [vmem:[#allocation8 + $0x440] ss:$16 sps:$4 sm:$0xff]  }
 0x1cf   : > { %3360 = vmatprep.subr.bf16.mxu0 %v7739_v37  ;;  %3524 = vmatprep.subr.bf16.mxu1 %v7742_v38  ;;  %v7794_v37 = vld [vmem:[#allocation8 + $0x448] ss:$16 sps:$4 sm:$0xff]   ;;  %v7799_v38 = vld [vmem:[#allocation8 + $0x464] ss:$16 sps:$4 sm:$0xff]  }
 0x1d2   : > { %3361 = vmatpush1.bf16.msra.mxu0 %v7737_v41  ;;  %3525 = vmatpush1.bf16.msra.mxu1 %v7740_v43  ;;  %v7802_v41 = vld [vmem:[#allocation8 + $0x46c] ss:$16 sps:$4 sm:$0xff]   ;;  %v7797_v43 = vld [vmem:[#allocation8 + $0x460] ss:$16 sps:$4 sm:$0xff]  }
 0x1d3   : > { %3362 = vmatprep.subr.bf16.mxu0 %v7745_v44  ;;  %3526 = vmatprep.subr.bf16.mxu1 %v7748_v45  ;;  %v7800_v44 = vld [vmem:[#allocation8 + $0x468] ss:$16 sps:$4 sm:$0xff]   ;;  %v7805_v45 = vld [vmem:[#allocation8 + $0x484] ss:$16 sps:$4 sm:$0xff]  }
 0x1d6   : > { %3363 = vmatpush1.bf16.msra.mxu0 %v7743_v46  ;;  %3527 = vmatpush1.bf16.msra.mxu1 %v7746_v47  ;;  %v7808_v46 = vld [vmem:[#allocation8 + $0x48c] ss:$16 sps:$4 sm:$0xff]   ;;  %v7803_v47 = vld [vmem:[#allocation8 + $0x480] ss:$16 sps:$4 sm:$0xff]  }
 0x1d7   : > { %3364 = vmatprep.subr.bf16.mxu0 %v7751_v48  ;;  %3528 = vmatprep.subr.bf16.mxu1 %v7754_v49  ;;  %v7806_v48 = vld [vmem:[#allocation8 + $0x488] ss:$16 sps:$4 sm:$0xff]   ;;  %v7811_v49 = vld [vmem:[#allocation8 + $0x4a4] ss:$16 sps:$4 sm:$0xff]  }
 0x1da   : > { %3365 = vmatpush1.bf16.msra.mxu0 %v7749_v50  ;;  %3529 = vmatpush1.bf16.msra.mxu1 %v7752_v51  ;;  %v7814_v50 = vld [vmem:[#allocation8 + $0x4ac] ss:$16 sps:$4 sm:$0xff]   ;;  %v7809_v51 = vld [vmem:[#allocation8 + $0x4a0] ss:$16 sps:$4 sm:$0xff]  }
 0x1db   : > { %3366 = vmatprep.subr.bf16.mxu0 %v7757_v52  ;;  %3530 = vmatprep.subr.bf16.mxu1 %v7760_v54  ;;  %v7812_v52 = vld [vmem:[#allocation8 + $0x4a8] ss:$16 sps:$4 sm:$0xff]   ;;  %v7817_v54 = vld [vmem:[#allocation8 + $0x4c4] ss:$16 sps:$4 sm:$0xff]  }
 0x1de   : > { %3367 = vmatpush1.bf16.msra.mxu0 %v7755_v57  ;;  %3531 = vmatpush1.bf16.msra.mxu1 %v7758_v58  ;;  %v7820_v57 = vld [vmem:[#allocation8 + $0x4cc] ss:$16 sps:$4 sm:$0xff]   ;;  %v7815_v58 = vld [vmem:[#allocation8 + $0x4c0] ss:$16 sps:$4 sm:$0xff]  }
 0x1df   : > { %3368 = vmatprep.subr.bf16.mxu0 %v7763_v59  ;;  %3532 = vmatprep.subr.bf16.mxu1 %v7766_v28  ;;  %v7818_v59 = vld [vmem:[#allocation8 + $0x4c8] ss:$16 sps:$4 sm:$0xff]   ;;  %v7823_v28 = vld [vmem:[#allocation8 + $0x4e4] ss:$16 sps:$4 sm:$0xff]  }
 0x1e2   : > { %3369 = vmatpush1.bf16.msra.mxu0 %v7761_v62  ;;  %3533 = vmatpush1.bf16.msra.mxu1 %v7764_v63  ;;  %v7824_v62 = vld [vmem:[#allocation8 + $0x4e8] ss:$16 sps:$4 sm:$0xff]   ;;  %v7829_v63 = vld [vmem:[#allocation8 + $0x504] ss:$16 sps:$4 sm:$0xff]  }
 0x1e3   : > { %3370 = vmatprep.subr.bf16.mxu0 %v7769_v1  ;;  %3534 = vmatprep.subr.bf16.mxu1 %v7772_v2  ;;  %v8752_v9 = vpop.f32.mrb[4].mxu0  ;;  %v7832_v1 = vld [vmem:[#allocation8 + $0x50c] ss:$16 sps:$4 sm:$0xff]   ;;  %v7827_v2 = vld [vmem:[#allocation8 + $0x500] ss:$16 sps:$4 sm:$0xff]  }
 0x1e4   : > { %v1665_v11 = vpop.f32.mrb[5].mxu0 }
 0x1e5   : > { %v1666_v55 = vadd.f32 %v1665_v11, %v865_v4  ;;  %v1667_v13 = vpop.f32.mrb[6].mxu0  ;;  %v8754_v29 = vpop.f32.mrb[4].mxu1  ;;  %v7835_v4 = vld [vmem:[#allocation8 + $0x524] ss:$16 sps:$4 sm:$0xff]   ;;  %v7839_v11 = vld [vmem:[#allocation8 + $0x540] ss:$16 sps:$4 sm:$0xff]  }
 0x1e6   : > { %3371 = vmatpush1.bf16.msra.mxu0 %v7767_v5  ;;  %3535 = vmatpush1.bf16.msra.mxu1 %v7770_v6  ;;  %v1668_v15 = vpop.f32.mrb[7].mxu0  ;;  %v8756_v32 = vpop.f32.mrb[5].mxu1  ;;  %v7838_v5 = vld [vmem:[#allocation8 + $0x52c] ss:$16 sps:$4 sm:$0xff]   ;;  %v7833_v6 = vld [vmem:[#allocation8 + $0x520] ss:$16 sps:$4 sm:$0xff]  }
 0x1e7   : > { %3372 = vmatprep.subr.bf16.mxu0 %v7775_v7  ;;  %3536 = vmatprep.subr.bf16.mxu1 %v7778_v8  ;;  %vm1716_vm4 = vcmp.ge.f32.partialorder %v1666_v55, 0.0  ;;  %v1724_v17 = vmul.f32 0.01, %v1666_v55  ;;  %v1708_v34 = vpop.f32.mrb[6].mxu1  ;;  %v7836_v7 = vld [vmem:[#allocation8 + $0x528] ss:$16 sps:$4 sm:$0xff]  }
 0x1e8   : > { %v1709_v35 = vpop.f32.mrb[7].mxu1  ;;  %v7841_v8 = vld [vmem:[#allocation8 + $0x544] ss:$16 sps:$4 sm:$0xff]   ;;  %v7850_v13 = vld [vmem:[#allocation8 + $0x56c] ss:$16 sps:$4 sm:$0xff]  }
 0x1e9   : > { %v1732_v19 = vsel %vm1716_vm4, %v1666_v55, %v1724_v17  ;;  %v7847_v55 = vld [vmem:[#allocation8 + $0x564] ss:$16 sps:$4 sm:$0xff]   ;;  %v860_v17 = vsub.s32 4, %v8695_v33  ;;  %v7863_v35 = vld [vmem:[#allocation8 + $0x5c0] ss:$16 sps:$4 sm:$0xff]  }
 0x1ea   : > { %3373 = vmatpush1.bf16.msra.mxu0 %v7773_v12  ;;  %3537 = vmatpush1.bf16.msra.mxu1 %v7776_v0  ;;  %v1740_v25 = vpack.c.bf16 %v1732_v19, %v1732_v19  ;;  %v7842_v12 = vld [vmem:[#allocation8 + $0x548] ss:$16 sps:$4 sm:$0xff]   ;;  %v7845_v0 = vld [vmem:[#allocation8 + $0x560] ss:$16 sps:$4 sm:$0xff]   ;;  %v7853_v15 = vld [vmem:[#allocation8 + $0x584] ss:$16 sps:$4 sm:$0xff]  }
 0x1eb   : > { %3383 = vmatprep.subr.bf16.mxu0 %v7781_v14  ;;  %3547 = vmatprep.subr.bf16.mxu1 %v7784_v16  ;;  %v7848_v14 = vld [vmem:[#allocation8 + $0x568] ss:$16 sps:$4 sm:$0xff]   ;;  %v7856_v16 = vld [vmem:[#allocation8 + $0x58c] ss:$16 sps:$4 sm:$0xff]   ;;  %v7851_v19 = vld [vmem:[#allocation8 + $0x580] ss:$16 sps:$4 sm:$0xff]  }
 0x1ed   : > { %3375 = vmatmul.mubr.bf16.vlgmr.msra.gmra.mrb[8].mxu0 %v1737_v22  ;;  %3539 = vmatmul.mubr.bf16.vlgmr.msra.gmra.mrb[8].mxu1 %v1737_v22  ;;  %v7862_v22 = vld [vmem:[#allocation8 + $0x5ac] ss:$16 sps:$4 sm:$0xff]  }
 0x1ee   : > { %3384 = vmatpush1.bf16.msra.mxu0 %v7779_v20  ;;  %3548 = vmatpush1.bf16.msra.mxu1 %v7782_v21  ;;  %v7854_v20 = vld [vmem:[#allocation8 + $0x588] ss:$16 sps:$4 sm:$0xff]   ;;  %v7859_v21 = vld [vmem:[#allocation8 + $0x5a4] ss:$16 sps:$4 sm:$0xff]  }
 0x1ef   : > { %3385 = vmatprep.subr.bf16.mxu0 %v7787_v23  ;;  %3549 = vmatprep.subr.bf16.mxu1 %v7790_v24  ;;  %v861_v23 = vrot.slane %v8728_v40, %v860_v17  ;;  %v873_v24 = vrot.slane %v8728_v40, %v872_v18  ;;  %v7920_v17 = vld [vmem:[#allocation8 + $0x6e8] ss:$16 sps:$4 sm:$0xff]   ;;  %v7925_v18 = vld [vmem:[#allocation8 + $0x704] ss:$16 sps:$4 sm:$0xff]  }
 0x1f0   : > { %3415 = vmatprep.mubr.bf16.mxu0 %v1740_v25  ;;  %3579 = vmatprep.mubr.bf16.mxu1 %v1740_v25  ;;  %v7857_v25 = vld [vmem:[#allocation8 + $0x5a0] ss:$16 sps:$4 sm:$0xff]  }
 0x1f1   : > { %v1707_v34 = vadd.f32 %v8756_v32, %v873_v24  ;;  %v7880_v32 = vld [vmem:[#allocation8 + $0x60c] ss:$16 sps:$4 sm:$0xff]   ;;  %v7929_v24 = vld [vmem:[#allocation8 + $0x720] ss:$16 sps:$4 sm:$0xff]  }
 0x1f2   : > { %3386 = vmatpush1.bf16.msra.mxu0 %v7785_v26  ;;  %3550 = vmatpush1.bf16.msra.mxu1 %v7788_v27  ;;  %v7860_v26 = vld [vmem:[#allocation8 + $0x5a8] ss:$16 sps:$4 sm:$0xff]   ;;  %v7865_v27 = vld [vmem:[#allocation8 + $0x5c4] ss:$16 sps:$4 sm:$0xff]  }
 0x1f3   : > { %3387 = vmatprep.subr.bf16.mxu0 %v7793_v30  ;;  %3551 = vmatprep.subr.bf16.mxu1 %v7796_v31  ;;  %v7868_v30 = vld [vmem:[#allocation8 + $0x5cc] ss:$16 sps:$4 sm:$0xff]   ;;  %v1664_v31 = vadd.f32 %v8752_v9, %v861_v23  ;;  %vm1718_vm6 = vcmp.ge.f32.partialorder %v1707_v34, 0.0  ;;  %v7877_v9 = vld [vmem:[#allocation8 + $0x604] ss:$16 sps:$4 sm:$0xff]  }
 0x1f4   : > { %v7934_v23 = vld [vmem:[#allocation8 + $0x72c] ss:$16 sps:$4 sm:$0xff]  }
 0x1f5   : > { %vm1715_vm5 = vcmp.ge.f32.partialorder %v1664_v31, 0.0 }
 0x1f6   : > { %3388 = vmatpush1.bf16.msra.mxu0 %v7791_v36  ;;  %3552 = vmatpush1.bf16.msra.mxu1 %v7794_v37  ;;  %v7866_v36 = vld [vmem:[#allocation8 + $0x5c8] ss:$16 sps:$4 sm:$0xff]   ;;  %v7871_v37 = vld [vmem:[#allocation8 + $0x5e4] ss:$16 sps:$4 sm:$0xff]  }
 0x1f7   : > { %3389 = vmatprep.subr.bf16.mxu0 %v7799_v38  ;;  %3553 = vmatprep.subr.bf16.mxu1 %v7802_v41  ;;  %v7874_v38 = vld [vmem:[#allocation8 + $0x5ec] ss:$16 sps:$4 sm:$0xff]   ;;  %v1723_v41 = vmul.f32 0.01, %v1664_v31 }
 0x1fa   : > { %3390 = vmatpush1.bf16.msra.mxu0 %v7797_v43  ;;  %3554 = vmatpush1.bf16.msra.mxu1 %v7800_v44  ;;  %v1726_v43 = vmul.f32 0.01, %v1707_v34  ;;  %v7869_v44 = vld [vmem:[#allocation8 + $0x5e0] ss:$16 sps:$4 sm:$0xff]  }
 0x1fb   : > { %3391 = vmatprep.subr.bf16.mxu0 %v7805_v45  ;;  %3555 = vmatprep.subr.bf16.mxu1 %v7808_v46  ;;  %v7872_v45 = vld [vmem:[#allocation8 + $0x5e8] ss:$16 sps:$4 sm:$0xff]   ;;  %v1731_v46 = vsel %vm1715_vm5, %v1664_v31, %v1723_v41  ;;  %v7952_v41 = vld [vmem:[#allocation8 + $0x78c] ss:$16 sps:$4 sm:$0xff]  }
 0x1fc   : > { %v7938_v31 = vld [vmem:[#allocation8 + $0x748] ss:$16 sps:$4 sm:$0xff]  }
 0x1fe   : > { %3392 = vmatpush1.bf16.msra.mxu0 %v7803_v47  ;;  %3556 = vmatpush1.bf16.msra.mxu1 %v7806_v48  ;;  %v1734_v47 = vsel %vm1718_vm6, %v1707_v34, %v1726_v43  ;;  %v7875_v48 = vld [vmem:[#allocation8 + $0x600] ss:$16 sps:$4 sm:$0xff]   ;;  %v7943_v34 = vld [vmem:[#allocation8 + $0x764] ss:$16 sps:$4 sm:$0xff]   ;;  %v868_v43 = vsub.s32 6, %v8695_v33 }
 0x1ff   : > { %3393 = vmatprep.subr.bf16.mxu0 %v7811_v49  ;;  %3557 = vmatprep.subr.bf16.mxu1 %v7814_v50  ;;  %v7878_v49 = vld [vmem:[#allocation8 + $0x608] ss:$16 sps:$4 sm:$0xff]   ;;  %v1739_v50 = vpack.c.bf16 %v1731_v46, %v1731_v46 }
 0x200   : > { %v869_v46 = vrot.slane %v8728_v40, %v868_v43  ;;  %v7965_v40 = vld [vmem:[#allocation8 + $0x7e0] ss:$16 sps:$4 sm:$0xff]   ;;  %v8075_v43 = vld [vmem:[#allocation10 + $0x24] ss:$16 sps:$4 sm:$0xff]  }
 0x202   : > { %3394 = vmatpush1.bf16.msra.mxu0 %v7809_v51  ;;  %3558 = vmatpush1.bf16.msra.mxu1 %v7812_v52  ;;  %v7883_v51 = vld [vmem:[#allocation8 + $0x624] ss:$16 sps:$4 sm:$0xff]   ;;  %v7886_v52 = vld [vmem:[#allocation8 + $0x62c] ss:$16 sps:$4 sm:$0xff]  }
 0x203   : > { %3395 = vmatprep.subr.bf16.mxu0 %v7817_v54  ;;  %3559 = vmatprep.subr.bf16.mxu1 %v7820_v57  ;;  %v1742_v54 = vpack.c.bf16 %v1734_v47, %v1734_v47  ;;  %v7881_v57 = vld [vmem:[#allocation8 + $0x620] ss:$16 sps:$4 sm:$0xff]  }
 0x204   : > { %v7953_v47 = vld [vmem:[#allocation8 + $0x7a0] ss:$16 sps:$4 sm:$0xff]  }
 0x206   : > { %3396 = vmatpush1.bf16.msra.mxu0 %v7815_v58  ;;  %3560 = vmatpush1.bf16.msra.mxu1 %v7818_v59  ;;  %v7884_v58 = vld [vmem:[#allocation8 + $0x628] ss:$16 sps:$4 sm:$0xff]   ;;  %v7889_v59 = vld [vmem:[#allocation8 + $0x644] ss:$16 sps:$4 sm:$0xff]  }
 0x207   : > { %3397 = vmatprep.subr.bf16.mxu0 %v7823_v28  ;;  %3561 = vmatprep.subr.bf16.mxu1 %v7826_v60  ;;  %v7892_v28 = vld [vmem:[#allocation8 + $0x64c] ss:$16 sps:$4 sm:$0xff]   ;;  %v7887_v60 = vld [vmem:[#allocation8 + $0x640] ss:$16 sps:$4 sm:$0xff]  }
 0x20a   : > { %3398 = vmatpush1.bf16.msra.mxu0 %v7821_v61  ;;  %3562 = vmatpush1.bf16.msra.mxu1 %v7824_v62  ;;  %v7890_v61 = vld [vmem:[#allocation8 + $0x648] ss:$16 sps:$4 sm:$0xff]   ;;  %v7895_v62 = vld [vmem:[#allocation8 + $0x664] ss:$16 sps:$4 sm:$0xff]  }
 0x20b   : > { %3399 = vmatprep.subr.bf16.mxu0 %v7829_v63  ;;  %3563 = vmatprep.subr.bf16.mxu1 %v7832_v1  ;;  %v7898_v63 = vld [vmem:[#allocation8 + $0x66c] ss:$16 sps:$4 sm:$0xff]   ;;  %v7893_v1 = vld [vmem:[#allocation8 + $0x660] ss:$16 sps:$4 sm:$0xff]  }
 0x20e   : > { %3400 = vmatpush1.bf16.msra.mxu0 %v7827_v2  ;;  %3564 = vmatpush1.bf16.msra.mxu1 %v7830_v3  ;;  %v7896_v2 = vld [vmem:[#allocation8 + $0x668] ss:$16 sps:$4 sm:$0xff]   ;;  %v7901_v3 = vld [vmem:[#allocation8 + $0x684] ss:$16 sps:$4 sm:$0xff]  }
 0x20f   : > { %3401 = vmatprep.subr.bf16.mxu0 %v7835_v4  ;;  %3565 = vmatprep.subr.bf16.mxu1 %v7838_v5  ;;  %v7904_v4 = vld [vmem:[#allocation8 + $0x68c] ss:$16 sps:$4 sm:$0xff]   ;;  %v7899_v5 = vld [vmem:[#allocation8 + $0x680] ss:$16 sps:$4 sm:$0xff]  }
 0x212   : > { %3402 = vmatpush1.bf16.msra.mxu0 %v7833_v6  ;;  %3566 = vmatpush1.bf16.msra.mxu1 %v7836_v7  ;;  %v7902_v6 = vld [vmem:[#allocation8 + $0x688] ss:$16 sps:$4 sm:$0xff]   ;;  %v7907_v7 = vld [vmem:[#allocation8 + $0x6a4] ss:$16 sps:$4 sm:$0xff]  }
 0x213   : > { %3403 = vmatprep.subr.bf16.mxu0 %v7841_v8  ;;  %3567 = vmatprep.subr.bf16.mxu1 %v7844_v10  ;;  %v7910_v8 = vld [vmem:[#allocation8 + $0x6ac] ss:$16 sps:$4 sm:$0xff]   ;;  %v7905_v10 = vld [vmem:[#allocation8 + $0x6a0] ss:$16 sps:$4 sm:$0xff]  }
 0x216   : > { %3404 = vmatpush1.bf16.msra.mxu0 %v7839_v11  ;;  %3568 = vmatpush1.bf16.msra.mxu1 %v7842_v12  ;;  %v7908_v11 = vld [vmem:[#allocation8 + $0x6a8] ss:$16 sps:$4 sm:$0xff]   ;;  %v7913_v12 = vld [vmem:[#allocation8 + $0x6c4] ss:$16 sps:$4 sm:$0xff]  }
 0x217   : > { %3405 = vmatprep.subr.bf16.mxu0 %v7847_v55  ;;  %3569 = vmatprep.subr.bf16.mxu1 %v7850_v13  ;;  %v7916_v55 = vld [vmem:[#allocation8 + $0x6cc] ss:$16 sps:$4 sm:$0xff]   ;;  %v7911_v13 = vld [vmem:[#allocation8 + $0x6c0] ss:$16 sps:$4 sm:$0xff]  }
 0x21a   : > { %3406 = vmatpush1.bf16.msra.mxu0 %v7845_v0  ;;  %3570 = vmatpush1.bf16.msra.mxu1 %v7848_v14  ;;  %v7914_v0 = vld [vmem:[#allocation8 + $0x6c8] ss:$16 sps:$4 sm:$0xff]   ;;  %v7919_v14 = vld [vmem:[#allocation8 + $0x6e4] ss:$16 sps:$4 sm:$0xff]  }
 0x21b   : > { %3407 = vmatprep.subr.bf16.mxu0 %v7853_v15  ;;  %3571 = vmatprep.subr.bf16.mxu1 %v7856_v16  ;;  %v7922_v15 = vld [vmem:[#allocation8 + $0x6ec] ss:$16 sps:$4 sm:$0xff]   ;;  %v7917_v16 = vld [vmem:[#allocation8 + $0x6e0] ss:$16 sps:$4 sm:$0xff]  }
 0x21e   : > { %3408 = vmatpush1.bf16.msra.mxu0 %v7851_v19  ;;  %3572 = vmatpush1.bf16.msra.mxu1 %v7854_v20  ;;  %v7928_v19 = vld [vmem:[#allocation8 + $0x70c] ss:$16 sps:$4 sm:$0xff]   ;;  %v7923_v20 = vld [vmem:[#allocation8 + $0x700] ss:$16 sps:$4 sm:$0xff]  }
 0x21f   : > { %3409 = vmatprep.subr.bf16.mxu0 %v7859_v21  ;;  %3573 = vmatprep.subr.bf16.mxu1 %v7862_v22  ;;  %v7926_v21 = vld [vmem:[#allocation8 + $0x708] ss:$16 sps:$4 sm:$0xff]   ;;  %v7931_v22 = vld [vmem:[#allocation8 + $0x724] ss:$16 sps:$4 sm:$0xff]  }
 0x222   : > { %3410 = vmatpush1.bf16.msra.mxu0 %v7857_v25  ;;  %3574 = vmatpush1.bf16.msra.mxu1 %v7860_v26  ;;  %v7932_v25 = vld [vmem:[#allocation8 + $0x728] ss:$16 sps:$4 sm:$0xff]   ;;  %v7937_v26 = vld [vmem:[#allocation8 + $0x744] ss:$16 sps:$4 sm:$0xff]  }
 0x223   : > { %3411 = vmatprep.subr.bf16.mxu0 %v7865_v27  ;;  %3575 = vmatprep.subr.bf16.mxu1 %v7868_v30  ;;  %v7940_v27 = vld [vmem:[#allocation8 + $0x74c] ss:$16 sps:$4 sm:$0xff]   ;;  %v7935_v30 = vld [vmem:[#allocation8 + $0x740] ss:$16 sps:$4 sm:$0xff]  }
 0x226   : > { %3412 = vmatpush1.bf16.msra.mxu0 %v7863_v35  ;;  %3576 = vmatpush1.bf16.msra.mxu1 %v7866_v36  ;;  %v7946_v35 = vld [vmem:[#allocation8 + $0x76c] ss:$16 sps:$4 sm:$0xff]   ;;  %v7941_v36 = vld [vmem:[#allocation8 + $0x760] ss:$16 sps:$4 sm:$0xff]  }
 0x227   : > { %3413 = vmatprep.subr.bf16.mxu0 %v7871_v37  ;;  %3577 = vmatprep.subr.bf16.mxu1 %v7874_v38  ;;  %v7944_v37 = vld [vmem:[#allocation8 + $0x768] ss:$16 sps:$4 sm:$0xff]   ;;  %v7949_v38 = vld [vmem:[#allocation8 + $0x784] ss:$16 sps:$4 sm:$0xff]  }
 0x22a   : > { %3414 = vmatpush1.bf16.msra.mxu0 %v7869_v44  ;;  %3578 = vmatpush1.bf16.msra.mxu1 %v7872_v45  ;;  %v7947_v44 = vld [vmem:[#allocation8 + $0x780] ss:$16 sps:$4 sm:$0xff]   ;;  %v7950_v45 = vld [vmem:[#allocation8 + $0x788] ss:$16 sps:$4 sm:$0xff]  }
 0x22b   : > { %3424 = vmatprep.subr.bf16.mxu0 %v7877_v9  ;;  %3588 = vmatprep.subr.bf16.mxu1 %v7880_v32  ;;  %v7955_v9 = vld [vmem:[#allocation8 + $0x7a4] ss:$16 sps:$4 sm:$0xff]   ;;  %v7958_v32 = vld [vmem:[#allocation8 + $0x7ac] ss:$16 sps:$4 sm:$0xff]  }
 0x22d   : > { %3416 = vmatmul.mubr.bf16.vlgmr.msra.gmra.mrb[8].mxu0 %v1739_v50  ;;  %3580 = vmatmul.mubr.bf16.vlgmr.msra.gmra.mrb[8].mxu1 %v1739_v50  ;;  %v7964_v50 = vld [vmem:[#allocation8 + $0x7cc] ss:$16 sps:$4 sm:$0xff]  }
 0x22e   : > { %3425 = vmatpush1.bf16.msra.mxu0 %v7875_v48  ;;  %3589 = vmatpush1.bf16.msra.mxu1 %v7878_v49  ;;  %v7956_v48 = vld [vmem:[#allocation8 + $0x7a8] ss:$16 sps:$4 sm:$0xff]   ;;  %v7961_v49 = vld [vmem:[#allocation8 + $0x7c4] ss:$16 sps:$4 sm:$0xff]  }
 0x22f   : > { %3426 = vmatprep.subr.bf16.mxu0 %v7883_v51  ;;  %3590 = vmatprep.subr.bf16.mxu1 %v7886_v52  ;;  %v1705_v51 = vadd.f32 %v8754_v29, %v869_v46  ;;  %v7959_v52 = vld [vmem:[#allocation8 + $0x7c0] ss:$16 sps:$4 sm:$0xff]  }
 0x230   : > { %3456 = vmatprep.mubr.bf16.mxu0 %v1742_v54  ;;  %3620 = vmatprep.mubr.bf16.mxu1 %v1742_v54  ;;  %v7962_v54 = vld [vmem:[#allocation8 + $0x7c8] ss:$16 sps:$4 sm:$0xff]   ;;  %v8079_v46 = vld [vmem:[#allocation10 + $0x60] ss:$16 sps:$4 sm:$0xff]  }
 0x231   : > { %vm1717_vm7 = vcmp.ge.f32.partialorder %v1705_v51, 0.0  ;;  %v7973_v29 = vld [vmem:[%s10276_s7 + $0x4] ss:$8 sps:$4 sm:$0xff]  }
 0x232   : > { %3427 = vmatpush1.bf16.msra.mxu0 %v7881_v57  ;;  %3591 = vmatpush1.bf16.msra.mxu1 %v7884_v58  ;;  %v7967_v57 = vld [vmem:[#allocation8 + $0x7e4] ss:$16 sps:$4 sm:$0xff]   ;;  %v7970_v58 = vld [vmem:[#allocation8 + $0x7ec] ss:$16 sps:$4 sm:$0xff]  }
 0x233   : > { %3428 = vmatprep.subr.bf16.mxu0 %v7889_v59  ;;  %3592 = vmatprep.subr.bf16.mxu1 %v7892_v28  ;;  %v1725_v59 = vmul.f32 0.01, %v1705_v51  ;;  %v7968_v28 = vld [vmem:[#allocation8 + $0x7e8] ss:$16 sps:$4 sm:$0xff]  }
 0x236   : > { %3429 = vmatpush1.bf16.msra.mxu0 %v7887_v60  ;;  %3593 = vmatpush1.bf16.msra.mxu1 %v7890_v61  ;;  %v1733_v60 = vsel %vm1717_vm7, %v1705_v51, %v1725_v59  ;;  %v7971_v61 = vld [vmem:[%s10276_s7] ss:$8 sps:$4 sm:$0xff]  }
 0x237   : > { %3430 = vmatprep.subr.bf16.mxu0 %v7895_v62  ;;  %3594 = vmatprep.subr.bf16.mxu1 %v7898_v63  ;;  %v1741_v62 = vpack.c.bf16 %v1733_v60, %v1733_v60  ;;  %v7976_v63 = vld [vmem:[%s10276_s7 + $0x14] ss:$8 sps:$4 sm:$0xff]  }
 0x238   : > { %v8090_v51 = vld [vmem:[#allocation10 + $0xc4] ss:$16 sps:$4 sm:$0xff]   ;;  %v8094_v59 = vld [vmem:[#allocation10 + $0x100] ss:$16 sps:$4 sm:$0xff]  }
 0x239   : > { %v8100_v60 = vld [vmem:[#allocation10 + $0x140] ss:$16 sps:$4 sm:$0xff]  }
 0x23a   : > { %3431 = vmatpush1.bf16.msra.mxu0 %v7893_v1  ;;  %3595 = vmatpush1.bf16.msra.mxu1 %v7896_v2  ;;  %v7974_v1 = vld [vmem:[%s10276_s7 + $0x10] ss:$8 sps:$4 sm:$0xff]   ;;  %v7979_v2 = vld [vmem:[%s10276_s7 + $0x24] ss:$8 sps:$4 sm:$0xff]  }
 0x23b   : > { %3432 = vmatprep.subr.bf16.mxu0 %v7901_v3  ;;  %3596 = vmatprep.subr.bf16.mxu1 %v7904_v4  ;;  %v7977_v3 = vld [vmem:[%s10276_s7 + $0x20] ss:$8 sps:$4 sm:$0xff]   ;;  %v7982_v4 = vld [vmem:[%s10276_s7 + $0x34] ss:$8 sps:$4 sm:$0xff]  }
 0x23e   : > { %3433 = vmatpush1.bf16.msra.mxu0 %v7899_v5  ;;  %3597 = vmatpush1.bf16.msra.mxu1 %v7902_v6  ;;  %v7980_v5 = vld [vmem:[%s10276_s7 + $0x30] ss:$8 sps:$4 sm:$0xff]   ;;  %v7985_v6 = vld [vmem:[%s10276_s7 + $0x44] ss:$8 sps:$4 sm:$0xff]  }
 0x23f   : > { %3434 = vmatprep.subr.bf16.mxu0 %v7907_v7  ;;  %3598 = vmatprep.subr.bf16.mxu1 %v7910_v8  ;;  %v7983_v7 = vld [vmem:[%s10276_s7 + $0x40] ss:$8 sps:$4 sm:$0xff]   ;;  %v7988_v8 = vld [vmem:[%s10276_s7 + $0x54] ss:$8 sps:$4 sm:$0xff]  }
 0x242   : > { %3435 = vmatpush1.bf16.msra.mxu0 %v7905_v10  ;;  %3599 = vmatpush1.bf16.msra.mxu1 %v7908_v11  ;;  %v7986_v10 = vld [vmem:[%s10276_s7 + $0x50] ss:$8 sps:$4 sm:$0xff]   ;;  %v7991_v11 = vld [vmem:[%s10276_s7 + $0x64] ss:$8 sps:$4 sm:$0xff]  }
 0x243   : > { %3436 = vmatprep.subr.bf16.mxu0 %v7913_v12  ;;  %3600 = vmatprep.subr.bf16.mxu1 %v7916_v55  ;;  %v7989_v12 = vld [vmem:[%s10276_s7 + $0x60] ss:$8 sps:$4 sm:$0xff]   ;;  %v7994_v55 = vld [vmem:[%s10276_s7 + $0x74] ss:$8 sps:$4 sm:$0xff]  }
 0x246   : > { %3437 = vmatpush1.bf16.msra.mxu0 %v7911_v13  ;;  %3601 = vmatpush1.bf16.msra.mxu1 %v7914_v0  ;;  %v7992_v13 = vld [vmem:[%s10276_s7 + $0x70] ss:$8 sps:$4 sm:$0xff]   ;;  %v7997_v0 = vld [vmem:[%s10276_s7 + $0x84] ss:$8 sps:$4 sm:$0xff]  }
 0x247   : > { %3438 = vmatprep.subr.bf16.mxu0 %v7919_v14  ;;  %3602 = vmatprep.subr.bf16.mxu1 %v7922_v15  ;;  %v7995_v14 = vld [vmem:[%s10276_s7 + $0x80] ss:$8 sps:$4 sm:$0xff]   ;;  %v8000_v15 = vld [vmem:[%s10276_s7 + $0x94] ss:$8 sps:$4 sm:$0xff]  }
 0x24a   : > { %3439 = vmatpush1.bf16.msra.mxu0 %v7917_v16  ;;  %3603 = vmatpush1.bf16.msra.mxu1 %v7920_v17  ;;  %v7998_v16 = vld [vmem:[%s10276_s7 + $0x90] ss:$8 sps:$4 sm:$0xff]   ;;  %v8003_v17 = vld [vmem:[%s10276_s7 + $0xa4] ss:$8 sps:$4 sm:$0xff]  }
 0x24b   : > { %3440 = vmatprep.subr.bf16.mxu0 %v7925_v18  ;;  %3604 = vmatprep.subr.bf16.mxu1 %v7928_v19  ;;  %v8001_v18 = vld [vmem:[%s10276_s7 + $0xa0] ss:$8 sps:$4 sm:$0xff]   ;;  %v8006_v19 = vld [vmem:[%s10276_s7 + $0xb4] ss:$8 sps:$4 sm:$0xff]  }
 0x24e   : > { %3441 = vmatpush1.bf16.msra.mxu0 %v7923_v20  ;;  %3605 = vmatpush1.bf16.msra.mxu1 %v7926_v21  ;;  %v8004_v20 = vld [vmem:[%s10276_s7 + $0xb0] ss:$8 sps:$4 sm:$0xff]   ;;  %v8009_v21 = vld [vmem:[%s10276_s7 + $0xc4] ss:$8 sps:$4 sm:$0xff]  }
 0x24f   : > { %3442 = vmatprep.subr.bf16.mxu0 %v7931_v22  ;;  %3606 = vmatprep.subr.bf16.mxu1 %v7934_v23  ;;  %v8007_v22 = vld [vmem:[%s10276_s7 + $0xc0] ss:$8 sps:$4 sm:$0xff]   ;;  %v8012_v23 = vld [vmem:[%s10276_s7 + $0xd4] ss:$8 sps:$4 sm:$0xff]  }
 0x252   : > { %3443 = vmatpush1.bf16.msra.mxu0 %v7929_v24  ;;  %3607 = vmatpush1.bf16.msra.mxu1 %v7932_v25  ;;  %v8010_v24 = vld [vmem:[%s10276_s7 + $0xd0] ss:$8 sps:$4 sm:$0xff]   ;;  %v8015_v25 = vld [vmem:[%s10276_s7 + $0xe4] ss:$8 sps:$4 sm:$0xff]  }
 0x253   : > { %3444 = vmatprep.subr.bf16.mxu0 %v7937_v26  ;;  %3608 = vmatprep.subr.bf16.mxu1 %v7940_v27  ;;  %v8013_v26 = vld [vmem:[%s10276_s7 + $0xe0] ss:$8 sps:$4 sm:$0xff]   ;;  %v8018_v27 = vld [vmem:[%s10276_s7 + $0xf4] ss:$8 sps:$4 sm:$0xff]  }
 0x256   : > { %3445 = vmatpush1.bf16.msra.mxu0 %v7935_v30  ;;  %3609 = vmatpush1.bf16.msra.mxu1 %v7938_v31  ;;  %v8016_v30 = vld [vmem:[%s10276_s7 + $0xf0] ss:$8 sps:$4 sm:$0xff]   ;;  %v8021_v31 = vld [vmem:[%s10276_s7 + $0x104] ss:$8 sps:$4 sm:$0xff]  }
 0x257   : > { %3446 = vmatprep.subr.bf16.mxu0 %v7943_v34  ;;  %3610 = vmatprep.subr.bf16.mxu1 %v7946_v35  ;;  %v8067_v34 = vld [vmem:[%s10279_s10 + $0x8] ss:$16 sps:$4 sm:$0xff]   ;;  %v8069_v35 = vld [vmem:[%s10279_s10 + $0xc] ss:$16 sps:$4 sm:$0xff]  }
 0x25a   : > { %3447 = vmatpush1.bf16.msra.mxu0 %v7941_v36  ;;  %3611 = vmatpush1.bf16.msra.mxu1 %v7944_v37  ;;  %v8419_v36 = vmov 0   ;;  %v8072_v37 = vld [vmem:[#allocation10 + $0x4] ss:$16 sps:$4 sm:$0xff]  }
 0x25b   : > { %3448 = vmatprep.subr.bf16.mxu0 %v7949_v38  ;;  %3612 = vmatprep.subr.bf16.mxu1 %v7952_v41  ;;  %v8876_v38 = vld [vmem:[%s10270_s1] sm:$0x1]  ;;  %v8070_v41 = vld [vmem:[#allocation10] ss:$16 sps:$4 sm:$0xff]  }
 0x25e   : > { %3449 = vmatpush1.bf16.msra.mxu0 %v7947_v44  ;;  %3613 = vmatpush1.bf16.msra.mxu1 %v7950_v45  ;;  %v8073_v44 = vld [vmem:[#allocation10 + $0x20] ss:$16 sps:$4 sm:$0xff]   ;;  %v8078_v45 = vld [vmem:[#allocation10 + $0x44] ss:$16 sps:$4 sm:$0xff]  }
 0x25f   : > { %3450 = vmatprep.subr.bf16.mxu0 %v7955_v9  ;;  %3614 = vmatprep.subr.bf16.mxu1 %v7958_v32  ;;  %v8076_v9 = vld [vmem:[#allocation10 + $0x40] ss:$16 sps:$4 sm:$0xff]   ;;  %v8081_v32 = vld [vmem:[#allocation10 + $0x64] ss:$16 sps:$4 sm:$0xff]  }
 0x262   : > { %3451 = vmatpush1.bf16.msra.mxu0 %v7953_v47  ;;  %3615 = vmatpush1.bf16.msra.mxu1 %v7956_v48  ;;  %v8084_v47 = vld [vmem:[#allocation10 + $0x84] ss:$16 sps:$4 sm:$0xff]   ;;  %v8082_v48 = vld [vmem:[#allocation10 + $0x80] ss:$16 sps:$4 sm:$0xff]  }
 0x263   : > { %3452 = vmatprep.subr.bf16.mxu0 %v7961_v49  ;;  %3616 = vmatprep.subr.bf16.mxu1 %v7964_v50  ;;  %v8087_v49 = vld [vmem:[#allocation10 + $0xa4] ss:$16 sps:$4 sm:$0xff]   ;;  %v8085_v50 = vld [vmem:[#allocation10 + $0xa0] ss:$16 sps:$4 sm:$0xff]  }
 0x266   : > { %3453 = vmatpush1.bf16.msra.mxu0 %v7959_v52  ;;  %3617 = vmatpush1.bf16.msra.mxu1 %v7962_v54  ;;  %v8088_v52 = vld [vmem:[#allocation10 + $0xc0] ss:$16 sps:$4 sm:$0xff]   ;;  %v8093_v54 = vld [vmem:[#allocation10 + $0xe4] ss:$16 sps:$4 sm:$0xff]  }
 0x267   : > { %3454 = vmatprep.subr.bf16.mxu0 %v7967_v57  ;;  %3618 = vmatprep.subr.bf16.mxu1 %v7970_v58  ;;  %v8091_v57 = vld [vmem:[#allocation10 + $0xe0] ss:$16 sps:$4 sm:$0xff]   ;;  %v8096_v58 = vld [vmem:[#allocation10 + $0x104] ss:$16 sps:$4 sm:$0xff]  }
 0x26a   : > { %3455 = vmatpush1.bf16.msra.mxu0 %v7965_v40  ;;  %3619 = vmatpush1.bf16.msra.mxu1 %v7968_v28  ;;  %v8099_v40 = vld [vmem:[#allocation10 + $0x124] ss:$16 sps:$4 sm:$0xff]   ;;  %v8097_v28 = vld [vmem:[#allocation10 + $0x120] ss:$16 sps:$4 sm:$0xff]  }
 0x26b   : > { %4041 = vmatprep.subr.bf16.mxu0 %v7973_v29  ;;  %4265 = vmatprep.subr.bf16.mxu1 %v8069_v35  ;;  %v8102_v29 = vld [vmem:[#allocation10 + $0x144] ss:$16 sps:$4 sm:$0xff]  }
 0x26c   : > { %v8025_v35 = vld [vmem:[%s10276_s7 + $0x120] ss:$8 sps:$4 sm:$0xff]  }
 0x26d   : > { %3457 = vmatmul.mubr.bf16.vlgmr.msra.gmra.mrb[8].mxu0 %v1741_v62  ;;  %3621 = vmatmul.mubr.bf16.vlgmr.msra.gmra.mrb[8].mxu1 %v1741_v62  ;;  %v8103_v62 = vld [vmem:[#allocation10 + $0x160] ss:$16 sps:$4 sm:$0xff]  }
 0x26e   : > { %4042 = vmatpush1.bf16.msra.mxu0 %v7971_v61  ;;  %4297 = vmatprep.mubr.bf16.mxu1 %v8419_v36  ;;  %v8105_v61 = vld [vmem:[#allocation10 + $0x164] ss:$16 sps:$4 sm:$0xff]  }
 0x26f   : > { %4043 = vmatprep.subr.bf16.mxu0 %v7976_v63  ;;  %4266 = vmatpush1.bf16.msra.mxu1 %v8067_v34  ;;  %v8883_v63 = vld [vmem:[%s10275_s6] sm:$0xf]  ;;  %v8027_v34 = vld [vmem:[%s10276_s7 + $0x124] ss:$8 sps:$4 sm:$0xff]  }
 0x270   : > { %4626 = vmatprep.subr.bf16.mxu1 %v8072_v37  ;;  %v8030_v37 = vld [vmem:[%s10276_s7 + $0x134] ss:$8 sps:$4 sm:$0xff]  }
 0x272   : > { %4044 = vmatpush1.bf16.msra.mxu0 %v7974_v1  ;;  %v8108_v1 = vld [vmem:[#allocation10 + $0x184] ss:$16 sps:$4 sm:$0xff]  }
 0x273   : > { %4045 = vmatprep.subr.bf16.mxu0 %v7979_v2  ;;  %v2004_v2 = vrot.slane %v8883_v63, %v8723_v39 }
 0x275   : > { %7332 = vmatmul.mubr.msk.bf16.vlgmr.msra.gmra.mrb[12].mxu1 %vm4220_vm8, %v8876_v38 }
 0x276   : > { %4046 = vmatpush1.bf16.msra.mxu0 %v7977_v3  ;;  %4627 = vmatpush1.bf16.msra.mxu1 %v8070_v41  ;;  %v8106_v3 = vld [vmem:[#allocation10 + $0x180] ss:$16 sps:$4 sm:$0xff]  }
 0x277   : > { %4047 = vmatprep.subr.bf16.mxu0 %v7982_v4  ;;  %4628 = vmatprep.subr.bf16.mxu1 %v8075_v43  ;;  %v2008_v4 = vrot.slane %v8883_v63, %v8731_v42  ;;  %v8028_v41 = vld [vmem:[%s10276_s7 + $0x130] ss:$8 sps:$4 sm:$0xff]   ;;  %v8033_v43 = vld [vmem:[%s10276_s7 + $0x144] ss:$8 sps:$4 sm:$0xff]  }
 0x27a   : > { %4048 = vmatpush1.bf16.msra.mxu0 %v7980_v5  ;;  %4629 = vmatpush1.bf16.msra.mxu1 %v8073_v44  ;;  %v2016_v5 = vrot.slane %v8883_v63, %v8738_v53  ;;  %v8031_v44 = vld [vmem:[%s10276_s7 + $0x140] ss:$8 sps:$4 sm:$0xff]  }
 0x27b   : > { %4049 = vmatprep.subr.bf16.mxu0 %v7985_v6  ;;  %4630 = vmatprep.subr.bf16.mxu1 %v8078_v45  ;;  %v8111_v6 = vld [vmem:[#allocation10 + $0x1a4] ss:$16 sps:$4 sm:$0xff]  }
 0x27c   : > { %v8036_v45 = vld [vmem:[%s10276_s7 + $0x154] ss:$8 sps:$4 sm:$0xff]  }
 0x27e   : > { %4050 = vmatpush1.bf16.msra.mxu0 %v7983_v7  ;;  %4631 = vmatpush1.bf16.msra.mxu1 %v8076_v9  ;;  %v8034_v9 = vld [vmem:[%s10276_s7 + $0x150] ss:$8 sps:$4 sm:$0xff]  }
 0x27f   : > { %4051 = vmatprep.subr.bf16.mxu0 %v7988_v8  ;;  %4632 = vmatprep.subr.bf16.mxu1 %v8081_v32  ;;  %v8039_v32 = vld [vmem:[%s10276_s7 + $0x164] ss:$8 sps:$4 sm:$0xff]  }
 0x282   : > { %4052 = vmatpush1.bf16.msra.mxu0 %v7986_v10  ;;  %4633 = vmatpush1.bf16.msra.mxu1 %v8079_v46  ;;  %v8037_v46 = vld [vmem:[%s10276_s7 + $0x160] ss:$8 sps:$4 sm:$0xff]  }
 0x283   : > { %4053 = vmatprep.subr.bf16.mxu0 %v7991_v11  ;;  %4634 = vmatprep.subr.bf16.mxu1 %v8084_v47  ;;  %v8042_v47 = vld [vmem:[%s10276_s7 + $0x174] ss:$8 sps:$4 sm:$0xff]  }
 0x286   : > { %4054 = vmatpush1.bf16.msra.mxu0 %v7989_v12  ;;  %4635 = vmatpush1.bf16.msra.mxu1 %v8082_v48  ;;  %v8040_v48 = vld [vmem:[%s10276_s7 + $0x170] ss:$8 sps:$4 sm:$0xff]  }
 0x287   : > { %4055 = vmatprep.subr.bf16.mxu0 %v7994_v55  ;;  %4636 = vmatprep.subr.bf16.mxu1 %v8087_v49  ;;  %v8109_v55 = vld [vmem:[#allocation10 + $0x1a0] ss:$16 sps:$4 sm:$0xff]  }
 0x288   : > { %v8045_v49 = vld [vmem:[%s10276_s7 + $0x184] ss:$8 sps:$4 sm:$0xff]  }
 0x28a   : > { %4056 = vmatpush1.bf16.msra.mxu0 %v7992_v13  ;;  %4637 = vmatpush1.bf16.msra.mxu1 %v8085_v50  ;;  %v8043_v50 = vld [vmem:[%s10276_s7 + $0x180] ss:$8 sps:$4 sm:$0xff]  }
 0x28b   : > { %4057 = vmatprep.subr.bf16.mxu0 %v7997_v0  ;;  %4638 = vmatprep.subr.bf16.mxu1 %v8090_v51  ;;  %v8048_v51 = vld [vmem:[%s10276_s7 + $0x194] ss:$8 sps:$4 sm:$0xff]  }
 0x28e   : > { %4058 = vmatpush1.bf16.msra.mxu0 %v7995_v14  ;;  %4639 = vmatpush1.bf16.msra.mxu1 %v8088_v52  ;;  %v8046_v52 = vld [vmem:[%s10276_s7 + $0x190] ss:$8 sps:$4 sm:$0xff]  }
 0x28f   : > { %4059 = vmatprep.subr.bf16.mxu0 %v8000_v15  ;;  %4640 = vmatprep.subr.bf16.mxu1 %v8093_v54  ;;  %v8051_v54 = vld [vmem:[%s10276_s7 + $0x1a4] ss:$8 sps:$4 sm:$0xff]  }
 0x292   : > { %4060 = vmatpush1.bf16.msra.mxu0 %v7998_v16  ;;  %4641 = vmatpush1.bf16.msra.mxu1 %v8091_v57  ;;  %v8049_v57 = vld [vmem:[%s10276_s7 + $0x1a0] ss:$8 sps:$4 sm:$0xff]  }
 0x293   : > { %4061 = vmatprep.subr.bf16.mxu0 %v8003_v17  ;;  %4642 = vmatprep.subr.bf16.mxu1 %v8096_v58  ;;  %v8054_v58 = vld [vmem:[%s10276_s7 + $0x1b4] ss:$8 sps:$4 sm:$0xff]  }
 0x296   : > { %4062 = vmatpush1.bf16.msra.mxu0 %v8001_v18  ;;  %4643 = vmatpush1.bf16.msra.mxu1 %v8094_v59  ;;  %v8052_v59 = vld [vmem:[%s10276_s7 + $0x1b0] ss:$8 sps:$4 sm:$0xff]  }
 0x297   : > { %4063 = vmatprep.subr.bf16.mxu0 %v8006_v19  ;;  %4644 = vmatprep.subr.bf16.mxu1 %v8099_v40  ;;  %v8057_v40 = vld [vmem:[%s10276_s7 + $0x1c4] ss:$8 sps:$4 sm:$0xff]  }
 0x29a   : > { %4064 = vmatpush1.bf16.msra.mxu0 %v8004_v20  ;;  %4645 = vmatpush1.bf16.msra.mxu1 %v8097_v28  ;;  %v8055_v28 = vld [vmem:[%s10276_s7 + $0x1c0] ss:$8 sps:$4 sm:$0xff]  }
 0x29b   : > { %4065 = vmatprep.subr.bf16.mxu0 %v8009_v21  ;;  %4646 = vmatprep.subr.bf16.mxu1 %v8102_v29  ;;  %v8060_v29 = vld [vmem:[%s10276_s7 + $0x1d4] ss:$8 sps:$4 sm:$0xff]  }
 0x29e   : > { %4066 = vmatpush1.bf16.msra.mxu0 %v8007_v22  ;;  %4647 = vmatpush1.bf16.msra.mxu1 %v8100_v60  ;;  %v2012_v60 = vrot.slane %v8883_v63, %v8745_v56  ;;  %v8066_v63 = vld [vmem:[%s10276_s7 + $0x1f4] ss:$8 sps:$4 sm:$0xff]  }
 0x29f   : > { %4067 = vmatprep.subr.bf16.mxu0 %v8012_v23  ;;  %4648 = vmatprep.subr.bf16.mxu1 %v8105_v61  ;;  %v8058_v61 = vld [vmem:[%s10276_s7 + $0x1d0] ss:$8 sps:$4 sm:$0xff]  }
 0x2a2   : > { %4068 = vmatpush1.bf16.msra.mxu0 %v8010_v24  ;;  %4649 = vmatpush1.bf16.msra.mxu1 %v8103_v62  ;;  %v8063_v62 = vld [vmem:[%s10276_s7 + $0x1e4] ss:$8 sps:$4 sm:$0xff]  }
 0x2a3   : > { %4069 = vmatprep.subr.bf16.mxu0 %v8015_v25  ;;  %4650 = vmatprep.subr.bf16.mxu1 %v8108_v1  ;;  %v8019_v25 = vld [vmem:[%s10276_s7 + $0x100] ss:$8 sps:$4 sm:$0xff]  }
 0x2a6   : > { %4070 = vmatpush1.bf16.msra.mxu0 %v8013_v26  ;;  %4651 = vmatpush1.bf16.msra.mxu1 %v8106_v3 }
 0x2a7   : > { %4071 = vmatprep.subr.bf16.mxu0 %v8018_v27  ;;  %4652 = vmatprep.subr.bf16.mxu1 %v8111_v6  ;;  %v8024_v27 = vld [vmem:[%s10276_s7 + $0x114] ss:$8 sps:$4 sm:$0xff]  }
 0x2aa   : > { %4072 = vmatpush1.bf16.msra.mxu0 %v8016_v30  ;;  %4653 = vmatpush1.bf16.msra.mxu1 %v8109_v55  ;;  %v8118_v55 = vld [vmem:[%s10279_s10] ss:$16 sps:$4 sm:$0xff]  }
 0x2ab   : > { %4082 = vmatprep.subr.bf16.mxu0 %v8021_v31  ;;  %v8022_v31 = vld [vmem:[%s10276_s7 + $0x110] ss:$8 sps:$4 sm:$0xff]  }
 0x340   : > { %v3458_v7 = vpop.f32.mrb[8].mxu0  ;;  %v8891_v8 = vpop.f32.mrb[8].mxu1 }
 0x341   : > { %v7475_v10 = vadd.f32 %v3458_v7, %v2004_v2  ;;  %v3460_v11 = vpop.f32.mrb[9].mxu0  ;;  %v3624_v12 = vpop.f32.mrb[9].mxu1  ;;  %v7477_v1 = vadd.f32 %v8891_v8, %v2012_v60  ;;  %v8061_v2 = vld [vmem:[%s10276_s7 + $0x1e0] ss:$8 sps:$4 sm:$0xff]  }
 0x342   : > { %v7476_v13 = vadd.f32 %v3460_v11, %v2008_v4  ;;  %v7478_v0 = vadd.f32 %v3624_v12, %v2016_v5  ;;  %v3462_v14 = vpop.f32.mrb[10].mxu0  ;;  %v3626_v15 = vpop.f32.mrb[10].mxu1  ;;  %v8064_v4 = vld [vmem:[%s10276_s7 + $0x1f0] ss:$8 sps:$4 sm:$0xff]   ;;  %v8120_v12 = vld [vmem:[%s10279_s10 + $0x4] ss:$16 sps:$4 sm:$0xff]  }
 0x343   : > { %vm3629_vm9 = vcmp.ge.f32.partialorder %v7475_v10, 0.0  ;;  %v3633_v16 = vmul.f32 0.01, %v7475_v10  ;;  %v3463_v20 = vpop.f32.mrb[11].mxu0  ;;  %v3627_v21 = vpop.f32.mrb[11].mxu1  ;;  %vm3631_vm12 = vcmp.ge.f32.partialorder %v7477_v1, 0.0 }
 0x344   : > { %vm3630_vm10 = vcmp.ge.f32.partialorder %v7476_v13, 0.0  ;;  %v3634_v17 = vmul.f32 0.01, %v7476_v13  ;;  %vm3632_vm11 = vcmp.ge.f32.partialorder %v7478_v0, 0.0  ;;  %v3636_v18 = vmul.f32 0.01, %v7478_v0 }
 0x345   : > { %v3637_v19 = vsel %vm3629_vm9, %v7475_v10, %v3633_v16  ;;  %v3635_v3 = vmul.f32 0.01, %v7477_v1  ;;  %v8114_v7 = vld [vmem:[#allocation10 + $0x1c4] ss:$16 sps:$4 sm:$0xff]   ;;  %v8112_v8 = vld [vmem:[#allocation10 + $0x1c0] ss:$16 sps:$4 sm:$0xff]  }
 0x346   : > { %v3638_v22 = vsel %vm3630_vm10, %v7476_v13, %v3634_v17  ;;  %v3640_v23 = vsel %vm3632_vm11, %v7478_v0, %v3636_v18  ;;  %v3641_v26 = vpack.c.bf16 %v3637_v19, %v3637_v19  ;;  %4654 = vmatprep.subr.bf16.mxu1 %v8114_v7  ;;  %v8117_v10 = vld [vmem:[#allocation10 + $0x1e4] ss:$16 sps:$4 sm:$0xff]   ;;  %v8115_v11 = vld [vmem:[#allocation10 + $0x1e0] ss:$16 sps:$4 sm:$0xff]   ;;  %v8123_v13 = vld [vmem:[#allocation10 + $0xc] ss:$16 sps:$4 sm:$0xff]  }
 0x347   : > { %v3642_v24 = vpack.c.bf16 %v3638_v22, %v3638_v22  ;;  %v3644_v30 = vpack.c.bf16 %v3640_v23, %v3640_v23  ;;  %v3639_v5 = vsel %vm3631_vm12, %v7477_v1, %v3635_v3  ;;  %4655 = vmatpush1.bf16.msra.mxu1 %v8112_v8  ;;  %v3709_v16 = vld [vmem:[%s10328_s28] sm:$0x3]  ;;  %v8159_v60 = vld [vmem:[#allocation10 + $0x18c] ss:$16 sps:$4 sm:$0xff]  }
 0x348   : > { %v3643_v6 = vpack.c.bf16 %v3639_v5, %v3639_v5  ;;  %4656 = vmatprep.subr.bf16.mxu1 %v8117_v10  ;;  %v3714_v17 = vrot.slane %v3709_v16, %v8723_v39  ;;  %v3718_v18 = vrot.slane %v3709_v16, %v8731_v42  ;;  %v8160_v1 = vld [vmem:[#allocation10 + $0x1a8] ss:$16 sps:$4 sm:$0xff]   ;;  %v8168_v3 = vld [vmem:[#allocation10 + $0x1ec] ss:$16 sps:$4 sm:$0xff]  }
 0x349   : > { %4073 = vmatprep.mubr.bf16.mxu0 %v3642_v24  ;;  %v4708_v10 = vld [vmem:[%s10329_s17] sm:$0xf] }
 0x34a   : > { %4074 = vmatmul.mubr.bf16.vlgmr.msra.gmra.mrb[12].mxu0 %v3641_v26 }
 0x34b   : > { %4083 = vmatpush1.bf16.msra.mxu0 %v8019_v25  ;;  %4114 = vmatprep.mubr.bf16.mxu0 %v3644_v30 }
 0x34c   : > { %4084 = vmatprep.subr.bf16.mxu0 %v8024_v27  ;;  %4657 = vmatpush1.bf16.msra.mxu1 %v8115_v11  ;;  %v4713_v11 = vrot.slane %v4708_v10, %v8723_v39 }
 0x34d   : > { %4667 = vmatprep.subr.bf16.mxu1 %v8123_v13 }
 0x34f   : > { %4085 = vmatpush1.bf16.msra.mxu0 %v8022_v31  ;;  %v8121_v31 = vld [vmem:[#allocation10 + $0x8] ss:$16 sps:$4 sm:$0xff]  }
 0x350   : > { %4086 = vmatprep.subr.bf16.mxu0 %v8027_v34 }
 0x353   : > { %4087 = vmatpush1.bf16.msra.mxu0 %v8025_v35  ;;  %v8126_v35 = vld [vmem:[#allocation10 + $0x2c] ss:$16 sps:$4 sm:$0xff]  }
 0x354   : > { %4088 = vmatprep.subr.bf16.mxu0 %v8030_v37  ;;  %v8124_v37 = vld [vmem:[#allocation10 + $0x28] ss:$16 sps:$4 sm:$0xff]  }
 0x357   : > { %4089 = vmatpush1.bf16.msra.mxu0 %v8028_v41  ;;  %v8129_v41 = vld [vmem:[#allocation10 + $0x4c] ss:$16 sps:$4 sm:$0xff]  }
 0x358   : > { %4090 = vmatprep.subr.bf16.mxu0 %v8033_v43  ;;  %v8127_v43 = vld [vmem:[#allocation10 + $0x48] ss:$16 sps:$4 sm:$0xff]  }
 0x35b   : > { %4091 = vmatpush1.bf16.msra.mxu0 %v8031_v44  ;;  %v8132_v44 = vld [vmem:[#allocation10 + $0x6c] ss:$16 sps:$4 sm:$0xff]  }
 0x35c   : > { %4092 = vmatprep.subr.bf16.mxu0 %v8036_v45  ;;  %v8130_v45 = vld [vmem:[#allocation10 + $0x68] ss:$16 sps:$4 sm:$0xff]  }
 0x35f   : > { %4093 = vmatpush1.bf16.msra.mxu0 %v8034_v9  ;;  %v8135_v9 = vld [vmem:[#allocation10 + $0x8c] ss:$16 sps:$4 sm:$0xff]  }
 0x360   : > { %4094 = vmatprep.subr.bf16.mxu0 %v8039_v32  ;;  %v8133_v32 = vld [vmem:[#allocation10 + $0x88] ss:$16 sps:$4 sm:$0xff]  }
 0x363   : > { %4095 = vmatpush1.bf16.msra.mxu0 %v8037_v46  ;;  %v8138_v46 = vld [vmem:[#allocation10 + $0xac] ss:$16 sps:$4 sm:$0xff]  }
 0x364   : > { %4096 = vmatprep.subr.bf16.mxu0 %v8042_v47  ;;  %v8136_v47 = vld [vmem:[#allocation10 + $0xa8] ss:$16 sps:$4 sm:$0xff]  }
 0x367   : > { %4097 = vmatpush1.bf16.msra.mxu0 %v8040_v48  ;;  %v8141_v48 = vld [vmem:[#allocation10 + $0xcc] ss:$16 sps:$4 sm:$0xff]  }
 0x368   : > { %4098 = vmatprep.subr.bf16.mxu0 %v8045_v49  ;;  %v8139_v49 = vld [vmem:[#allocation10 + $0xc8] ss:$16 sps:$4 sm:$0xff]  }
 0x36b   : > { %4099 = vmatpush1.bf16.msra.mxu0 %v8043_v50  ;;  %v8144_v50 = vld [vmem:[#allocation10 + $0xec] ss:$16 sps:$4 sm:$0xff]  }
 0x36c   : > { %4100 = vmatprep.subr.bf16.mxu0 %v8048_v51  ;;  %v8142_v51 = vld [vmem:[#allocation10 + $0xe8] ss:$16 sps:$4 sm:$0xff]  }
 0x36f   : > { %4101 = vmatpush1.bf16.msra.mxu0 %v8046_v52  ;;  %v8147_v52 = vld [vmem:[#allocation10 + $0x10c] ss:$16 sps:$4 sm:$0xff]  }
 0x370   : > { %4102 = vmatprep.subr.bf16.mxu0 %v8051_v54  ;;  %v8145_v54 = vld [vmem:[#allocation10 + $0x108] ss:$16 sps:$4 sm:$0xff]  }
 0x373   : > { %4103 = vmatpush1.bf16.msra.mxu0 %v8049_v57  ;;  %v8150_v57 = vld [vmem:[#allocation10 + $0x12c] ss:$16 sps:$4 sm:$0xff]  }
 0x374   : > { %4104 = vmatprep.subr.bf16.mxu0 %v8054_v58  ;;  %v8148_v58 = vld [vmem:[#allocation10 + $0x128] ss:$16 sps:$4 sm:$0xff]  }
 0x377   : > { %4105 = vmatpush1.bf16.msra.mxu0 %v8052_v59  ;;  %v8153_v59 = vld [vmem:[#allocation10 + $0x14c] ss:$16 sps:$4 sm:$0xff]  }
 0x378   : > { %4106 = vmatprep.subr.bf16.mxu0 %v8057_v40  ;;  %v8151_v40 = vld [vmem:[#allocation10 + $0x148] ss:$16 sps:$4 sm:$0xff]  }
 0x37b   : > { %4107 = vmatpush1.bf16.msra.mxu0 %v8055_v28  ;;  %v8156_v28 = vld [vmem:[#allocation10 + $0x16c] ss:$16 sps:$4 sm:$0xff]  }
 0x37c   : > { %4108 = vmatprep.subr.bf16.mxu0 %v8060_v29  ;;  %v8154_v29 = vld [vmem:[#allocation10 + $0x168] ss:$16 sps:$4 sm:$0xff]  }
 0x37f   : > { %4109 = vmatpush1.bf16.msra.mxu0 %v8058_v61  ;;  %v8157_v61 = vld [vmem:[#allocation10 + $0x188] ss:$16 sps:$4 sm:$0xff]  }
 0x380   : > { %4110 = vmatprep.subr.bf16.mxu0 %v8063_v62  ;;  %v8162_v62 = vld [vmem:[#allocation10 + $0x1ac] ss:$16 sps:$4 sm:$0xff]  }
 0x383   : > { %4111 = vmatpush1.bf16.msra.mxu0 %v8061_v2  ;;  %v8165_v2 = vld [vmem:[#allocation10 + $0x1cc] ss:$16 sps:$4 sm:$0xff]  }
 0x384   : > { %4112 = vmatprep.subr.bf16.mxu0 %v8066_v63  ;;  %v8163_v63 = vld [vmem:[#allocation10 + $0x1c8] ss:$16 sps:$4 sm:$0xff]  }
 0x387   : > { %4113 = vmatpush1.bf16.msra.mxu0 %v8064_v4  ;;  %v8166_v4 = vld [vmem:[#allocation10 + $0x1e8] ss:$16 sps:$4 sm:$0xff]  }
 0x388   : > { %4224 = vmatprep.subr.bf16.mxu0 %v8120_v12 }
 0x38a   : > { %4115 = vmatmul.mubr.bf16.vlgmr.msra.gmra.mrb[12].mxu0 %v3643_v6 }
 0x38b   : > { %4256 = vmatprep.mubr.bf16.mxu0 %v8419_v36  ;;  %4225 = vmatpush1.bf16.msra.mxu0 %v8118_v55  ;;  %v8998_v36 = vpop.f32.mrb[12].mxu1  ;;  %v4717_v55 = vrot.slane %v4708_v10, %v8731_v42 }
 0x38c   : > { %v9000_v0 = vpop.f32.mrb[13].mxu1 }
 0x38d   : > { %v4303_v14 = vpop.f32.mrb[14].mxu1 }
 0x38e   : > { %v4304_v15 = vpop.f32.mrb[15].mxu1 }
 0x392   : > { %7331 = vmatmul.mubr.msk.bf16.vlgmr.msra.gmra.mrb[16].mxu0 %vm4220_vm8, %v8876_v38 }
 0x45d   : > { %v4116_v19 = vpop.f32.mrb[12].mxu0 }
 0x45e   : > { %v7479_v20 = vadd.f32 %v4116_v19, %v3714_v17  ;;  %v4118_v21 = vpop.f32.mrb[13].mxu0 }
 0x45f   : > { %v7480_v22 = vadd.f32 %v4118_v21, %v3718_v18  ;;  %v4120_v23 = vpop.f32.mrb[14].mxu0  ;;  %v8420_v21 = vmov 1983009808  }
 0x460   : > { %vm4123_vm13 = vcmp.ge.f32.partialorder %v7479_v20, 0.0  ;;  %v4125_v38 = vmul.f32 0.01, %v7479_v20  ;;  %v4121_v24 = vpop.f32.mrb[15].mxu0  ;;  %v4721_v23 = vrot.slane %v4708_v10, %v8745_v56 }
 0x461   : > { %vm4124_vm14 = vcmp.ge.f32.partialorder %v7480_v22, 0.0  ;;  %v4126_v25 = vmul.f32 0.01, %v7480_v22 }
 0x462   : > { %v4127_v26 = vsel %vm4123_vm13, %v7479_v20, %v4125_v38 }
 0x463   : > { %v4128_v27 = vsel %vm4124_vm14, %v7480_v22, %v4126_v25  ;;  %v9007_v34 = vpack.c.bf16 %v4127_v26, %v4127_v26  ;;  %v4741_v22 = vunpack.c.l.s4 %v8420_v21  ;;  %v4725_v25 = vrot.slane %v4708_v10, %v8738_v53 }
 0x464   : > { %v4130_v30 = vpack.c.bf16 %v4128_v27, %v4128_v27 }
 0x465   : > { %v4258_v5 = vpop.f32.mrb[16].mxu0  ;;  %v4742_v38 = vunpack.c.0.s8 %v4741_v22 }
 0x466   : > { %4658 = vmatprep.mubr.bf16.mxu1 %v4130_v30  ;;  %v4260_v6 = vpop.f32.mrb[17].mxu0 }
 0x467   : > { %4659 = vmatmul.mubr.bf16.vlgmr.msra.gmra.mrb[16].mxu1 %v9007_v34  ;;  %v4262_v7 = vpop.f32.mrb[18].mxu0 }
 0x468   : > { %4668 = vmatpush1.bf16.msra.mxu1 %v8121_v31  ;;  %4699 = vmatprep.mubr.bf16.mxu1 %v4130_v30  ;;  %v4263_v8 = vpop.f32.mrb[19].mxu0 }
 0x469   : > { %4669 = vmatprep.subr.bf16.mxu1 %v8126_v35 }
 0x46c   : > { %4670 = vmatpush1.bf16.msra.mxu1 %v8124_v37 }
 0x46d   : > { %4671 = vmatprep.subr.bf16.mxu1 %v8129_v41 }
 0x470   : > { %4672 = vmatpush1.bf16.msra.mxu1 %v8127_v43 }
 0x471   : > { %4673 = vmatprep.subr.bf16.mxu1 %v8132_v44 }
 0x474   : > { %4674 = vmatpush1.bf16.msra.mxu1 %v8130_v45 }
 0x475   : > { %4675 = vmatprep.subr.bf16.mxu1 %v8135_v9 }
 0x478   : > { %4676 = vmatpush1.bf16.msra.mxu1 %v8133_v32 }
 0x479   : > { %4677 = vmatprep.subr.bf16.mxu1 %v8138_v46 }
 0x47c   : > { %4678 = vmatpush1.bf16.msra.mxu1 %v8136_v47 }
 0x47d   : > { %4679 = vmatprep.subr.bf16.mxu1 %v8141_v48 }
 0x480   : > { %4680 = vmatpush1.bf16.msra.mxu1 %v8139_v49 }
 0x481   : > { %4681 = vmatprep.subr.bf16.mxu1 %v8144_v50 }
 0x484   : > { %4682 = vmatpush1.bf16.msra.mxu1 %v8142_v51 }
 0x485   : > { %4683 = vmatprep.subr.bf16.mxu1 %v8147_v52 }
 0x488   : > { %4684 = vmatpush1.bf16.msra.mxu1 %v8145_v54 }
 0x489   : > { %4685 = vmatprep.subr.bf16.mxu1 %v8150_v57 }
 0x48c   : > { %4686 = vmatpush1.bf16.msra.mxu1 %v8148_v58 }
 0x48d   : > { %4687 = vmatprep.subr.bf16.mxu1 %v8153_v59 }
 0x490   : > { %4688 = vmatpush1.bf16.msra.mxu1 %v8151_v40 }
 0x491   : > { %4689 = vmatprep.subr.bf16.mxu1 %v8156_v28 }
 0x494   : > { %4690 = vmatpush1.bf16.msra.mxu1 %v8154_v29 }
 0x495   : > { %4691 = vmatprep.subr.bf16.mxu1 %v8159_v60 }
 0x498   : > { %4692 = vmatpush1.bf16.msra.mxu1 %v8157_v61 }
 0x499   : > { %4693 = vmatprep.subr.bf16.mxu1 %v8162_v62 }
 0x49c   : > { %4694 = vmatpush1.bf16.msra.mxu1 %v8160_v1 }
 0x49d   : > { %4695 = vmatprep.subr.bf16.mxu1 %v8165_v2 }
 0x4a0   : > { %4696 = vmatpush1.bf16.msra.mxu1 %v8163_v63 }
 0x4a1   : > { %4697 = vmatprep.subr.bf16.mxu1 %v8168_v3 }
 0x4a4   : > { %4698 = vmatpush1.bf16.msra.mxu1 %v8166_v4 }
 0x4a7   : > { %4700 = vmatmul.mubr.bf16.vlgmr.msra.gmra.mrb[20].mxu1 %v9007_v34  ;;  %v4745_v34 = vsub.s32 %v4742_v38, %v8695_v33 }
 0x53a   : > { %v4660_v12 = vpop.f32.mrb[16].mxu1 }
 0x53b   : > { %v4661_v13 = vadd.f32 %v4660_v12, %v4258_v5  ;;  %v4662_v14 = vpop.f32.mrb[17].mxu1 }
 0x53c   : > { %v4663_v15 = vadd.f32 %v4662_v14, %v4260_v6  ;;  %v4664_v16 = vpop.f32.mrb[18].mxu1 }
 0x53d   : > { %v4730_v17 = vadd.f32 %v4713_v11, %v4661_v13  ;;  %v4665_v18 = vpop.f32.mrb[19].mxu1 }
 0x53e   : > { %v4731_v19 = vadd.f32 %v4717_v55, %v4663_v15 }
 0x540   : > { %v4738_v20 = vcombine.low %v4730_v17, %v4731_v19 }
 0x542   : > { %v4746_v41 = vrot.slane %v4738_v20, %v4745_v34 }
 0x57a   : > { %v4701_v24 = vpop.f32.mrb[20].mxu1 }
 0x57b   : > { %v4702_v39 = vadd.f32 %v4701_v24, %v8998_v36  ;;  %v4703_v26 = vpop.f32.mrb[21].mxu1 }
 0x57c   : > { %v4704_v42 = vadd.f32 %v4703_v26, %v9000_v0  ;;  %v4705_v27 = vpop.f32.mrb[22].mxu1 }
 0x57d   : > { %v4732_v30 = vadd.f32 %v4721_v23, %v4702_v39  ;;  %v4706_v31 = vpop.f32.mrb[23].mxu1 }
 0x57e   : > { %v4733_v35 = vadd.f32 %v4725_v25, %v4704_v42 }
 0x580   : > { %v4739_v37 = vcombine.low %v4732_v30, %v4733_v35 }
 0x582   : > { %v4753_v43 = vrot.slane %v4739_v37, %v4745_v34 }
 0x584   : > { %v4754_v44 = vcombine.low %v4746_v41, %v4753_v43 }
 0x586   : > { %4756 = vst [vmem:[#allocation2] sm:$0xff] %v4754_v44 }
 0x587 PF: > { %s10330_s15 = sld [smem:[#allocation36_spill]]  ;;  %vm4853_vm15 = vcmask 1043456   ;;  %v8421_v9 = vmov 0   ;;  %v8175_v47 = vld [vmem:[%s8680_s26] sm:$0xff]   ;;  %vm4828_vm0 = vcmask 64512   ;;  %v8176_v48 = vld [vmem:[%s8680_s26 + $0x8] sm:$0xff]   ;;  %v10298_v1 = vlaneseq }
 0x588   : > { %4898 = vmatprep.mubr.bf16.mxu0 %v8421_v9  ;;  %5011 = vmatprep.mubr.bf16.mxu1 %v8421_v9  ;;  %v8177_v49 = vld [vmem:[%s8680_s26 + $0x10] sm:$0xff]   ;;  %v8178_v50 = vld [vmem:[%s8680_s26 + $0x18] sm:$0xff]   ;;  %v8179_v51 = vld [vmem:[%s8680_s26 + $0x20] sm:$0xff]   ;;  %s10332_s18 = sld [smem:[#allocation38_spill]]  ;;  %s10367_s8 = sld [smem:[#allocation18_spill]] }
 0x589   : > { %8169 = vset.pattern.permute.xlu0 %v8421_v9  ;;  %8170 = vset.pattern.permute.xlu1 %v8421_v9  ;;  %v8180_v52 = vld [vmem:[%s8680_s26 + $0x28] sm:$0xff]   ;;  %v8181_v54 = vld [vmem:[%s8680_s26 + $0x30] sm:$0xff]   ;;  %v8182_v57 = vld [vmem:[%s8680_s26 + $0x38] sm:$0xff]   ;;  %v9116_v2 = vshrl.u32 %v10298_v1, 7  ;;  %s7471_s24 = sshll.u32 %s8527_s14, 5  ;;  %s6766_s12 = sshll.u32 %s8691_s25, 4  ;;  %s10225_s12 = int_to_ptr.vmem [resolvable:$true] %s6766_s12 }
 0x58a   : > { %v8183_v58 = vld [vmem:[%s8680_s26 + $0x40] sm:$0xff]   ;;  %v8184_v59 = vld [vmem:[%s8680_s26 + $0x48] sm:$0xff]   ;;  %v8185_v40 = vld [vmem:[%s8680_s26 + $0x50] sm:$0xff]   ;;  %s10368_s29 = sld [smem:[#allocation39_spill]]  ;;  %s6753_s14 = scalar_lea.sflag [#allocation7], %s8677_s30 }
 0x58b   : > { %v8186_v28 = vld [vmem:[%s8680_s26 + $0x58] sm:$0xff]   ;;  %v8187_v29 = vld [vmem:[%s8680_s26 + $0x60] sm:$0xff]   ;;  %v8188_v60 = vld [vmem:[%s8680_s26 + $0x68] sm:$0xff]   ;;  %10331 = vst [vmem:[#allocation20_spill] sm:$0xff] %v9116_v2  ;;  %v5095_v63 = vsub.s32 0, %v9116_v2  ;;  %v5099_v4 = vsub.s32 1, %v9116_v2 }
 0x58c   : > { %v8189_v61 = vld [vmem:[%s8680_s26 + $0x70] sm:$0xff]   ;;  %v8190_v62 = vld [vmem:[%s8680_s26 + $0x78] sm:$0xff]   ;;  %v5103_v5 = vsub.s32 2, %v9116_v2  ;;  %v5107_v7 = vsub.s32 3, %v9116_v2  ;;  %s8339_s17 = scalar_lea.vmem %s10225_s12, 32  ;;  %s8422_s19 = smov [#allocation11]  }
 0x58d   : > { %v4757_v53 = vld [vmem:[%s10330_s15] sm:$0xff]  ;;  %v4758_v56 = vld [vmem:[%s10330_s15 + $0x8] sm:$0xff]  ;;  %p8340_p2 = scmp.ne.s32.totalorder %s10225_s12, %s8339_s17  ;;  %s8343_s27 = sshll.u32 %s8422_s19, 4  ;;  %s8344_s27 = int_to_ptr.vmem [resolvable:$false] %s8343_s27 }
 0x58e   : > { %v7406_v36 = vcombine.high %v4757_v53, %v4757_v53  ;;  %v7408_v0 = vcombine.high %v4758_v56, %v4758_v56  ;;  %v7405_v33 = vcombine.low %v4757_v53, %v4757_v53  ;;  %v7407_v45 = vcombine.low %v4758_v56, %v4758_v56  ;;  %v4777_v3 = vld [vmem:[#allocation2] ss:$2 sm:$0xf]  ;;  %v5815_v35 = vld [vmem:[#allocation2 + $0x1] ss:$2 sm:$0xf]  ;;  %p8346_p9 = scmp.lt.s32.totalorder %s10225_s12, %s8344_s27 }
 0x58f   : > { %v9121_v6 = vrot.slane %v4777_v3, %v5095_v63  ;;  %v9124_v8 = vrot.slane %v4777_v3, %v5099_v4  ;;  %v9126_v12 = vrot.slane %v4777_v3, %v5103_v5  ;;  %v9129_v15 = vrot.slane %v4777_v3, %v5107_v7  ;;  %v4759_v19 = vld [vmem:[%s10332_s18] sm:$0xf]  ;;  %p10369_p4 = scmp.ne.s32.totalorder %s10367_s8, 0  ;;  %s8345_s11 = scalar_lea.vmem %s8344_s27, 64 }
 0x590   : > { %7409 = vmatprep.subr.msk.bf16.mxu0 %vm4853_vm15, %v7406_v36  ;;  %7418 = vmatprep.subr.msk.bf16.mxu1 %vm4853_vm15, %v7408_v0  ;;  %v4855_v32 = vsel %vm4853_vm15, %v7405_v33, 0  ;;  %v4861_v46 = vsel %vm4853_vm15, %v7407_v45, 0  ;;  %v9139_v26 = vrot.slane %v4759_v19, %v5095_v63  ;;  %v9141_v42 = vrot.slane %v4759_v19, %v5099_v4  ;;  %s10223_s16 = scalar_lea.hbm %s10368_s29, %s7471_s24  ;;  %p8347_p0 = scmp.lt.s32.totalorder %s8345_s11, %s8339_s17 }
 0x591   : > { %4867 = vmatpush1.bf16.msra.mxu0 %v4855_v32  ;;  %4980 = vmatpush1.bf16.msra.mxu1 %v4861_v46  ;;  %v9144_v37 = vrot.slane %v4759_v19, %v5103_v5  ;;  %v9146_v53 = vrot.slane %v4759_v19, %v5107_v7  ;;  %p8341_p7 = pnand %p8340_p2, %p10369_p4 }
 0x592   : > { %7452 = vmatprep.subr.msk.bf16.mxu0 %vm4853_vm15, %v7406_v36  ;;  %7461 = vmatprep.subr.msk.bf16.mxu1 %vm4853_vm15, %v7408_v0  ;;  %p8348_p3 = por %p8347_p0, %p8346_p9 }
 0x593   : > { %p8342_p8 = pneg %p8341_p7 }
 0x594   : > { %7410 = vmatmul.mubr.msk.bf16.vlgmr.msra.gmra.mrb[0].mxu0 %vm4828_vm0, %v8175_v47  ;;  %7419 = vmatmul.mubr.msk.bf16.vlgmr.msra.gmra.mrb[0].mxu1 %vm4828_vm0, %v8175_v47 }
 0x595   : > { %5881 = vmatpush1.bf16.msra.mxu0 %v4855_v32  ;;  %5994 = vmatpush1.bf16.msra.mxu1 %v4861_v46  ;;  %p8349_p1 = pnand %p8348_p3, %p8342_p8 }
 0x596   : > { %4908 = vmatprep.mubr.bf16.mxu0 %v8421_v9  ;;  %5021 = vmatprep.mubr.bf16.mxu1 %v8421_v9 }
 0x59c   : > { %7411 = vmatmul.mubr.msk.bf16.gmra.mrb[4].mxu0 %vm4828_vm0, %v8176_v48  ;;  %7420 = vmatmul.mubr.msk.bf16.gmra.mrb[4].mxu1 %vm4828_vm0, %v8176_v48 }
 0x59d   : > { %4918 = vmatprep.mubr.bf16.mxu0 %v8421_v9  ;;  %5031 = vmatprep.mubr.bf16.mxu1 %v8421_v9 }
 0x5a4   : > { %7412 = vmatmul.mubr.msk.bf16.gmra.mrb[8].mxu0 %vm4828_vm0, %v8177_v49  ;;  %7421 = vmatmul.mubr.msk.bf16.gmra.mrb[8].mxu1 %vm4828_vm0, %v8177_v49  ;;  %v9153_v49 = vrot.slane %v5815_v35, %v5095_v63 }
 0x5a5   : > { %4928 = vmatprep.mubr.bf16.mxu0 %v8421_v9  ;;  %5041 = vmatprep.mubr.bf16.mxu1 %v8421_v9 }
 0x5ac   : > { %7413 = vmatmul.mubr.msk.bf16.gmra.mrb[12].mxu0 %vm4828_vm0, %v8178_v50  ;;  %7422 = vmatmul.mubr.msk.bf16.gmra.mrb[12].mxu1 %vm4828_vm0, %v8178_v50  ;;  %v9155_v50 = vrot.slane %v5815_v35, %v5103_v5 }
 0x5ad   : > { %4938 = vmatprep.mubr.bf16.mxu0 %v8421_v9  ;;  %5051 = vmatprep.mubr.bf16.mxu1 %v8421_v9 }
 0x5b4   : > { %7414 = vmatmul.mubr.msk.bf16.gmra.mrb[16].mxu0 %vm4828_vm0, %v8179_v51  ;;  %7423 = vmatmul.mubr.msk.bf16.gmra.mrb[16].mxu1 %vm4828_vm0, %v8179_v51  ;;  %v9157_v51 = vrot.slane %v5815_v35, %v5107_v7 }
 0x5b5   : > { %4948 = vmatprep.mubr.bf16.mxu0 %v8421_v9  ;;  %5061 = vmatprep.mubr.bf16.mxu1 %v8421_v9 }
 0x5bc   : > { %7415 = vmatmul.mubr.msk.bf16.gmra.mrb[20].mxu0 %vm4828_vm0, %v8180_v52  ;;  %7424 = vmatmul.mubr.msk.bf16.gmra.mrb[20].mxu1 %vm4828_vm0, %v8180_v52 }
 0x5bd   : > { %4958 = vmatprep.mubr.bf16.mxu0 %v8421_v9  ;;  %5071 = vmatprep.mubr.bf16.mxu1 %v8421_v9 }
 0x5c4   : > { %7416 = vmatmul.mubr.msk.bf16.gmra.mrb[24].mxu0 %vm4828_vm0, %v8181_v54  ;;  %7425 = vmatmul.mubr.msk.bf16.gmra.mrb[24].mxu1 %vm4828_vm0, %v8181_v54 }
 0x5c5   : > { %4968 = vmatprep.mubr.bf16.mxu0 %v8421_v9  ;;  %5081 = vmatprep.mubr.bf16.mxu1 %v8421_v9 }
 0x5cc   : > { %7417 = vmatmul.mubr.msk.bf16.gmra.mrb[28].mxu0 %vm4828_vm0, %v8182_v57  ;;  %7426 = vmatmul.mubr.msk.bf16.gmra.mrb[28].mxu1 %vm4828_vm0, %v8182_v57  ;;  %v9161_v57 = vrot.slane %v5815_v35, %v5099_v4 }
 0x5cd   : > { %5912 = vmatprep.mubr.bf16.mxu0 %v8421_v9  ;;  %6025 = vmatprep.mubr.bf16.mxu1 %v8421_v9 }
 0x5d4   : > { %7453 = vmatmul.mubr.msk.bf16.vlgmr.msra.gmra.mrb[32].mxu0 %vm4828_vm0, %v8183_v58  ;;  %7462 = vmatmul.mubr.msk.bf16.vlgmr.msra.gmra.mrb[32].mxu1 %vm4828_vm0, %v8183_v58 }
 0x5d5   : > { %5922 = vmatprep.mubr.bf16.mxu0 %v8421_v9  ;;  %6035 = vmatprep.mubr.bf16.mxu1 %v8421_v9 }
 0x5dc   : > { %7454 = vmatmul.mubr.msk.bf16.gmra.mrb[36].mxu0 %vm4828_vm0, %v8184_v59  ;;  %7463 = vmatmul.mubr.msk.bf16.gmra.mrb[36].mxu1 %vm4828_vm0, %v8184_v59 }
 0x5dd   : > { %5932 = vmatprep.mubr.bf16.mxu0 %v8421_v9  ;;  %6045 = vmatprep.mubr.bf16.mxu1 %v8421_v9 }
 0x5e4   : > { %7455 = vmatmul.mubr.msk.bf16.gmra.mrb[40].mxu0 %vm4828_vm0, %v8185_v40  ;;  %7464 = vmatmul.mubr.msk.bf16.gmra.mrb[40].mxu1 %vm4828_vm0, %v8185_v40 }
 0x5e5   : > { %5942 = vmatprep.mubr.bf16.mxu0 %v8421_v9  ;;  %6055 = vmatprep.mubr.bf16.mxu1 %v8421_v9 }
 0x5ec   : > { %7456 = vmatmul.mubr.msk.bf16.gmra.mrb[44].mxu0 %vm4828_vm0, %v8186_v28  ;;  %7465 = vmatmul.mubr.msk.bf16.gmra.mrb[44].mxu1 %vm4828_vm0, %v8186_v28 }
 0x5ed   : > { %5952 = vmatprep.mubr.bf16.mxu0 %v8421_v9  ;;  %6065 = vmatprep.mubr.bf16.mxu1 %v8421_v9 }
 0x5f4   : > { %7457 = vmatmul.mubr.msk.bf16.gmra.mrb[48].mxu0 %vm4828_vm0, %v8187_v29  ;;  %7466 = vmatmul.mubr.msk.bf16.gmra.mrb[48].mxu1 %vm4828_vm0, %v8187_v29 }
 0x5f5   : > { %5962 = vmatprep.mubr.bf16.mxu0 %v8421_v9  ;;  %6075 = vmatprep.mubr.bf16.mxu1 %v8421_v9 }
 0x5fc   : > { %7458 = vmatmul.mubr.msk.bf16.gmra.mrb[52].mxu0 %vm4828_vm0, %v8188_v60  ;;  %7467 = vmatmul.mubr.msk.bf16.gmra.mrb[52].mxu1 %vm4828_vm0, %v8188_v60 }
 0x5fd   : > { %5972 = vmatprep.mubr.bf16.mxu0 %v8421_v9  ;;  %6085 = vmatprep.mubr.bf16.mxu1 %v8421_v9 }
 0x604   : > { %7459 = vmatmul.mubr.msk.bf16.gmra.mrb[56].mxu0 %vm4828_vm0, %v8189_v61  ;;  %7468 = vmatmul.mubr.msk.bf16.gmra.mrb[56].mxu1 %vm4828_vm0, %v8189_v61 }
 0x605   : > { %5982 = vmatprep.mubr.bf16.mxu0 %v8421_v9  ;;  %6095 = vmatprep.mubr.bf16.mxu1 %v8421_v9 }
 0x60c   : > { %7460 = vmatmul.mubr.msk.bf16.gmra.mrb[60].mxu0 %vm4828_vm0, %v8190_v62  ;;  %7469 = vmatmul.mubr.msk.bf16.gmra.mrb[60].mxu1 %vm4828_vm0, %v8190_v62 }
 0x667   : > { %v4900_v10 = vpop.f32.mrb[0].mxu0  ;;  %v5013_v11 = vpop.f32.mrb[0].mxu1 }
 0x668   : > { %v5113_v55 = vadd.f32 %v9121_v6, %v4900_v10  ;;  %v4902_v13 = vpop.f32.mrb[1].mxu0  ;;  %v5015_v14 = vpop.f32.mrb[1].mxu1  ;;  %v5115_v21 = vadd.f32 %v9126_v12, %v5013_v11 }
 0x669   : > { %v5114_v16 = vadd.f32 %v9124_v8, %v4902_v13  ;;  %v4904_v17 = vpop.f32.mrb[2].mxu0  ;;  %v5017_v18 = vpop.f32.mrb[2].mxu1  ;;  %v5116_v23 = vadd.f32 %v9129_v15, %v5015_v14 }
 0x66a   : > { %v5241_v20 = vmul.f32 0.01, %v5113_v55  ;;  %vm5177_vm1 = vcmp.ge.f32.partialorder %v5113_v55, 0.0  ;;  %v4906_v38 = vpop.f32.mrb[3].mxu0  ;;  %v5019_v24 = vpop.f32.mrb[3].mxu1  ;;  %v5117_v25 = vadd.f32 %v9121_v6, %v4904_v17  ;;  %v5119_v34 = vadd.f32 %v9126_v12, %v5017_v18 }
 0x66b   : > { %v5242_v22 = vmul.f32 0.01, %v5114_v16  ;;  %vm5178_vm2 = vcmp.ge.f32.partialorder %v5114_v16, 0.0  ;;  %v5118_v39 = vadd.f32 %v9124_v8, %v4906_v38  ;;  %v5243_v30 = vmul.f32 0.01, %v5115_v21 }
 0x66c   : > { %v5305_v27 = vsel %vm5177_vm1, %v5113_v55, %v5241_v20  ;;  %vm5179_vm3 = vcmp.ge.f32.partialorder %v5115_v21, 0.0  ;;  %vm5180_vm4 = vcmp.ge.f32.partialorder %v5116_v23, 0.0  ;;  %v5244_v41 = vmul.f32 0.01, %v5116_v23 }
 0x66d   : > { %v5306_v31 = vsel %vm5178_vm2, %v5114_v16, %v5242_v22  ;;  %v5245_v56 = vmul.f32 0.01, %v5117_v25  ;;  %v5246_v36 = vmul.f32 0.01, %v5118_v39  ;;  %v9149_v0 = vadd.f32 %v9129_v15, %v5019_v24 }
 0x66e   : > { %vm5181_vm5 = vcmp.ge.f32.partialorder %v5117_v25, 0.0  ;;  %vm5182_vm6 = vcmp.ge.f32.partialorder %v5118_v39, 0.0  ;;  %v5390_v46 = vmul.f32 %v9139_v26, %v5305_v27  ;;  %v5391_v47 = vmul.f32 %v9141_v42, %v5306_v31 }
 0x66f   : > { %v4910_v43 = vpop.f32.mrb[4].mxu0  ;;  %v5023_v44 = vpop.f32.mrb[4].mxu1  ;;  %v5247_v48 = vmul.f32 0.01, %v5119_v34  ;;  %vm5183_vm7 = vcmp.ge.f32.partialorder %v5119_v34, 0.0  ;;  %v5307_v54 = vsel %vm5179_vm3, %v5115_v21, %v5243_v30  ;;  %v5309_v58 = vsel %vm5181_vm5, %v5117_v25, %v5245_v56 }
 0x670   : > { %v4912_v33 = vpop.f32.mrb[5].mxu0  ;;  %v5025_v45 = vpop.f32.mrb[5].mxu1  ;;  %v5121_v52 = vadd.f32 %v9121_v6, %v4910_v43  ;;  %v5310_v59 = vsel %vm5182_vm6, %v5118_v39, %v5246_v36  ;;  %v5308_v60 = vsel %vm5180_vm4, %v5116_v23, %v5244_v41  ;;  %vm5184_vm8 = vcmp.ge.f32.partialorder %v9149_v0, 0.0 }
 0x671   : > { %v4914_v9 = vpop.f32.mrb[6].mxu0  ;;  %v5027_v32 = vpop.f32.mrb[6].mxu1  ;;  %v5248_v61 = vmul.f32 0.01, %v9149_v0  ;;  %v5454_v63 = vadd.f32 %v5391_v47, %v5390_v46  ;;  %v5311_v3 = vsel %vm5183_vm7, %v5119_v34, %v5247_v48  ;;  %v5122_v5 = vadd.f32 %v9124_v8, %v4912_v33 }
 0x672   : > { %v5125_v40 = vadd.f32 %v9121_v6, %v4914_v9  ;;  %v4916_v28 = vpop.f32.mrb[7].mxu0  ;;  %v5029_v29 = vpop.f32.mrb[7].mxu1  ;;  %v5127_v4 = vadd.f32 %v9126_v12, %v5027_v32  ;;  %v5392_v7 = vmul.f32 %v9144_v37, %v5307_v54  ;;  %v5394_v10 = vmul.f32 %v9139_v26, %v5309_v58 }
 0x673   : > { %v5126_v62 = vadd.f32 %v9124_v8, %v4916_v28  ;;  %v5395_v11 = vmul.f32 %v9141_v42, %v5310_v59  ;;  %vm5185_vm9 = vcmp.ge.f32.partialorder %v5121_v52, 0.0  ;;  %v5123_v55 = vadd.f32 %v9126_v12, %v5023_v44 }
 0x674   : > { %v5253_v13 = vmul.f32 0.01, %v5125_v40  ;;  %v5393_v16 = vmul.f32 %v9146_v53, %v5308_v60  ;;  %v5455_v17 = vadd.f32 %v5454_v63, %v5392_v7  ;;  %v5249_v20 = vmul.f32 0.01, %v5121_v52 }
 0x675   : > { %v5254_v14 = vmul.f32 0.01, %v5126_v62  ;;  %v9176_v21 = vadd.f32 %v9129_v15, %v5025_v45  ;;  %vm5189_vm10 = vcmp.ge.f32.partialorder %v5125_v40, 0.0  ;;  %vm5190_vm11 = vcmp.ge.f32.partialorder %v5126_v62, 0.0 }
 0x676   : > { %v5250_v38 = vmul.f32 0.01, %v5122_v5  ;;  %v5255_v24 = vmul.f32 0.01, %v5127_v4  ;;  %v9179_v25 = vadd.f32 %v9129_v15, %v5029_v29  ;;  %v5456_v39 = vadd.f32 %v5455_v17, %v5393_v16 }
 0x677   : > { %v4920_v18 = vpop.f32.mrb[8].mxu0  ;;  %v5033_v19 = vpop.f32.mrb[8].mxu1  ;;  %vm5187_vm12 = vcmp.ge.f32.partialorder %v5123_v55, 0.0  ;;  %vm5186_vm13 = vcmp.ge.f32.partialorder %v5122_v5, 0.0  ;;  %vm5191_vm14 = vcmp.ge.f32.partialorder %v5127_v4, 0.0  ;;  %v5317_v35 = vsel %vm5189_vm10, %v5125_v40, %v5253_v13 }
 0x678   : > { %v4922_v22 = vpop.f32.mrb[9].mxu0  ;;  %v5035_v23 = vpop.f32.mrb[9].mxu1  ;;  %v5129_v31 = vadd.f32 %v9121_v6, %v4920_v18  ;;  %v5251_v34 = vmul.f32 0.01, %v5123_v55  ;;  %v5318_v41 = vsel %vm5190_vm11, %v5126_v62, %v5254_v14  ;;  %5457 = vadd.xlane.f32.xlu0 %v5456_v39  ;;  %v5131_v43 = vadd.f32 %v9126_v12, %v5033_v19 }
 0x679   : > { %v4924_v27 = vpop.f32.mrb[10].mxu0  ;;  %v5037_v30 = vpop.f32.mrb[10].mxu1  ;;  %v5313_v44 = vsel %vm5185_vm9, %v5121_v52, %v5249_v20  ;;  %vm5188_vm15 = vcmp.ge.f32.partialorder %v9176_v21, 0.0  ;;  %v5252_v56 = vmul.f32 0.01, %v9176_v21  ;;  %v5130_v36 = vadd.f32 %v9124_v8, %v4922_v22 }
 0x67a   : > { %v5039_v33 = vpop.f32.mrb[11].mxu1  ;;  %v4926_v45 = vpop.f32.mrb[11].mxu0  ;;  %v5314_v9 = vsel %vm5186_vm13, %v5122_v5, %v5250_v38  ;;  %v9187_v32 = vsel %vm5191_vm14, %v5127_v4, %v5255_v24  ;;  %v9190_v46 = vmul.f32 0.01, %v9179_v25  ;;  %v5312_v47 = vsel %vm5184_vm8, %v9149_v0, %v5248_v61 }
 0x67b   : > { %v9196_v54 = vmul.f32 %v9139_v26, %v5317_v35  ;;  %v9199_v58 = vmul.f32 %v9141_v42, %v5318_v41  ;;  %vm5193_vm0 = vcmp.ge.f32.partialorder %v5129_v31, 0.0  ;;  %v5133_v59 = vadd.f32 %v9121_v6, %v4924_v27 }
 0x67c   : > { %v5257_v29 = vmul.f32 0.01, %v5129_v31  ;;  %vm5195_vm1 = vcmp.ge.f32.partialorder %v5131_v43, 0.0  ;;  %v5259_v60 = vmul.f32 0.01, %v5131_v43  ;;  %v9205_v62 = vadd.f32 %v9129_v15, %v5035_v23 }
 0x67d   : > { %vm5192_vm2 = vcmp.ge.f32.partialorder %v9179_v25, 0.0  ;;  %vm5194_vm3 = vcmp.ge.f32.partialorder %v5130_v36, 0.0  ;;  %v5396_v61 = vmul.f32 %v9144_v37, %v5311_v3  ;;  %v5459_v63 = vadd.f32 %v5395_v11, %v5394_v10 }
 0x67e   : > { %v5134_v5 = vadd.f32 %v9124_v8, %v4926_v45  ;;  %v5258_v13 = vmul.f32 0.01, %v5130_v36  ;;  %v5135_v14 = vadd.f32 %v9126_v12, %v5037_v30  ;;  %v5315_v16 = vsel %vm5187_vm12, %v5123_v55, %v5251_v34 }
 0x67f   : > { %v4930_v48 = vpop.f32.mrb[12].mxu0  ;;  %v5043_v52 = vpop.f32.mrb[12].mxu1  ;;  %v5398_v17 = vmul.f32 %v9139_v26, %v5313_v44  ;;  %vm5197_vm4 = vcmp.ge.f32.partialorder %v5133_v59, 0.0  ;;  %v5397_v19 = vmul.f32 %v9146_v53, %v5312_v47  ;;  %v5460_v20 = vadd.f32 %v5459_v63, %v5396_v61 }
 0x680   : > { %v4932_v40 = vpop.f32.mrb[13].mxu0  ;;  %v9202_v28 = vpop.f32.mrb[13].mxu1  ;;  %v5399_v3 = vmul.f32 %v9141_v42, %v5314_v9  ;;  %vm5196_vm5 = vcmp.ge.f32.partialorder %v9205_v62, 0.0  ;;  %v5261_v10 = vmul.f32 0.01, %v5133_v59  ;;  %vm5198_vm6 = vcmp.ge.f32.partialorder %v5134_v5, 0.0 }
 0x681   : > { %v9207_v0 = vpop.f32.mrb[14].mxu0  ;;  %v5047_v4 = vpop.f32.mrb[14].mxu1  ;;  %v5262_v11 = vmul.f32 0.01, %v5134_v5  ;;  %v5316_v22 = vsel %vm5188_vm15, %v9176_v21, %v5252_v56  ;;  %v5461_v55 = vadd.f32 %v5460_v20, %v5397_v19  ;;  %v5400_v23 = vmul.f32 %v9144_v37, %v5315_v16 }
 0x682   : > { %v9212_v7 = vpop.f32.mrb[15].mxu0  ;;  %v9217_v18 = vpop.f32.mrb[15].mxu1  ;;  %v5464_v38 = vadd.f32 %v5399_v3, %v5398_v17  ;;  %v5137_v24 = vadd.f32 %v9121_v6, %v4930_v48  ;;  %v5321_v39 = vsel %vm5193_vm0, %v5129_v31, %v5257_v29  ;;  %v5322_v27 = vsel %vm5194_vm3, %v5130_v36, %v5258_v13 }
 0x683   : > { %v5260_v30 = vmul.f32 0.01, %v9205_v62  ;;  %v9231_v34 = vadd.f32 %v9129_v15, %v5039_v33  ;;  %v5263_v44 = vmul.f32 0.01, %v5135_v14  ;;  %5462 = vadd.xlane.f32.xlu0 %v5461_v55  ;;  %v5401_v21 = vmul.f32 %v9146_v53, %v5316_v22 }
 0x684   : > { %v5465_v56 = vadd.f32 %v5464_v38, %v5400_v23  ;;  %v5139_v45 = vadd.f32 %v9126_v12, %v5043_v52  ;;  %v5323_v31 = vsel %vm5195_vm1, %v5131_v43, %v5259_v60  ;;  %v5325_v36 = vsel %vm5197_vm4, %v5133_v59, %v5261_v10 }
 0x685   : > { %vm5199_vm7 = vcmp.ge.f32.partialorder %v5135_v14, 0.0  ;;  %v5326_v33 = vsel %vm5198_vm6, %v5134_v5, %v5262_v11  ;;  %v5406_v29 = vmul.f32 %v9139_v26, %v5321_v39  ;;  %v5265_v63 = vmul.f32 0.01, %v5137_v24 }
 0x686   : > { %v5466_v61 = vadd.f32 %v5465_v56, %v5401_v21  ;;  %v5138_v13 = vadd.f32 %v9124_v8, %v4932_v40  ;;  %v5407_v43 = vmul.f32 %v9141_v42, %v5322_v27  ;;  %vm5200_vm8 = vcmp.ge.f32.partialorder %v9231_v34, 0.0 }
 0x687   : > { %v4940_v35 = vpop.f32.mrb[16].mxu0  ;;  %v9233_v41 = vpop.f32.mrb[16].mxu1  ;;  %v5264_v59 = vmul.f32 0.01, %v9231_v34  ;;  %vm5201_vm9 = vcmp.ge.f32.partialorder %v5137_v24, 0.0  ;;  %v5410_v5 = vmul.f32 %v9139_v26, %v5325_v36  ;;  %v5327_v17 = vsel %vm5199_vm7, %v5135_v14, %v5263_v44 }
 0x688   : > { %v9237_v9 = vpop.f32.mrb[17].mxu1  ;;  %v9242_v47 = vpop.f32.mrb[17].mxu0  ;;  %v5411_v19 = vmul.f32 %v9141_v42, %v5326_v33  ;;  %5467 = vadd.xlane.f32.xlu1 %v5466_v61  ;;  %vm5203_vm10 = vcmp.ge.f32.partialorder %v5139_v45, 0.0  ;;  %v5267_v40 = vmul.f32 0.01, %v5139_v45  ;;  %v5320_v20 = vsel %vm5192_vm2, %v9179_v25, %v9190_v46 }
 0x689   : > { %v9244_v48 = vpop.f32.mrb[18].mxu1  ;;  %v9248_v52 = vpop.f32.mrb[18].mxu0  ;;  %v5404_v3 = vmul.f32 %v9144_v37, %v9187_v32  ;;  %v5469_v10 = vadd.f32 %v9199_v58, %v9196_v54  ;;  %v5329_v11 = vsel %vm5201_vm9, %v5137_v24, %v5265_v63  ;;  %vm5202_vm11 = vcmp.ge.f32.partialorder %v5138_v13, 0.0 }
 0x68a   : > { %v9250_v16 = vpop.f32.mrb[19].mxu1  ;;  %v9255_v60 = vpop.f32.mrb[19].mxu0  ;;  %v5266_v22 = vmul.f32 0.01, %v5138_v13  ;;  %v5141_v14 = vadd.f32 %v9121_v6, %v9207_v0  ;;  %v5143_v55 = vadd.f32 %v9126_v12, %v5047_v4  ;;  %v5405_v23 = vmul.f32 %v9146_v53, %v5320_v20 }
 0x68b   : > { %v5470_v38 = vadd.f32 %v5469_v10, %v5404_v3  ;;  %v5142_v25 = vadd.f32 %v9124_v8, %v9212_v7  ;;  %v9280_v54 = vadd.f32 %v9129_v15, %v9202_v28  ;;  %v5324_v58 = vsel %vm5196_vm5, %v9205_v62, %v5260_v30 }
 0x68c   : > { %v5408_v0 = vmul.f32 %v9144_v37, %v5323_v31  ;;  %v5474_v4 = vadd.f32 %v5407_v43, %v5406_v29  ;;  %v9291_v7 = vmul.f32 %v9139_v26, %v5329_v11  ;;  %v5331_v27 = vsel %vm5203_vm10, %v5139_v45, %v5267_v40 }
 0x68d   : > { %v5471_v44 = vadd.f32 %v5470_v38, %v5405_v23  ;;  %v5145_v28 = vadd.f32 %v9121_v6, %v4940_v35  ;;  %v5330_v62 = vsel %vm5202_vm11, %v5138_v13, %v5266_v22  ;;  %v5269_v30 = vmul.f32 0.01, %v5141_v14 }
 0x68e   : > { %v5409_v31 = vmul.f32 %v9146_v53, %v5324_v58  ;;  %v5475_v36 = vadd.f32 %v5474_v4, %v5408_v0  ;;  %vm5205_vm12 = vcmp.ge.f32.partialorder %v5141_v14, 0.0  ;;  %vm5207_vm13 = vcmp.ge.f32.partialorder %v5143_v55, 0.0 }
 0x68f   : > { %v9274_v46 = vpop.f32.mrb[20].mxu0  ;;  %v9276_v32 = vpop.f32.mrb[20].mxu1  ;;  %v5271_v45 = vmul.f32 0.01, %v5143_v55  ;;  %5472 = vadd.xlane.f32.xlu1 %v5471_v44  ;;  %v5270_v61 = vmul.f32 0.01, %v5142_v25  ;;  %v5328_v13 = vsel %vm5200_vm8, %v9231_v34, %v5264_v59  ;;  %v5144_v43 = vadd.f32 %v9129_v15, %v9217_v18 }
 0x690   : > { %v9286_v24 = vpop.f32.mrb[21].mxu1  ;;  %v9288_v39 = vpop.f32.mrb[21].mxu0  ;;  %vm5206_vm14 = vcmp.ge.f32.partialorder %v5142_v25, 0.0  ;;  %v5476_v35 = vadd.f32 %v5475_v36, %v5409_v31  ;;  %v5273_v63 = vmul.f32 0.01, %v5145_v28  ;;  %vm5209_vm15 = vcmp.ge.f32.partialorder %v5145_v28, 0.0 }
 0x691   : > { %v9295_v21 = vpop.f32.mrb[22].mxu0  ;;  %v9297_v56 = vpop.f32.mrb[22].mxu1  ;;  %v5412_v40 = vmul.f32 %v9144_v37, %v5327_v17  ;;  %v5479_v20 = vadd.f32 %v5411_v19, %v5410_v5  ;;  %v5415_v3 = vmul.f32 %v9141_v42, %v5330_v62  ;;  %vm5204_vm0 = vcmp.ge.f32.partialorder %v9280_v54, 0.0 }
 0x692   : > { %v9301_v33 = vpop.f32.mrb[23].mxu0  ;;  %v9303_v29 = vpop.f32.mrb[23].mxu1  ;;  %v5333_v10 = vsel %vm5205_vm12, %v5141_v14, %v5269_v30  ;;  %5477 = vadd.xlane.f32.xlu0 %v5476_v35  ;;  %v5147_v11 = vadd.f32 %v9126_v12, %v9233_v41  ;;  %v5334_v22 = vsel %vm5206_vm14, %v5142_v25, %v5270_v61  ;;  %v9317_v34 = vadd.f32 %v9129_v15, %v9237_v9 }
 0x693   : > { %v5413_v18 = vmul.f32 %v9146_v53, %v5328_v13  ;;  %v5480_v59 = vadd.f32 %v5479_v20, %v5412_v40  ;;  %v5268_v17 = vmul.f32 0.01, %v9280_v54  ;;  %v5335_v19 = vsel %vm5207_vm13, %v5143_v55, %v5271_v45 }
 0x694   : > { %v5337_v14 = vsel %vm5209_vm15, %v5145_v28, %v5273_v63  ;;  %v5146_v41 = vadd.f32 %v9124_v8, %v9242_v47  ;;  %vm5208_vm1 = vcmp.ge.f32.partialorder %v5144_v43, 0.0  ;;  %v5272_v38 = vmul.f32 0.01, %v5144_v43 }
 0x695   : > { %v5481_v9 = vadd.f32 %v5480_v59, %v5413_v18  ;;  %v5149_v25 = vadd.f32 %v9121_v6, %v9248_v52  ;;  %v5418_v4 = vmul.f32 %v9139_v26, %v5333_v10  ;;  %v5419_v44 = vmul.f32 %v9141_v42, %v5334_v22 }
 0x696   : > { %vm5211_vm2 = vcmp.ge.f32.partialorder %v5147_v11, 0.0  ;;  %v5150_v55 = vadd.f32 %v9124_v8, %v9255_v60  ;;  %v9344_v62 = vmul.f32 %v9139_v26, %v5337_v14  ;;  %v5275_v52 = vmul.f32 0.01, %v5147_v11 }
 0x697   : > { %v9320_v23 = vpop.f32.mrb[24].mxu0  ;;  %v9322_v5 = vpop.f32.mrb[24].mxu1  ;;  %v9347_v30 = vmul.f32 0.01, %v9317_v34  ;;  %5482 = vadd.xlane.f32.xlu1 %v5481_v9  ;;  %v5151_v31 = vadd.f32 %v9126_v12, %v9244_v48  ;;  %vm5212_vm3 = vcmp.ge.f32.partialorder %v9317_v34, 0.0  ;;  %v5332_v61 = vsel %vm5204_vm0, %v9280_v54, %v5268_v17 }
 0x698   : > { %v9331_v58 = vpop.f32.mrb[25].mxu1  ;;  %v9333_v0 = vpop.f32.mrb[25].mxu0  ;;  %v5274_v60 = vmul.f32 0.01, %v5146_v41  ;;  %v5416_v35 = vmul.f32 %v9144_v37, %v5331_v27  ;;  %v5484_v63 = vadd.f32 %v5415_v3, %v9291_v7  ;;  %vm5210_vm4 = vcmp.ge.f32.partialorder %v5146_v41, 0.0 }
 0x699   : > { %v9339_v28 = vpop.f32.mrb[26].mxu0  ;;  %v9341_v47 = vpop.f32.mrb[26].mxu1  ;;  %vm5213_vm5 = vcmp.ge.f32.partialorder %v5149_v25, 0.0  ;;  %v5277_v13 = vmul.f32 0.01, %v5149_v25  ;;  %v5153_v48 = vadd.f32 %v9121_v6, %v9274_v46  ;;  %v5417_v20 = vmul.f32 %v9146_v53, %v5332_v61 }
 0x69a   : > { %v9351_v36 = vpop.f32.mrb[27].mxu0  ;;  %v9353_v45 = vpop.f32.mrb[27].mxu1  ;;  %v5278_v40 = vmul.f32 0.01, %v5150_v55  ;;  %v5485_v10 = vadd.f32 %v5484_v63, %v5416_v35  ;;  %v5155_v22 = vadd.f32 %v9126_v12, %v9276_v32  ;;  %v5339_v18 = vsel %vm5211_vm2, %v5147_v11, %v5275_v52 }
 0x69b   : > { %vm5215_vm6 = vcmp.ge.f32.partialorder %v5151_v31, 0.0  ;;  %vm5214_vm7 = vcmp.ge.f32.partialorder %v5150_v55, 0.0  ;;  %v5152_v54 = vadd.f32 %v9129_v15, %v9250_v16  ;;  %v5338_v7 = vsel %vm5210_vm4, %v5146_v41, %v5274_v60 }
 0x69c   : > { %v5279_v27 = vmul.f32 0.01, %v5151_v31  ;;  %v5486_v3 = vadd.f32 %v5485_v10, %v5417_v20  ;;  %v5336_v59 = vsel %vm5208_vm1, %v5144_v43, %v5272_v38  ;;  %v5341_v14 = vsel %vm5213_vm5, %v5149_v25, %v5277_v13 }
 0x69d   : > { %vm5217_vm8 = vcmp.ge.f32.partialorder %v5153_v48, 0.0  ;;  %v5420_v32 = vmul.f32 %v9144_v37, %v5335_v19  ;;  %v5489_v11 = vadd.f32 %v5419_v44, %v5418_v4  ;;  %v5342_v16 = vsel %vm5214_vm7, %v5150_v55, %v5278_v40 }
 0x69e   : > { %5487 = vadd.xlane.f32.xlu0 %v5486_v3  ;;  %v5281_v41 = vmul.f32 0.01, %v5153_v48  ;;  %v5283_v60 = vmul.f32 0.01, %v5155_v22  ;;  %v9382_v43 = vadd.f32 %v9129_v15, %v9286_v24  ;;  %vm5219_vm9 = vcmp.ge.f32.partialorder %v5155_v22, 0.0 }
 0x69f   : > { %v9370_v46 = vpop.f32.mrb[28].mxu0  ;;  %v9372_v17 = vpop.f32.mrb[28].mxu1  ;;  %v5421_v19 = vmul.f32 %v9146_v53, %v5336_v59  ;;  %v5490_v25 = vadd.f32 %v5489_v11, %v5420_v32  ;;  %v5154_v4 = vadd.f32 %v9124_v8, %v9288_v39  ;;  %v5423_v35 = vmul.f32 %v9141_v42, %v5338_v7 }
 0x6a0   : > { %v9376_v9 = vpop.f32.mrb[29].mxu1  ;;  %v9378_v52 = vpop.f32.mrb[29].mxu0  ;;  %v5426_v24 = vmul.f32 %v9139_v26, %v5341_v14  ;;  %vm5216_vm10 = vcmp.ge.f32.partialorder %v5152_v54, 0.0  ;;  %v5157_v63 = vadd.f32 %v9121_v6, %v9295_v21  ;;  %v5343_v13 = vsel %vm5215_vm6, %v5151_v31, %v5279_v27 }
 0x6a1   : > { %v9384_v38 = vpop.f32.mrb[30].mxu0  ;;  %v9386_v61 = vpop.f32.mrb[30].mxu1  ;;  %v5280_v40 = vmul.f32 0.01, %v5152_v54  ;;  %v5491_v20 = vadd.f32 %v5490_v25, %v5421_v19  ;;  %v5158_v10 = vadd.f32 %v9124_v8, %v9301_v33  ;;  %v5427_v39 = vmul.f32 %v9141_v42, %v5342_v16 }
 0x6a2   : > { %v9391_v44 = vpop.f32.mrb[31].mxu0  ;;  %v9393_v55 = vpop.f32.mrb[31].mxu1  ;;  %v5345_v3 = vsel %vm5217_vm8, %v5153_v48, %v5281_v41  ;;  %v9405_v59 = vsel %vm5219_vm9, %v5155_v22, %v5283_v60  ;;  %v9408_v7 = vmul.f32 0.01, %v9382_v43  ;;  %vm5218_vm11 = vcmp.ge.f32.partialorder %v5154_v4, 0.0 }
 0x6a3   : > { %5492 = vadd.xlane.f32.xlu1 %v5491_v20  ;;  %v5282_v21 = vmul.f32 0.01, %v5154_v4  ;;  %v5159_v31 = vadd.f32 %v9126_v12, %v9297_v56  ;;  %v5340_v33 = vsel %vm5212_vm3, %v9317_v34, %v9347_v30  ;;  %vm5220_vm12 = vcmp.ge.f32.partialorder %v9382_v43, 0.0 }
 0x6a4   : > { %vm5221_vm13 = vcmp.ge.f32.partialorder %v5157_v63, 0.0  ;;  %v5285_v22 = vmul.f32 0.01, %v5157_v63  ;;  %v5424_v14 = vmul.f32 %v9144_v37, %v5339_v18  ;;  %v5494_v32 = vadd.f32 %v5423_v35, %v9344_v62 }
 0x6a5   : > { %vm5222_vm14 = vcmp.ge.f32.partialorder %v5158_v10, 0.0  ;;  %v5286_v16 = vmul.f32 0.01, %v5158_v10  ;;  %v5425_v34 = vmul.f32 %v9146_v53, %v5340_v33  ;;  %v5344_v30 = vsel %vm5216_vm10, %v5152_v54, %v5280_v40 }
 0x6a6   : > { %v5495_v19 = vadd.f32 %v5494_v32, %v5424_v14  ;;  %v5161_v18 = vadd.f32 %v9121_v6, %v9320_v23  ;;  %v5428_v62 = vmul.f32 %v9144_v37, %v5343_v13  ;;  %v5499_v25 = vadd.f32 %v5427_v39, %v5426_v24 }
 0x6a7   : > { %v9416_v27 = vpop.f32.mrb[32].mxu0  ;;  %v9418_v48 = vpop.f32.mrb[32].mxu1  ;;  %v5430_v1 = vmul.f32 %v9139_v26, %v5345_v3  ;;  %v5287_v33 = vmul.f32 0.01, %v5159_v31  ;;  %v5160_v54 = vadd.f32 %v9129_v15, %v9303_v29  ;;  %v5163_v40 = vadd.f32 %v9126_v12, %v9322_v5 }
 0x6a8   : > { %v9423_v11 = vpop.f32.mrb[33].mxu1  ;;  %v9425_v56 = vpop.f32.mrb[33].mxu0  ;;  %v5346_v14 = vsel %vm5218_vm11, %v5154_v4, %v5282_v21  ;;  %v5496_v32 = vadd.f32 %v5495_v19, %v5425_v34  ;;  %v5429_v23 = vmul.f32 %v9146_v53, %v5344_v30  ;;  %v5500_v13 = vadd.f32 %v5499_v25, %v5428_v62 }
 0x6a9   : > { %v9429_v41 = vpop.f32.mrb[34].mxu0  ;;  %v9431_v60 = vpop.f32.mrb[34].mxu1  ;;  %v5349_v24 = vsel %vm5221_vm13, %v5157_v63, %v5285_v22  ;;  %vm5223_vm15 = vcmp.ge.f32.partialorder %v5159_v31, 0.0  ;;  %v5350_v39 = vsel %vm5222_vm14, %v5158_v10, %v5286_v16  ;;  %v5162_v3 = vadd.f32 %v9124_v8, %v9333_v0 }
 0x6aa   : > { %v9436_v35 = vpop.f32.mrb[35].mxu0  ;;  %v9438_v20 = vpop.f32.mrb[35].mxu1  ;;  %5497 = vadd.xlane.f32.xlu0 %v5496_v32  ;;  %v5289_v2 = vmul.f32 0.01, %v5161_v18  ;;  %v9453_v29 = vadd.f32 %v9129_v15, %v9331_v58  ;;  %v5501_v5 = vadd.f32 %v5500_v13, %v5429_v23  ;;  %v5165_v4 = vadd.f32 %v9121_v6, %v9339_v28 }
 0x6ab   : > { %v5431_v21 = vmul.f32 %v9141_v42, %v5346_v14  ;;  %vm5225_vm0 = vcmp.ge.f32.partialorder %v5161_v18, 0.0  ;;  %v5291_v63 = vmul.f32 0.01, %v5163_v40  ;;  %v9460_v10 = vadd.f32 %v9126_v12, %v9341_v47 }
 0x6ac   : > { %v5351_v22 = vsel %vm5223_vm15, %v5159_v31, %v5287_v33  ;;  %vm5224_vm1 = vcmp.ge.f32.partialorder %v5160_v54, 0.0  ;;  %vm5227_vm2 = vcmp.ge.f32.partialorder %v5163_v40, 0.0  ;;  %5502 = vadd.xlane.f32.xlu1 %v5501_v5  ;;  %v5166_v58 = vadd.f32 %v9124_v8, %v9351_v36 }
 0x6ad   : > { %v5434_v0 = vmul.f32 %v9139_v26, %v5349_v24  ;;  %v5435_v16 = vmul.f32 %v9141_v42, %v5350_v39  ;;  %v5288_v28 = vmul.f32 0.01, %v5160_v54  ;;  %v5290_v34 = vmul.f32 0.01, %v5162_v3 }
 0x6ae   : > { %v5353_v62 = vsel %vm5225_vm0, %v5161_v18, %v5289_v2  ;;  %vm5228_vm3 = vcmp.ge.f32.partialorder %v9453_v29, 0.0  ;;  %v9472_v47 = vmul.f32 0.01, %v9453_v29  ;;  %vm5226_vm4 = vcmp.ge.f32.partialorder %v5162_v3, 0.0 }
 0x6af   : > { %v9466_v30 = vpop.f32.mrb[36].mxu0  ;;  %v9468_v19 = vpop.f32.mrb[36].mxu1  ;;  %vm5229_vm5 = vcmp.ge.f32.partialorder %v5165_v4, 0.0  ;;  %v9479_v25 = vsel %vm5227_vm2, %v5163_v40, %v5291_v63  ;;  %v5293_v33 = vmul.f32 0.01, %v5165_v4  ;;  %v5348_v2 = vsel %vm5220_vm12, %v9382_v43, %v9408_v7 }
 0x6b0   : > { %v9474_v31 = vpop.f32.mrb[37].mxu0  ;;  %v9476_v36 = vpop.f32.mrb[37].mxu1  ;;  %v5295_v14 = vmul.f32 0.01, %v9460_v10  ;;  %vm5230_vm6 = vcmp.ge.f32.partialorder %v5166_v58, 0.0  ;;  %v5432_v23 = vmul.f32 %v9144_v37, %v9405_v59  ;;  %v5504_v13 = vadd.f32 %v5431_v21, %v5430_v1 }
 0x6b1   : > { %v9486_v18 = vpop.f32.mrb[38].mxu0  ;;  %v9488_v32 = vpop.f32.mrb[38].mxu1  ;;  %v5169_v40 = vadd.f32 %v9121_v6, %v9370_v46  ;;  %v5354_v5 = vsel %vm5226_vm4, %v5162_v3, %v5290_v34  ;;  %v5294_v63 = vmul.f32 0.01, %v5166_v58  ;;  %v5352_v43 = vsel %vm5224_vm1, %v5160_v54, %v5288_v28 }
 0x6b2   : > { %10333 = vst [vmem:[#allocation21_spill] sm:$0xff] %v9486_v18  ;;  %10334 = vst [vmem:[#allocation22_spill] sm:$0xff] %v9488_v32  ;;  %v9494_v24 = vpop.f32.mrb[39].mxu0  ;;  %v9496_v39 = vpop.f32.mrb[39].mxu1  ;;  %v5509_v7 = vadd.f32 %v5435_v16, %v5434_v0  ;;  %v5433_v32 = vmul.f32 %v9146_v53, %v5348_v2  ;;  %v5505_v18 = vadd.f32 %v5504_v13, %v5432_v23  ;;  %vm5231_vm8 = vcmp.ge.f32.partialorder %v9460_v10, 0.0 }
 0x6b3   : > { %10335 = vst [vmem:[#allocation23_spill] sm:$0xff] %v9496_v39  ;;  %v5171_v59 = vadd.f32 %v9126_v12, %v9372_v17  ;;  %v5436_v1 = vmul.f32 %v9144_v37, %v5351_v22  ;;  %v5357_v46 = vsel %vm5229_vm5, %v5165_v4, %v5293_v33  ;;  %v5168_v21 = vadd.f32 %v9129_v15, %v9353_v45 }
 0x6b4   : > { %vm5233_vm7 = vcmp.ge.f32.partialorder %v5169_v40, 0.0  ;;  %v5297_v39 = vmul.f32 0.01, %v5169_v40  ;;  %v5506_v34 = vadd.f32 %v5505_v18, %v5433_v32  ;;  %v5437_v54 = vmul.f32 %v9146_v53, %v5352_v43 }
 0x6b5   : > { %v5510_v0 = vadd.f32 %v5509_v7, %v5436_v1  ;;  %v5170_v16 = vadd.f32 %v9124_v8, %v9378_v52  ;;  %v5438_v4 = vmul.f32 %v9139_v26, %v5353_v62  ;;  %v5358_v45 = vsel %vm5230_vm6, %v5166_v58, %v5294_v63 }
 0x6b6   : > { %v9521_v22 = vadd.f32 %v9129_v15, %v9376_v9  ;;  %v5439_v52 = vmul.f32 %v9141_v42, %v5354_v5  ;;  %5507 = vadd.xlane.f32.xlu0 %v5506_v34  ;;  %v5299_v18 = vmul.f32 0.01, %v5171_v59  ;;  %v5173_v62 = vadd.f32 %v9121_v6, %v9384_v38 }
 0x6b7   : > { %v9507_v3 = vpop.f32.mrb[40].mxu0  ;;  %v9512_v28 = vpop.f32.mrb[40].mxu1  ;;  %v5511_v32 = vadd.f32 %v5510_v0, %v5437_v54  ;;  %v5442_v58 = vmul.f32 %v9139_v26, %v5357_v46  ;;  %v5361_v9 = vsel %vm5233_vm7, %v5169_v40, %v5297_v39  ;;  %vm5235_vm9 = vcmp.ge.f32.partialorder %v5171_v59, 0.0 }
 0x6b8   : > { %v9514_v17 = vpop.f32.mrb[41].mxu0  ;;  %v9523_v33 = vpop.f32.mrb[41].mxu1  ;;  %v5175_v63 = vadd.f32 %v9126_v12, %v9386_v61  ;;  %v5359_v5 = vsel %vm5231_vm8, %v9460_v10, %v5295_v14  ;;  %v5443_v43 = vmul.f32 %v9141_v42, %v5358_v45  ;;  %v5296_v7 = vmul.f32 0.01, %v5168_v21 }
 0x6b9   : > { %v9525_v2 = vpop.f32.mrb[42].mxu0  ;;  %v9530_v23 = vpop.f32.mrb[42].mxu1  ;;  %5512 = vadd.xlane.f32.xlu1 %v5511_v32  ;;  %v5298_v6 = vmul.f32 0.01, %v5170_v16  ;;  %vm5232_vm10 = vcmp.ge.f32.partialorder %v5168_v21, 0.0  ;;  %vm5234_vm11 = vcmp.ge.f32.partialorder %v5170_v16, 0.0  ;;  %v5356_v12 = vsel %vm5228_vm3, %v9453_v29, %v9472_v47 }
 0x6ba   : > { %v9532_v13 = vpop.f32.mrb[43].mxu0  ;;  %v9542_v38 = vpop.f32.mrb[43].mxu1  ;;  %v9545_v1 = vmul.f32 0.01, %v9521_v22  ;;  %v9552_v61 = vmul.f32 %v9139_v26, %v5361_v9  ;;  %v9554_v10 = vsel %vm5235_vm9, %v5171_v59, %v5299_v18  ;;  %vm5237_vm12 = vcmp.ge.f32.partialorder %v5173_v62, 0.0 }
 0x6bb   : > { %v5174_v14 = vadd.f32 %v9124_v8, %v9391_v44  ;;  %vm5236_vm13 = vcmp.ge.f32.partialorder %v9521_v22, 0.0  ;;  %v5301_v40 = vmul.f32 0.01, %v5173_v62  ;;  %vm5239_vm14 = vcmp.ge.f32.partialorder %v5175_v63, 0.0 }
 0x6bc   : > { %v5440_v39 = vmul.f32 %v9144_v37, %v9479_v25  ;;  %v5514_v46 = vadd.f32 %v5439_v52, %v5438_v4  ;;  %v5362_v47 = vsel %vm5234_vm11, %v5170_v16, %v5298_v6  ;;  %v5441_v59 = vmul.f32 %v9146_v53, %v5356_v12 }
 0x6bd   : > { %v6127_v54 = vadd.f32 %v9153_v49, %v9416_v27  ;;  %v5360_v8 = vsel %vm5232_vm10, %v5168_v21, %v5296_v7  ;;  %v6129_v25 = vadd.f32 %v9155_v50, %v9418_v48  ;;  %v5444_v4 = vmul.f32 %v9144_v37, %v5359_v5 }
 0x6be   : > { %v5515_v45 = vadd.f32 %v5514_v46, %v5440_v39  ;;  %v5519_v52 = vadd.f32 %v5443_v43, %v5442_v58  ;;  %v5303_v32 = vmul.f32 0.01, %v5175_v63  ;;  %vm5238_vm15 = vcmp.ge.f32.partialorder %v5174_v14, 0.0 }
 0x6bf   : > { %v9561_v34 = vpop.f32.mrb[44].mxu0  ;;  %v9563_v29 = vpop.f32.mrb[44].mxu1  ;;  %v5302_v27 = vmul.f32 0.01, %v5174_v14  ;;  %v9582_v21 = vadd.f32 %v9129_v15, %v9393_v55  ;;  %v6255_v7 = vmul.f32 0.01, %v6127_v54  ;;  %v5445_v6 = vmul.f32 %v9146_v53, %v5360_v8 }
 0x6c0   : > { %v9569_v44 = vpop.f32.mrb[45].mxu0  ;;  %v9571_v0 = vpop.f32.mrb[45].mxu1  ;;  %v5516_v9 = vadd.f32 %v5515_v45, %v5441_v59  ;;  %v5520_v12 = vadd.f32 %v5519_v52, %v5444_v4  ;;  %v5447_v58 = vmul.f32 %v9141_v42, %v5362_v47  ;;  %vm6191_vm0 = vcmp.ge.f32.partialorder %v6127_v54, 0.0 }
 0x6c1   : > { %v9576_v18 = vpop.f32.mrb[46].mxu0  ;;  %v9578_v16 = vpop.f32.mrb[46].mxu1  ;;  %v6128_v43 = vadd.f32 %v9161_v57, %v9425_v56  ;;  %v6131_v39 = vadd.f32 %v9153_v49, %v9429_v41  ;;  %v5365_v15 = vsel %vm5237_vm12, %v5173_v62, %v5301_v40  ;;  %v6257_v55 = vmul.f32 0.01, %v6129_v25 }
 0x6c2   : > { %v9585_v48 = vpop.f32.mrb[47].mxu0  ;;  %v9587_v5 = vpop.f32.mrb[47].mxu1  ;;  %5517 = vadd.xlane.f32.xlu0 %v5516_v9  ;;  %v9597_v46 = vadd.f32 %v9157_v51, %v9423_v11  ;;  %v5521_v59 = vadd.f32 %v5520_v12, %v5445_v6  ;;  %v5366_v8 = vsel %vm5238_vm15, %v5174_v14, %v5302_v27  ;;  %vm6193_vm1 = vcmp.ge.f32.partialorder %v6129_v25, 0.0 }
 0x6c3   : > { %v6256_v47 = vmul.f32 0.01, %v6128_v43  ;;  %v6133_v45 = vadd.f32 %v9155_v50, %v9431_v60  ;;  %v5367_v56 = vsel %vm5239_vm14, %v5175_v63, %v5303_v32  ;;  %v6319_v4 = vsel %vm6191_vm0, %v6127_v54, %v6255_v7 }
 0x6c4   : > { %5522 = vadd.xlane.f32.xlu1 %v5521_v59  ;;  %vm6192_vm2 = vcmp.ge.f32.partialorder %v6128_v43, 0.0  ;;  %v6259_v41 = vmul.f32 0.01, %v6131_v39  ;;  %v5450_v62 = vmul.f32 %v9139_v26, %v5365_v15  ;;  %vm5240_vm3 = vcmp.ge.f32.partialorder %v9582_v21, 0.0 }
 0x6c5   : > { %vm6195_vm4 = vcmp.ge.f32.partialorder %v6131_v39, 0.0  ;;  %v6132_v11 = vadd.f32 %v9161_v57, %v9436_v35  ;;  %v5451_v60 = vmul.f32 %v9141_v42, %v5366_v8  ;;  %v5304_v63 = vmul.f32 0.01, %v9582_v21 }
 0x6c6   : > { %v9614_v54 = vsel %vm6193_vm1, %v6129_v25, %v6257_v55  ;;  %v9617_v52 = vmul.f32 0.01, %v9597_v46  ;;  %v9624_v35 = vmul.f32 %v6319_v4, %v9139_v26  ;;  %vm6194_vm5 = vcmp.ge.f32.partialorder %v9597_v46, 0.0 }
 0x6c7   : > { %v9607_v14 = vpop.f32.mrb[48].mxu0  ;;  %v9609_v40 = vpop.f32.mrb[48].mxu1  ;;  %v6320_v9 = vsel %vm6192_vm2, %v6128_v43, %v6256_v47  ;;  %v6261_v7 = vmul.f32 0.01, %v6133_v45  ;;  %v5364_v25 = vsel %vm5236_vm13, %v9521_v22, %v9545_v1  ;;  %v6323_v15 = vsel %vm6195_vm4, %v6131_v39, %v6259_v41 }
 0x6c8   : > { %v9619_v32 = vpop.f32.mrb[49].mxu1  ;;  %v9621_v27 = vpop.f32.mrb[49].mxu0  ;;  %v5448_v55 = vmul.f32 %v9144_v37, %v9554_v10  ;;  %v5524_v59 = vadd.f32 %v5447_v58, %v9552_v61  ;;  %v6135_v43 = vadd.f32 %v9153_v49, %v9466_v30  ;;  %vm6197_vm6 = vcmp.ge.f32.partialorder %v6133_v45, 0.0 }
 0x6c9   : > { %v9632_v6 = vpop.f32.mrb[50].mxu0  ;;  %v9634_v12 = vpop.f32.mrb[50].mxu1  ;;  %vm6196_vm7 = vcmp.ge.f32.partialorder %v6132_v11, 0.0  ;;  %v6260_v22 = vmul.f32 0.01, %v6132_v11  ;;  %v6136_v1 = vadd.f32 %v9161_v57, %v9474_v31  ;;  %v5449_v39 = vmul.f32 %v9146_v53, %v5364_v25 }
 0x6ca   : > { %v9642_v8 = vpop.f32.mrb[51].mxu0  ;;  %v9644_v47 = vpop.f32.mrb[51].mxu1  ;;  %v5525_v4 = vadd.f32 %v5524_v59, %v5448_v55  ;;  %v6263_v41 = vmul.f32 0.01, %v6135_v43  ;;  %v6137_v61 = vadd.f32 %v9155_v50, %v9468_v19  ;;  %v6384_v10 = vmul.f32 %v6320_v9, %v9141_v42 }
 0x6cb   : > { %10336 = vst [vmem:[#allocation24_spill] sm:$0xff] %v9642_v8  ;;  %10337 = vst [vmem:[#allocation25_spill] sm:$0xff] %v9644_v47  ;;  %v9653_v30 = vmul.f32 %v6323_v15, %v9139_v26  ;;  %v6134_v58 = vadd.f32 %v9157_v51, %v9438_v20  ;;  %vm6199_vm8 = vcmp.ge.f32.partialorder %v6135_v43, 0.0  ;;  %v6325_v47 = vsel %vm6197_vm6, %v6133_v45, %v6261_v7 }
 0x6cc   : > { %v5526_v8 = vadd.f32 %v5525_v4, %v5449_v39  ;;  %v9659_v31 = vadd.f32 %v9157_v51, %v9476_v36  ;;  %v5368_v25 = vsel %vm5240_vm3, %v9582_v21, %v5304_v63  ;;  %v6324_v15 = vsel %vm6196_vm7, %v6132_v11, %v6260_v22  ;;  %v10340_v4 = vld [vmem:[#allocation21_spill] sm:$0xff] }
 0x6cd   : > { %v6264_v55 = vmul.f32 0.01, %v6136_v1  ;;  %v5452_v20 = vmul.f32 %v9144_v37, %v5367_v56  ;;  %v5529_v59 = vadd.f32 %v5451_v60, %v5450_v62  ;;  %v6327_v36 = vsel %vm6199_vm8, %v6135_v43, %v6263_v41 }
 0x6ce   : > { %5527 = vadd.xlane.f32.xlu0 %v5526_v8  ;;  %v6265_v39 = vmul.f32 0.01, %v6137_v61  ;;  %vm6200_vm9 = vcmp.ge.f32.partialorder %v6136_v1, 0.0  ;;  %v6139_v21 = vadd.f32 %v9153_v49, %v10340_v4  ;;  %vm6201_vm10 = vcmp.ge.f32.partialorder %v6137_v61, 0.0 }
 0x6cf   : > { %v9664_v19 = vpop.f32.mrb[52].mxu0  ;;  %v9666_v9 = vpop.f32.mrb[52].mxu1  ;;  %v5453_v11 = vmul.f32 %v9146_v53, %v5368_v25  ;;  %v5530_v56 = vadd.f32 %v5529_v59, %v5452_v20  ;;  %v6140_v62 = vadd.f32 %v9161_v57, %v9494_v24  ;;  %v6388_v43 = vmul.f32 %v6324_v15, %v9141_v42  ;;  %v10345_v20 = vld [vmem:[#allocation22_spill] sm:$0xff] }
 0x6d0   : > { %10338 = vst [vmem:[#allocation26_spill] sm:$0xff] %v9666_v9  ;;  %v9670_v45 = vpop.f32.mrb[53].mxu1  ;;  %v9672_v7 = vpop.f32.mrb[53].mxu0  ;;  %vm6198_vm11 = vcmp.ge.f32.partialorder %v6134_v58, 0.0  ;;  %v6262_v22 = vmul.f32 0.01, %v6134_v58  ;;  %v9692_v4 = vmul.f32 %v6327_v36, %v9139_v26  ;;  %v6141_v59 = vadd.f32 %v9155_v50, %v10345_v20 }
 0x6d1   : > { %10339 = vst [vmem:[#allocation27_spill] sm:$0xff] %v9672_v7  ;;  %v9676_v63 = vpop.f32.mrb[54].mxu0  ;;  %v9678_v9 = vpop.f32.mrb[54].mxu1  ;;  %v9689_v41 = vmul.f32 0.01, %v9659_v31  ;;  %v5531_v25 = vadd.f32 %v5530_v56, %v5453_v11  ;;  %v9696_v24 = vsel %vm6201_vm10, %v6137_v61, %v6265_v39  ;;  %v6322_v15 = vsel %vm6194_vm5, %v9597_v46, %v9617_v52  ;;  %v10346_v39 = vld [vmem:[#allocation23_spill] sm:$0xff] }
 0x6d2   : > { %10341 = vst [vmem:[#allocation21_spill] sm:$0xff] %v9676_v63  ;;  %10342 = vst [vmem:[#allocation28_spill] sm:$0xff] %v9678_v9  ;;  %v9683_v60 = vpop.f32.mrb[55].mxu0  ;;  %v9685_v8 = vpop.f32.mrb[55].mxu1  ;;  %v6328_v9 = vsel %vm6200_vm9, %v6136_v1, %v6264_v55  ;;  %vm6202_vm12 = vcmp.ge.f32.partialorder %v9659_v31, 0.0  ;;  %vm6203_vm13 = vcmp.ge.f32.partialorder %v6139_v21, 0.0  ;;  %v6447_v55 = vadd.f32 %v6384_v10, %v9624_v35 }
 0x6d3   : > { %10343 = vst [vmem:[#allocation29_spill] sm:$0xff] %v9683_v60  ;;  %10344 = vst [vmem:[#allocation30_spill] sm:$0xff] %v9685_v8  ;;  %v6267_v60 = vmul.f32 0.01, %v6139_v21  ;;  %v6385_v8 = vmul.f32 %v9614_v54, %v9144_v37  ;;  %5532 = vadd.xlane.f32.xlu1 %v5531_v25  ;;  %v6268_v1 = vmul.f32 0.01, %v6140_v62  ;;  %v6143_v61 = vadd.f32 %v9153_v49, %v9507_v3 }
 0x6d4   : > { %v6392_v36 = vmul.f32 %v6328_v9, %v9141_v42  ;;  %vm6204_vm14 = vcmp.ge.f32.partialorder %v6140_v62, 0.0  ;;  %v9711_v11 = vadd.f32 %v9157_v51, %v10346_v39  ;;  %v6145_v46 = vadd.f32 %v9155_v50, %v9512_v28 }
 0x6d5   : > { %vm6205_vm15 = vcmp.ge.f32.partialorder %v6141_v59, 0.0  ;;  %v6386_v35 = vmul.f32 %v6322_v15, %v9146_v53  ;;  %v6448_v10 = vadd.f32 %v6447_v55, %v6385_v8  ;;  %v6271_v56 = vmul.f32 0.01, %v6143_v61 }
 0x6d6   : > { %v6331_v25 = vsel %vm6203_vm13, %v6139_v21, %v6267_v60  ;;  %v6269_v20 = vmul.f32 0.01, %v6141_v59  ;;  %vm6207_vm0 = vcmp.ge.f32.partialorder %v6143_v61, 0.0  ;;  %v6326_v39 = vsel %vm6198_vm11, %v6134_v58, %v6262_v22 }
 0x6d7   : > { %v9715_v54 = vpop.f32.mrb[56].mxu0  ;;  %v9717_v52 = vpop.f32.mrb[56].mxu1  ;;  %v6332_v28 = vsel %vm6204_vm14, %v6140_v62, %v6268_v1  ;;  %v6449_v63 = vadd.f32 %v6448_v10, %v6386_v35  ;;  %v6273_v15 = vmul.f32 0.01, %v6145_v46  ;;  %v9734_v55 = vadd.f32 %v9157_v51, %v9523_v33 }
 0x6d8   : > { %10347 = vst [vmem:[#allocation22_spill] sm:$0xff] %v9715_v54  ;;  %10348 = vst [vmem:[#allocation23_spill] sm:$0xff] %v9717_v52  ;;  %v9720_v3 = vpop.f32.mrb[57].mxu1  ;;  %v9722_v9 = vpop.f32.mrb[57].mxu0  ;;  %v6389_v54 = vmul.f32 %v6325_v47, %v9144_v37  ;;  %v6452_v52 = vadd.f32 %v6388_v43, %v9653_v30  ;;  %v6144_v21 = vadd.f32 %v9161_v57, %v9514_v17  ;;  %v9751_v17 = vmul.f32 0.01, %v9711_v11 }
 0x6d9   : > { %v9728_v7 = vpop.f32.mrb[58].mxu0  ;;  %v9730_v8 = vpop.f32.mrb[58].mxu1  ;;  %v6147_v58 = vadd.f32 %v9153_v49, %v9525_v2  ;;  %6450 = vadd.xlane.f32.xlu1 %v6449_v63  ;;  %v6335_v30 = vsel %vm6207_vm0, %v6143_v61, %v6271_v56  ;;  %v6390_v60 = vmul.f32 %v6326_v39, %v9146_v53  ;;  %v6149_v22 = vadd.f32 %v9155_v50, %v9530_v23 }
 0x6da   : > { %v9740_v62 = vpop.f32.mrb[59].mxu0  ;;  %v9742_v47 = vpop.f32.mrb[59].mxu1  ;;  %v6453_v43 = vadd.f32 %v6452_v52, %v6389_v54  ;;  %v9748_v33 = vsel %vm6205_vm15, %v6141_v59, %v6269_v20  ;;  %vm6209_vm1 = vcmp.ge.f32.partialorder %v6145_v46, 0.0  ;;  %v6148_v2 = vadd.f32 %v9161_v57, %v9532_v13 }
 0x6db   : > { %v9756_v1 = vmul.f32 %v6331_v25, %v9139_v26  ;;  %v9759_v63 = vmul.f32 %v6332_v28, %v9141_v42  ;;  %v6272_v54 = vmul.f32 0.01, %v6144_v21  ;;  %vm6206_vm2 = vcmp.ge.f32.partialorder %v9711_v11, 0.0 }
 0x6dc   : > { %v6454_v61 = vadd.f32 %v6453_v43, %v6390_v60  ;;  %v9763_v23 = vmul.f32 %v6335_v30, %v9139_v26  ;;  %v9766_v59 = vmul.f32 0.01, %v9734_v55  ;;  %vm6208_vm3 = vcmp.ge.f32.partialorder %v6144_v21, 0.0 }
 0x6dd   : > { %vm6211_vm4 = vcmp.ge.f32.partialorder %v6147_v58, 0.0  ;;  %v6337_v35 = vsel %vm6209_vm1, %v6145_v46, %v6273_v15  ;;  %v6275_v10 = vmul.f32 0.01, %v6147_v58  ;;  %v6277_v56 = vmul.f32 0.01, %v6149_v22 }
 0x6de   : > { %6455 = vadd.xlane.f32.xlu0 %v6454_v61  ;;  %v9774_v25 = vadd.f32 %v9157_v51, %v9542_v38  ;;  %vm6210_vm5 = vcmp.ge.f32.partialorder %v9734_v55, 0.0  ;;  %vm6212_vm6 = vcmp.ge.f32.partialorder %v6148_v2, 0.0  ;;  %v6330_v28 = vsel %vm6202_vm12, %v9659_v31, %v9689_v41 }
 0x6df   : > { %v9768_v52 = vpop.f32.mrb[60].mxu0  ;;  %v9770_v13 = vpop.f32.mrb[60].mxu1  ;;  %v6393_v46 = vmul.f32 %v9696_v24, %v9144_v37  ;;  %v6457_v15 = vadd.f32 %v6392_v36, %v9692_v4  ;;  %v6336_v60 = vsel %vm6208_vm3, %v6144_v21, %v6272_v54  ;;  %v6276_v43 = vmul.f32 0.01, %v6148_v2 }
 0x6e0   : > { %v9776_v20 = vpop.f32.mrb[61].mxu1  ;;  %v9778_v39 = vpop.f32.mrb[61].mxu0  ;;  %v6151_v61 = vadd.f32 %v9153_v49, %v9561_v34  ;;  %v6394_v41 = vmul.f32 %v6330_v28, %v9146_v53  ;;  %v6152_v24 = vadd.f32 %v9161_v57, %v9569_v44  ;;  %v6155_v36 = vadd.f32 %v9153_v49, %v9576_v18 }
 0x6e1   : > { %10349 = vst [vmem:[#allocation31_spill] sm:$0xff] %v9776_v20  ;;  %10350 = vst [vmem:[#allocation32_spill] sm:$0xff] %v9778_v39  ;;  %v9788_v30 = vpop.f32.mrb[62].mxu0  ;;  %v9790_v38 = vpop.f32.mrb[62].mxu1  ;;  %v6153_v39 = vadd.f32 %v9155_v50, %v9563_v29  ;;  %v6458_v4 = vadd.f32 %v6457_v15, %v6393_v46  ;;  %v6339_v21 = vsel %vm6211_vm4, %v6147_v58, %v6275_v10  ;;  %vm6213_vm7 = vcmp.ge.f32.partialorder %v6149_v22, 0.0 }
 0x6e2   : > { %v9797_v20 = vpop.f32.mrb[63].mxu0  ;;  %v9799_v31 = vpop.f32.mrb[63].mxu1  ;;  %vm6215_vm8 = vcmp.ge.f32.partialorder %v6151_v61, 0.0  ;;  %v6279_v34 = vmul.f32 0.01, %v6151_v61  ;;  %v6400_v29 = vmul.f32 %v6336_v60, %v9141_v42  ;;  %vm6214_vm9 = vcmp.ge.f32.partialorder %v9774_v25, 0.0 }
 0x6e3   : > { %10351 = vst [vmem:[#allocation33_spill] sm:$0xff] %v9799_v31  ;;  %v6459_v54 = vadd.f32 %v6458_v4, %v6394_v41  ;;  %v6281_v31 = vmul.f32 0.01, %v6153_v39  ;;  %v9811_v28 = vadd.f32 %v9157_v51, %v9571_v0  ;;  %v6340_v44 = vsel %vm6212_vm6, %v6148_v2, %v6276_v43 }
 0x6e4   : > { %v6343_v46 = vsel %vm6215_vm8, %v6151_v61, %v6279_v34  ;;  %vm6217_vm10 = vcmp.ge.f32.partialorder %v6153_v39, 0.0  ;;  %v6280_v18 = vmul.f32 0.01, %v6152_v24  ;;  %v6403_v58 = vmul.f32 %v6339_v21, %v9139_v26 }
 0x6e5   : > { %v6341_v10 = vsel %vm6213_vm7, %v6149_v22, %v6277_v56  ;;  %6460 = vadd.xlane.f32.xlu1 %v6459_v54  ;;  %vm6216_vm11 = vcmp.ge.f32.partialorder %v6152_v24, 0.0  ;;  %v6283_v15 = vmul.f32 0.01, %v6155_v36  ;;  %v6278_v60 = vmul.f32 0.01, %v9774_v25 }
 0x6e6   : > { %vm6219_vm12 = vcmp.ge.f32.partialorder %v6155_v36, 0.0  ;;  %v6157_v41 = vadd.f32 %v9155_v50, %v9578_v16  ;;  %v6156_v0 = vadd.f32 %v9161_v57, %v9585_v48  ;;  %v6404_v2 = vmul.f32 %v6340_v44, %v9141_v42 }
 0x6e7   : > { %v9822_v43 = vmul.f32 %v6343_v46, %v9139_v26  ;;  %v9824_v61 = vsel %vm6217_vm10, %v6153_v39, %v6281_v31  ;;  %v9827_v22 = vmul.f32 0.01, %v9811_v28  ;;  %v6344_v56 = vsel %vm6216_vm11, %v6152_v24, %v6280_v18 }
 0x6e8   : > { %v6284_v4 = vmul.f32 0.01, %v6156_v0  ;;  %v9831_v21 = vadd.f32 %v9157_v51, %v9587_v5  ;;  %v6334_v16 = vsel %vm6206_vm2, %v9711_v11, %v9751_v17  ;;  %v6347_v48 = vsel %vm6219_vm12, %v6155_v36, %v6283_v15 }
 0x6e9   : > { %vm6220_vm13 = vcmp.ge.f32.partialorder %v6156_v0, 0.0  ;;  %v6397_v39 = vmul.f32 %v9748_v33, %v9144_v37  ;;  %v6462_v31 = vadd.f32 %v9759_v63, %v9756_v1  ;;  %v6285_v34 = vmul.f32 0.01, %v6157_v41 }
 0x6ea   : > { %v6338_v5 = vsel %vm6210_vm5, %v9734_v55, %v9766_v59  ;;  %v6401_v24 = vmul.f32 %v6337_v35, %v9144_v37  ;;  %v6467_v54 = vadd.f32 %v6400_v29, %v9763_v23  ;;  %vm6218_vm14 = vcmp.ge.f32.partialorder %v9811_v28, 0.0 }
 0x6eb   : > { %vm6221_vm15 = vcmp.ge.f32.partialorder %v6157_v41, 0.0  ;;  %v6398_v11 = vmul.f32 %v6334_v16, %v9146_v53  ;;  %v6463_v17 = vadd.f32 %v6462_v31, %v6397_v39  ;;  %v6159_v33 = vadd.f32 %v9153_v49, %v9607_v14  ;;  %v10352_v39 = vld [vmem:[#allocation24_spill] sm:$0xff] }
 0x6ec   : > { %v6408_v1 = vmul.f32 %v6344_v56, %v9141_v42  ;;  %v6348_v63 = vsel %vm6220_vm13, %v6156_v0, %v6284_v4  ;;  %v6402_v36 = vmul.f32 %v6338_v5, %v9146_v53  ;;  %v6468_v44 = vadd.f32 %v6467_v54, %v6401_v24  ;;  %v10353_v5 = vld [vmem:[#allocation25_spill] sm:$0xff] }
 0x6ed   : > { %v9854_v55 = vmul.f32 %v6347_v48, %v9139_v26  ;;  %v6464_v59 = vadd.f32 %v6463_v17, %v6398_v11  ;;  %vm6223_vm0 = vcmp.ge.f32.partialorder %v6159_v33, 0.0  ;;  %v6287_v23 = vmul.f32 0.01, %v6159_v33 }
 0x6ee   : > { %v6349_v35 = vsel %vm6221_vm15, %v6157_v41, %v6285_v34  ;;  %vm6222_vm1 = vcmp.ge.f32.partialorder %v9831_v21, 0.0  ;;  %v6286_v29 = vmul.f32 0.01, %v9831_v21  ;;  %v6469_v46 = vadd.f32 %v6468_v44, %v6402_v36 }
 0x6ef   : > { %v6342_v14 = vsel %vm6214_vm9, %v9774_v25, %v6278_v60  ;;  %v6412_v18 = vmul.f32 %v6348_v63, %v9141_v42  ;;  %6465 = vadd.xlane.f32.xlu1 %v6464_v59  ;;  %v6161_v15 = vadd.f32 %v9155_v50, %v9609_v40  ;;  %v6405_v0 = vmul.f32 %v6341_v10, %v9144_v37 }
 0x6f0   : > { %v6472_v56 = vadd.f32 %v6404_v2, %v6403_v58  ;;  %v6351_v4 = vsel %vm6223_vm0, %v6159_v33, %v6287_v23  ;;  %v9867_v41 = vadd.f32 %v9157_v51, %v9619_v32  ;;  %v6160_v16 = vadd.f32 %v9161_v57, %v9621_v27 }
 0x6f1   : > { %v6163_v25 = vadd.f32 %v9153_v49, %v9632_v6  ;;  %v6406_v60 = vmul.f32 %v6342_v14, %v9146_v53  ;;  %v6165_v40 = vadd.f32 %v9155_v50, %v9634_v12  ;;  %v6164_v58 = vadd.f32 %v9161_v57, %v10352_v39 }
 0x6f2   : > { %v6473_v48 = vadd.f32 %v6472_v56, %v6405_v0  ;;  %vm6224_vm2 = vcmp.ge.f32.partialorder %v6160_v16, 0.0  ;;  %v6288_v10 = vmul.f32 0.01, %v6160_v16  ;;  %vm6225_vm4 = vcmp.ge.f32.partialorder %v6161_v15, 0.0 }
 0x6f3   : > { %vm6227_vm3 = vcmp.ge.f32.partialorder %v6163_v25, 0.0  ;;  %v6291_v32 = vmul.f32 0.01, %v6163_v25  ;;  %6470 = vadd.xlane.f32.xlu1 %v6469_v46  ;;  %v6289_v2 = vmul.f32 0.01, %v6161_v15  ;;  %vm6228_vm5 = vcmp.ge.f32.partialorder %v6164_v58, 0.0 }
 0x6f4   : > { %v6474_v27 = vadd.f32 %v6473_v48, %v6406_v60  ;;  %v6352_v31 = vsel %vm6224_vm2, %v6160_v16, %v6288_v10  ;;  %v6293_v6 = vmul.f32 0.01, %v6165_v40  ;;  %v6292_v34 = vmul.f32 0.01, %v6164_v58  ;;  %v10354_v46 = vld [vmem:[#allocation26_spill] sm:$0xff]  ;;  %v10355_v48 = vld [vmem:[#allocation27_spill] sm:$0xff] }
 0x6f5   : > { %v9880_v24 = vadd.f32 %v9157_v51, %v10353_v5  ;;  %v6415_v12 = vmul.f32 %v6351_v4, %v9139_v26  ;;  %v6290_v54 = vmul.f32 0.01, %v9867_v41  ;;  %v6355_v11 = vsel %vm6227_vm3, %v6163_v25, %v6291_v32 }
 0x6f6   : > { %6475 = vadd.xlane.f32.xlu0 %v6474_v27  ;;  %vm6229_vm6 = vcmp.ge.f32.partialorder %v6165_v40, 0.0  ;;  %vm6226_vm7 = vcmp.ge.f32.partialorder %v9867_v41, 0.0  ;;  %v6356_v17 = vsel %vm6228_vm5, %v6164_v58, %v6292_v34  ;;  %v6346_v33 = vsel %vm6218_vm14, %v9811_v28, %v9827_v22  ;;  %v10356_v58 = vld [vmem:[#allocation21_spill] sm:$0xff] }
 0x6f7   : > { %v6409_v63 = vmul.f32 %v9824_v61, %v9144_v37  ;;  %v6477_v36 = vadd.f32 %v6408_v1, %v9822_v43  ;;  %v6353_v44 = vsel %vm6225_vm4, %v6161_v15, %v6289_v2  ;;  %v6416_v59 = vmul.f32 %v6352_v31, %v9141_v42 }
 0x6f8   : > { %v6167_v23 = vadd.f32 %v9153_v49, %v9664_v19  ;;  %v6169_v14 = vadd.f32 %v9155_v50, %v10354_v46  ;;  %v6419_v0 = vmul.f32 %v6355_v11, %v9139_v26  ;;  %v6357_v56 = vsel %vm6229_vm6, %v6165_v40, %v6293_v6 }
 0x6f9   : > { %vm6230_vm8 = vcmp.ge.f32.partialorder %v9880_v24, 0.0  ;;  %v6410_v28 = vmul.f32 %v6346_v33, %v9146_v53  ;;  %v6478_v61 = vadd.f32 %v6477_v36, %v6409_v63  ;;  %v6420_v43 = vmul.f32 %v6356_v17, %v9141_v42  ;;  %v10359_v33 = vld [vmem:[#allocation30_spill] sm:$0xff] }
 0x6fa   : > { %v6294_v22 = vmul.f32 0.01, %v9880_v24  ;;  %v6295_v1 = vmul.f32 0.01, %v6167_v23  ;;  %v6350_v19 = vsel %vm6222_vm1, %v9831_v21, %v6286_v29  ;;  %vm6231_vm9 = vcmp.ge.f32.partialorder %v6167_v23, 0.0  ;;  %v10357_v29 = vld [vmem:[#allocation28_spill] sm:$0xff] }
 0x6fb   : > { %v6479_v15 = vadd.f32 %v6478_v61, %v6410_v28  ;;  %v9908_v4 = vadd.f32 %v9157_v51, %v9670_v45  ;;  %v6413_v16 = vmul.f32 %v6349_v35, %v9144_v37  ;;  %vm6233_vm10 = vcmp.ge.f32.partialorder %v6169_v14, 0.0  ;;  %v10358_v45 = vld [vmem:[#allocation29_spill] sm:$0xff] }
 0x6fc   : > { %v6297_v25 = vmul.f32 0.01, %v6169_v14  ;;  %v6482_v60 = vadd.f32 %v6412_v18, %v9854_v55  ;;  %v6168_v40 = vadd.f32 %v9161_v57, %v10355_v48  ;;  %v6414_v39 = vmul.f32 %v6350_v19, %v9146_v53 }
 0x6fd   : > { %6480 = vadd.xlane.f32.xlu1 %v6479_v15  ;;  %v6171_v21 = vadd.f32 %v9153_v49, %v10356_v58  ;;  %v6173_v10 = vadd.f32 %v9155_v50, %v10357_v29  ;;  %v6172_v32 = vadd.f32 %v9161_v57, %v10358_v45  ;;  %v6359_v35 = vsel %vm6231_vm9, %v6167_v23, %v6295_v1  ;;  %v10360_v15 = vld [vmem:[#allocation22_spill] sm:$0xff] }
 0x6fe   : > { %v6483_v2 = vadd.f32 %v6482_v60, %v6413_v16  ;;  %vm6232_vm11 = vcmp.ge.f32.partialorder %v6168_v40, 0.0  ;;  %v6296_v27 = vmul.f32 0.01, %v6168_v40  ;;  %v6361_v5 = vsel %vm6233_vm10, %v6169_v14, %v6297_v25  ;;  %v10361_v25 = vld [vmem:[#allocation23_spill] sm:$0xff] }
 0x6ff   : > { %vm6235_vm12 = vcmp.ge.f32.partialorder %v6171_v21, 0.0  ;;  %v6299_v55 = vmul.f32 0.01, %v6171_v21  ;;  %vm6237_vm13 = vcmp.ge.f32.partialorder %v6173_v10, 0.0  ;;  %v6301_v18 = vmul.f32 0.01, %v6173_v10 }
 0x700   : > { %v6484_v31 = vadd.f32 %v6483_v2, %v6414_v39  ;;  %v6360_v6 = vsel %vm6232_vm11, %v6168_v40, %v6296_v27  ;;  %vm6236_vm14 = vcmp.ge.f32.partialorder %v6172_v32, 0.0  ;;  %v6300_v34 = vmul.f32 0.01, %v6172_v32 }
 0x701   : > { %v6298_v11 = vmul.f32 0.01, %v9908_v4  ;;  %v6363_v17 = vsel %vm6235_vm12, %v6171_v21, %v6299_v55  ;;  %v9925_v63 = vadd.f32 %v9157_v51, %v10359_v33  ;;  %v6423_v36 = vmul.f32 %v6359_v35, %v9139_v26 }
 0x702   : > { %vm6234_vm15 = vcmp.ge.f32.partialorder %v9908_v4, 0.0  ;;  %6485 = vadd.xlane.f32.xlu0 %v6484_v31  ;;  %v6424_v23 = vmul.f32 %v6360_v6, %v9141_v42  ;;  %v9930_v46 = vsel %vm6237_vm13, %v6173_v10, %v6301_v18  ;;  %v6354_v14 = vsel %vm6226_vm7, %v9867_v41, %v6290_v54 }
 0x703   : > { %v6427_v28 = vmul.f32 %v6363_v17, %v9139_v26  ;;  %v6364_v61 = vsel %vm6236_vm14, %v6172_v32, %v6300_v34  ;;  %v6417_v1 = vmul.f32 %v6353_v44, %v9144_v37  ;;  %v6487_v19 = vadd.f32 %v6416_v59, %v6415_v12 }
 0x704   : > { %v6175_v16 = vadd.f32 %v9153_v49, %v10360_v15  ;;  %v6177_v60 = vadd.f32 %v9155_v50, %v10361_v25  ;;  %v9943_v48 = vadd.f32 %v9157_v51, %v9720_v3  ;;  %v6358_v41 = vsel %vm6230_vm8, %v9880_v24, %v6294_v22 }
 0x705   : > { %vm6238_vm0 = vcmp.ge.f32.partialorder %v9925_v63, 0.0  ;;  %v6418_v54 = vmul.f32 %v6354_v14, %v9146_v53  ;;  %v6488_v44 = vadd.f32 %v6487_v19, %v6417_v1  ;;  %v6421_v12 = vmul.f32 %v6357_v56, %v9144_v37 }
 0x706   : > { %v6492_v59 = vadd.f32 %v6420_v43, %v6419_v0  ;;  %v6428_v40 = vmul.f32 %v6364_v61, %v9141_v42  ;;  %v6302_v39 = vmul.f32 0.01, %v9925_v63  ;;  %vm6239_vm1 = vcmp.ge.f32.partialorder %v6175_v16, 0.0 }
 0x707   : > { %v6303_v58 = vmul.f32 0.01, %v6175_v16  ;;  %v6489_v3 = vadd.f32 %v6488_v44, %v6418_v54  ;;  %vm6241_vm2 = vcmp.ge.f32.partialorder %v6177_v60, 0.0  ;;  %v6422_v21 = vmul.f32 %v6358_v41, %v9146_v53 }
 0x708   : > { %v6493_v29 = vadd.f32 %v6492_v59, %v6421_v12  ;;  %v6305_v24 = vmul.f32 0.01, %v6177_v60  ;;  %v9955_v22 = vmul.f32 0.01, %v9943_v48  ;;  %v6176_v10 = vadd.f32 %v9161_v57, %v9722_v9  ;;  %v10363_v12 = vld [vmem:[#allocation32_spill] sm:$0xff] }
 0x709   : > { %v6179_v0 = vadd.f32 %v9153_v49, %v9728_v7  ;;  %6490 = vadd.xlane.f32.xlu1 %v6489_v3  ;;  %v6367_v56 = vsel %vm6239_vm1, %v6175_v16, %v6303_v58  ;;  %v6181_v45 = vadd.f32 %v9155_v50, %v9730_v8  ;;  %v6180_v32 = vadd.f32 %v9161_v57, %v9740_v62 }
 0x70a   : > { %v6494_v43 = vadd.f32 %v6493_v29, %v6422_v21  ;;  %vm6240_vm3 = vcmp.ge.f32.partialorder %v6176_v10, 0.0  ;;  %v6304_v35 = vmul.f32 0.01, %v6176_v10  ;;  %v9966_v7 = vsel %vm6241_vm2, %v6177_v60, %v6305_v24  ;;  %v5458_v24 = vpop.xlane.xlu0 %5457 }
 0x70b   : > { %vm6243_vm4 = vcmp.ge.f32.partialorder %v6179_v0, 0.0  ;;  %v6307_v2 = vmul.f32 0.01, %v6179_v0  ;;  %vm6245_vm5 = vcmp.ge.f32.partialorder %v6181_v45, 0.0  ;;  %v6309_v27 = vmul.f32 0.01, %v6181_v45 }
 0x70c   : > { %6495 = vadd.xlane.f32.xlu0 %v6494_v43  ;;  %vm6244_vm6 = vcmp.ge.f32.partialorder %v6180_v32, 0.0  ;;  %v6308_v9 = vmul.f32 0.01, %v6180_v32  ;;  %v6368_v55 = vsel %vm6240_vm3, %v6176_v10, %v6304_v35  ;;  %v9970_v8 = vadd.f32 %v9157_v51, %v9742_v47 }
 0x70d   : > { %v6371_v18 = vsel %vm6243_vm4, %v6179_v0, %v6307_v2  ;;  %v6431_v62 = vmul.f32 %v6367_v56, %v9139_v26  ;;  %v6432_v31 = vmul.f32 %v6368_v55, %v9141_v42  ;;  %v6362_v34 = vsel %vm6234_vm15, %v9908_v4, %v6298_v11  ;;  %v10362_v11 = vld [vmem:[#allocation31_spill] sm:$0xff] }
 0x70e   : > { %v6372_v6 = vsel %vm6244_vm6, %v6180_v32, %v6308_v9  ;;  %vm6242_vm7 = vcmp.ge.f32.partialorder %v9943_v48, 0.0  ;;  %v6435_v17 = vmul.f32 %v6371_v18, %v9139_v26  ;;  %v6373_v33 = vsel %vm6245_vm5, %v6181_v45, %v6309_v27 }
 0x70f   : > { %v6436_v14 = vmul.f32 %v6372_v6, %v9141_v42  ;;  %v6310_v61 = vmul.f32 0.01, %v9970_v8  ;;  %v6425_v47 = vmul.f32 %v6361_v5, %v9144_v37  ;;  %v6497_v1 = vadd.f32 %v6424_v23, %v6423_v36  ;;  %v10022_v6 = vld [vmem:[#allocation3] ss:$0 sm:$0xff] }
 0x710   : > { %v6183_v19 = vadd.f32 %v9153_v49, %v9768_v52  ;;  %v6185_v15 = vadd.f32 %v9155_v50, %v9770_v13  ;;  %vm6246_vm8 = vcmp.ge.f32.partialorder %v9970_v8, 0.0  ;;  %v6426_v4 = vmul.f32 %v6362_v34, %v9146_v53 }
 0x711   : > { %v6186_v16 = vadd.f32 %v9157_v51, %v10362_v11  ;;  %v6366_v25 = vsel %vm6238_vm0, %v9925_v63, %v6302_v39  ;;  %v6502_v60 = vadd.f32 %v6428_v40, %v6427_v28  ;;  %v6498_v5 = vadd.f32 %v6497_v1, %v6425_v47 }
 0x712   : > { %vm6247_vm9 = vcmp.ge.f32.partialorder %v6183_v19, 0.0  ;;  %v6311_v36 = vmul.f32 0.01, %v6183_v19  ;;  %v6429_v52 = vmul.f32 %v9930_v46, %v9144_v37  ;;  %vm6249_vm10 = vcmp.ge.f32.partialorder %v6185_v15, 0.0 }
 0x713   : > { %v6313_v13 = vmul.f32 0.01, %v6185_v15  ;;  %vm6250_vm11 = vcmp.ge.f32.partialorder %v6186_v16, 0.0  ;;  %v6430_v23 = vmul.f32 %v6366_v25, %v9146_v53  ;;  %v6499_v41 = vadd.f32 %v6498_v5, %v6426_v4 }
 0x714   : > { %v6375_v54 = vsel %vm6247_vm9, %v6183_v19, %v6311_v36  ;;  %v6503_v44 = vadd.f32 %v6502_v60, %v6429_v52  ;;  %v6184_v59 = vadd.f32 %v9161_v57, %v10363_v12  ;;  %v6314_v28 = vmul.f32 0.01, %v6186_v16 }
 0x715   : > { %v6439_v63 = vmul.f32 %v6375_v54, %v9139_v26  ;;  %v6187_v40 = vadd.f32 %v9153_v49, %v9788_v30  ;;  %v6189_v46 = vadd.f32 %v9155_v50, %v9790_v38  ;;  %6500 = vadd.xlane.f32.xlu1 %v6499_v41  ;;  %v6188_v3 = vadd.f32 %v9161_v57, %v9797_v20  ;;  %v10364_v49 = vld [vmem:[#allocation33_spill] sm:$0xff]  ;;  %v5468_v35 = vpop.xlane.xlu1 %5467 }
 0x716   : > { %v6504_v39 = vadd.f32 %v6503_v44, %v6430_v23  ;;  %vm6248_vm12 = vcmp.ge.f32.partialorder %v6184_v59, 0.0  ;;  %v6312_v58 = vmul.f32 0.01, %v6184_v59  ;;  %v6190_v30 = vadd.f32 %v9157_v51, %v10364_v49 }
 0x717   : > { %vm6251_vm13 = vcmp.ge.f32.partialorder %v6187_v40, 0.0  ;;  %v6315_v21 = vmul.f32 0.01, %v6187_v40  ;;  %vm6253_vm14 = vcmp.ge.f32.partialorder %v6189_v46, 0.0  ;;  %v6317_v29 = vmul.f32 0.01, %v6189_v46 }
 0x718   : > { %6505 = vadd.xlane.f32.xlu0 %v6504_v39  ;;  %v6376_v10 = vsel %vm6248_vm12, %v6184_v59, %v6312_v58  ;;  %vm6252_vm15 = vcmp.ge.f32.partialorder %v6188_v3, 0.0  ;;  %v6316_v0 = vmul.f32 0.01, %v6188_v3  ;;  %v6377_v50 = vsel %vm6249_vm10, %v6185_v15, %v6313_v13 }
 0x719   : > { %v6440_v38 = vmul.f32 %v6376_v10, %v9141_v42  ;;  %v6379_v56 = vsel %vm6251_vm13, %v6187_v40, %v6315_v21  ;;  %v6381_v43 = vsel %vm6253_vm14, %v6189_v46, %v6317_v29  ;;  %v6318_v45 = vmul.f32 0.01, %v6190_v30 }
 0x71a   : > { %v6443_v57 = vmul.f32 %v6379_v56, %v9139_v26  ;;  %v6380_v20 = vsel %vm6252_vm15, %v6188_v3, %v6316_v0  ;;  %v6370_v32 = vsel %vm6242_vm7, %v9943_v48, %v9955_v22  ;;  %vm6254_vm0 = vcmp.ge.f32.partialorder %v6190_v30, 0.0 }
 0x71b   : > { %v6444_v2 = vmul.f32 %v6380_v20, %v9141_v42  ;;  %v6433_v51 = vmul.f32 %v9966_v7, %v9144_v37  ;;  %v6507_v27 = vadd.f32 %v6432_v31, %v6431_v62  ;;  %v6374_v9 = vsel %vm6246_vm8, %v9970_v8, %v6310_v61  ;;  %v5463_v7 = vpop.xlane.xlu0 %5462 }
 0x71c   : > { %v6437_v26 = vmul.f32 %v6373_v33, %v9144_v37  ;;  %v6512_v55 = vadd.f32 %v6436_v14, %v6435_v17  ;;  %v6378_v18 = vsel %vm6250_vm11, %v6186_v16, %v6314_v28  ;;  %v6434_v48 = vmul.f32 %v6370_v32, %v9146_v53  ;;  %v5473_v11 = vpop.xlane.xlu1 %5472 }
 0x71d   : > { %v6508_v22 = vadd.f32 %v6507_v27, %v6433_v51  ;;  %v6438_v42 = vmul.f32 %v6374_v9, %v9146_v53  ;;  %v6441_v34 = vmul.f32 %v6377_v50, %v9144_v37  ;;  %v6442_v31 = vmul.f32 %v6378_v18, %v9146_v53 }
 0x71e   : > { %v6513_v62 = vadd.f32 %v6512_v55, %v6437_v26  ;;  %v6517_v47 = vadd.f32 %v6440_v38, %v6439_v63  ;;  %v6382_v8 = vsel %vm6254_vm0, %v6190_v30, %v6318_v45  ;;  %v6445_v17 = vmul.f32 %v6381_v43, %v9144_v37 }
 0x71f   : > { %v6509_v33 = vadd.f32 %v6508_v22, %v6434_v48  ;;  %v6522_v14 = vadd.f32 %v6444_v2, %v6443_v57  ;;  %v5540_v61 = vadd.f32 %v10022_v6, %v5458_v24  ;;  %v5541_v15 = vadd.f32 %v10022_v6, %v5463_v7  ;;  %v5478_v23 = vpop.xlane.xlu0 %5477 }
 0x720   : > { %v6514_v1 = vadd.f32 %v6513_v62, %v6438_v42  ;;  %v6518_v19 = vadd.f32 %v6517_v47, %v6441_v34  ;;  %v5542_v4 = vadd.f32 %v10022_v6, %v5468_v35  ;;  %v6446_v16 = vmul.f32 %v6382_v8, %v9146_v53 }
 0x721   : > { %6510 = vadd.xlane.f32.xlu1 %v6509_v33  ;;  %v6523_v25 = vadd.f32 %v6522_v14, %v6445_v17  ;;  %v5543_v60 = vadd.f32 %v10022_v6, %v5473_v11  ;;  %v5557_v36 = vmul.f32 0.5, %v5541_v15  ;;  %v5556_v13 = vmul.f32 0.5, %v5540_v61 }
 0x722   : > { %6515 = vadd.xlane.f32.xlu0 %v6514_v1  ;;  %v6519_v5 = vadd.f32 %v6518_v19, %v6442_v31  ;;  %v5558_v37 = vmul.f32 0.5, %v5542_v4  ;;  %v5544_v54 = vadd.f32 %v10022_v6, %v5478_v23  ;;  %vm5695_vm1 = vcmask 130112  }
 0x723   : > { %v6524_v52 = vadd.f32 %v6523_v25, %v6446_v16  ;;  %8191 = vtanh.f32 %v5557_v36  ;;  %v5559_v41 = vmul.f32 0.5, %v5543_v60  ;;  %vm5702_vm2 = vcmask 195712  }
 0x724   : > { %8193 = vtanh.f32 %v5558_v37  ;;  %v5483_v44 = vpop.xlane.xlu1 %5482  ;;  %v5560_v53 = vmul.f32 0.5, %v5544_v54  ;;  %vm5709_vm3 = vcmask 261312   ;;  %vm5716_vm4 = vcmask 326912  }
 0x725   : > { %6520 = vadd.xlane.f32.xlu1 %v6519_v5  ;;  %8195 = vtanh.f32 %v5556_v13  ;;  %v5545_v12 = vadd.f32 %v10022_v6, %v5483_v44  ;;  %vm5723_vm5 = vcmask 392512   ;;  %vm5730_vm6 = vcmask 458112  }
 0x726   : > { %6525 = vadd.xlane.f32.xlu0 %v6524_v52  ;;  %8197 = vtanh.f32 %v5559_v41  ;;  %vm5737_vm7 = vcmask 523712   ;;  %vm5744_vm8 = vcmask 589312   ;;  %vm5751_vm9 = vcmask 654912  }
 0x727   : > { %8199 = vtanh.f32 %v5560_v53  ;;  %v5561_v40 = vmul.f32 0.5, %v5545_v12  ;;  %vm5758_vm10 = vcmask 720512   ;;  %vm5765_vm11 = vcmask 786112  }
 0x728   : > { %vm5772_vm12 = vcmask 851712   ;;  %vm5779_vm13 = vcmask 917312   ;;  %vm5786_vm14 = vcmask 982912   ;;  %vm5793_vm15 = vcmask 1048512  }
 0x729   : > { %8201 = vtanh.f32 %v5561_v40 }
 0x72b   : > { %v5488_v46 = vpop.xlane.xlu0 %5487 }
 0x72c   : > { %v5546_v39 = vadd.f32 %v10022_v6, %v5488_v46 }
 0x72d   : > { %v8192_v59 = vpop.eup %8191 }
 0x72e   : > { %v8194_v63 = vpop.eup %8193  ;;  %v5589_v28 = vadd.f32 1.0, %v8192_v59  ;;  %v5562_v21 = vmul.f32 0.5, %v5546_v39 }
 0x72f   : > { %v8196_v58 = vpop.eup %8195  ;;  %v5590_v3 = vadd.f32 1.0, %v8194_v63 }
 0x730   : > { %v5605_v29 = vmul.f32 0.5, %v5589_v28  ;;  %v8198_v24 = vpop.eup %8197  ;;  %v5588_v10 = vadd.f32 1.0, %v8196_v58  ;;  %8203 = vtanh.f32 %v5562_v21  ;;  %v5493_v0 = vpop.xlane.xlu1 %5492 }
 0x731   : > { %v5547_v49 = vadd.f32 %v10022_v6, %v5493_v0  ;;  %v5591_v30 = vadd.f32 1.0, %v8198_v24  ;;  %v5606_v50 = vmul.f32 0.5, %v5590_v3  ;;  %v8200_v38 = vpop.eup %8199 }
 0x732   : > { %v5604_v43 = vmul.f32 0.5, %v5588_v10  ;;  %v5592_v57 = vadd.f32 1.0, %v8200_v38 }
 0x733   : > { %v5563_v56 = vmul.f32 0.5, %v5547_v49  ;;  %v5607_v20 = vmul.f32 0.5, %v5591_v30  ;;  %v8202_v35 = vpop.eup %8201 }
 0x734   : > { %v5608_v26 = vmul.f32 0.5, %v5592_v57  ;;  %v5593_v18 = vadd.f32 1.0, %v8202_v35 }
 0x735   : > { %8205 = vtanh.f32 %v5563_v56 }
 0x736   : > { %5640 = vperm.xlu1 %8170, %v5605_v29   ;;  %v5609_v7 = vmul.f32 0.5, %v5593_v18 }
 0x737   : > { %v5498_v45 = vpop.xlane.xlu0 %5497 }
 0x738   : > { %v5548_v32 = vadd.f32 %v10022_v6, %v5498_v45 }
 0x739   : > { %v5503_v2 = vpop.xlane.xlu1 %5502 }
 0x73a   : > { %5643 = vperm.xlu1 %8170, %v5606_v50   ;;  %v8204_v51 = vpop.eup %8203  ;;  %v5564_v27 = vmul.f32 0.5, %v5548_v32  ;;  %v5549_v9 = vadd.f32 %v10022_v6, %v5503_v2 }
 0x73b   : > { %v5594_v55 = vadd.f32 1.0, %v8204_v51 }
 0x73c   : > { %5637 = vperm.xlu0 %8169, %v5604_v43   ;;  %8207 = vtanh.f32 %v5564_v27  ;;  %v5565_v48 = vmul.f32 0.5, %v5549_v9 }
 0x73d   : > { %v5610_v22 = vmul.f32 0.5, %v5594_v55 }
 0x73e   : > { %5646 = vperm.xlu1 %8170, %v5607_v20   ;;  %8209 = vtanh.f32 %v5565_v48 }
 0x73f   : > { %v8206_v42 = vpop.eup %8205 }
 0x740   : > { %5655 = vperm.xlu0 %8169, %v5610_v22   ;;  %v5595_v34 = vadd.f32 1.0, %v8206_v42 }
 0x742   : > { %5649 = vperm.xlu1 %8170, %v5608_v26   ;;  %v5611_v62 = vmul.f32 0.5, %v5595_v34 }
 0x743   : > { %v5508_v31 = vpop.xlane.xlu0 %5507 }
 0x744   : > { %v5550_v47 = vadd.f32 %v10022_v6, %v5508_v31 }
 0x746   : > { %5652 = vperm.xlu1 %8170, %v5609_v7   ;;  %v5513_v8 = vpop.xlane.xlu1 %5512  ;;  %v8208_v33 = vpop.eup %8207  ;;  %v5566_v17 = vmul.f32 0.5, %v5550_v47 }
 0x747   : > { %v5551_v14 = vadd.f32 %v10022_v6, %v5513_v8  ;;  %v5596_v61 = vadd.f32 1.0, %v8208_v33 }
 0x748   : > { %v8210_v1 = vpop.eup %8209  ;;  %8211 = vtanh.f32 %v5566_v17 }
 0x749   : > { %v5567_v19 = vmul.f32 0.5, %v5551_v14  ;;  %v5597_v15 = vadd.f32 1.0, %v8210_v1  ;;  %v5612_v4 = vmul.f32 0.5, %v5596_v61 }
 0x74a   : > { %5658 = vperm.xlu1 %8170, %v5611_v62  }
 0x74b   : > { %8213 = vtanh.f32 %v5567_v19  ;;  %v5613_v11 = vmul.f32 0.5, %v5597_v15 }
 0x74d   : > { %5664 = vperm.xlu0 %8169, %v5613_v11  }
 0x74e   : > { %5661 = vperm.xlu1 %8170, %v5612_v4  }
 0x74f   : > { %v5518_v16 = vpop.xlane.xlu0 %5517 }
 0x750   : > { %v5552_v25 = vadd.f32 %v10022_v6, %v5518_v16 }
 0x751   : > { %v5523_v60 = vpop.xlane.xlu1 %5522 }
 0x752   : > { %v5568_v5 = vmul.f32 0.5, %v5552_v25  ;;  %v5553_v36 = vadd.f32 %v10022_v6, %v5523_v60  ;;  %v8212_v37 = vpop.eup %8211 }
 0x753   : > { %v5598_v52 = vadd.f32 1.0, %v8212_v37 }
 0x754   : > { %8215 = vtanh.f32 %v5568_v5  ;;  %v5569_v13 = vmul.f32 0.5, %v5553_v36 }
 0x755   : > { %v8214_v23 = vpop.eup %8213  ;;  %v5614_v54 = vmul.f32 0.5, %v5598_v52 }
 0x756   : > { %v5599_v41 = vadd.f32 1.0, %v8214_v23  ;;  %8217 = vtanh.f32 %v5569_v13 }
 0x757   : > { %5667 = vperm.xlu1 %8170, %v5614_v54  }
 0x758   : > { %v5615_v44 = vmul.f32 0.5, %v5599_v41 }
 0x75a   : > { %5670 = vperm.xlu0 %8169, %v5615_v44  }
 0x75b   : > { %v10047_v39 = vpop.xlane.xlu0 %5527 }
 0x75c   : > { %v5554_v41 = vadd.f32 %v10022_v6, %v10047_v39 }
 0x75e   : > { %v8216_v53 = vpop.eup %8215 }
 0x75f   : > { %v5600_v12 = vadd.f32 1.0, %v8216_v53  ;;  %v5570_v53 = vmul.f32 0.5, %v5554_v41 }
 0x760   : > { %v8218_v59 = vpop.eup %8217  ;;  %v10045_v40 = vpop.xlane.xlu1 %5532 }
 0x761   : > { %v5601_v63 = vadd.f32 1.0, %v8218_v59  ;;  %v5616_v28 = vmul.f32 0.5, %v5600_v12  ;;  %v5555_v59 = vadd.f32 %v10022_v6, %v10045_v40 }
 0x763   : > { %5673 = vperm.xlu1 %8170, %v5616_v28   ;;  %v5617_v46 = vmul.f32 0.5, %v5601_v63  ;;  %v5571_v39 = vmul.f32 0.5, %v5555_v59 }
 0x766   : > { %v6451_v58 = vpop.xlane.xlu1 %6450 }
 0x767   : > { %v6527_v3 = vadd.f32 %v10022_v6, %v6451_v58  ;;  %5676 = vperm.xlu1 %8170, %v5617_v46  }
 0x769   : > { %v6543_v21 = vmul.f32 0.5, %v6527_v3 }
 0x76b   : > { %v6456_v29 = vpop.xlane.xlu0 %6455  ;;  %8219 = vtanh.f32 %v6543_v21 }
 0x76c   : > { %v6528_v24 = vadd.f32 %v10022_v6, %v6456_v29 }
 0x76e   : > { %v6544_v10 = vmul.f32 0.5, %v6528_v24 }
 0x770   : > { %8221 = vtanh.f32 %v6544_v10 }
 0x772   : > { %v6461_v0 = vpop.xlane.xlu1 %6460 }
 0x773   : > { %v6529_v49 = vadd.f32 %v10022_v6, %v6461_v0 }
 0x775   : > { %v6545_v30 = vmul.f32 0.5, %v6529_v49  ;;  %v8220_v50 = vpop.eup %8219 }
 0x776   : > { %v6575_v38 = vadd.f32 1.0, %v8220_v50 }
 0x777   : > { %8223 = vtanh.f32 %v6545_v30 }
 0x778   : > { %v6591_v56 = vmul.f32 0.5, %v6575_v38 }
 0x77a   : > { %v8222_v43 = vpop.eup %8221  ;;  %6624 = vperm.xlu1 %8170, %v6591_v56  }
 0x77b   : > { %v6576_v57 = vadd.f32 1.0, %v8222_v43 }
 0x77c   : > { %v6466_v20 = vpop.xlane.xlu1 %6465 }
 0x77d   : > { %v6530_v45 = vadd.f32 %v10022_v6, %v6466_v20  ;;  %v6592_v32 = vmul.f32 0.5, %v6576_v57 }
 0x77f   : > { %v6546_v35 = vmul.f32 0.5, %v6530_v45  ;;  %6627 = vperm.xlu0 %8169, %v6592_v32  }
 0x780   : > { %v6471_v2 = vpop.xlane.xlu1 %6470 }
 0x781   : > { %v8224_v51 = vpop.eup %8223  ;;  %8225 = vtanh.f32 %v6546_v35  ;;  %v6531_v27 = vadd.f32 %v10022_v6, %v6471_v2 }
 0x782   : > { %v6577_v9 = vadd.f32 1.0, %v8224_v51 }
 0x783   : > { %v6476_v26 = vpop.xlane.xlu0 %6475  ;;  %v6547_v55 = vmul.f32 0.5, %v6531_v27 }
 0x784   : > { %v6532_v18 = vadd.f32 %v10022_v6, %v6476_v26  ;;  %v6593_v48 = vmul.f32 0.5, %v6577_v9 }
 0x785   : > { %8227 = vtanh.f32 %v6547_v55 }
 0x786   : > { %v6548_v22 = vmul.f32 0.5, %v6532_v18  ;;  %6630 = vperm.xlu1 %8170, %v6593_v48  }
 0x788   : > { %8229 = vtanh.f32 %v6548_v22 }
 0x78a   : > { %v6481_v42 = vpop.xlane.xlu1 %6480 }
 0x78b   : > { %v6533_v34 = vadd.f32 %v10022_v6, %v6481_v42  ;;  %v8226_v7 = vpop.eup %8225 }
 0x78c   : > { %v6578_v62 = vadd.f32 1.0, %v8226_v7 }
 0x78d   : > { %v6549_v31 = vmul.f32 0.5, %v6533_v34 }
 0x78e   : > { %v6594_v8 = vmul.f32 0.5, %v6578_v62 }
 0x78f   : > { %8231 = vtanh.f32 %v6549_v31  ;;  %v6486_v47 = vpop.xlane.xlu0 %6485  ;;  %v8228_v33 = vpop.eup %8227 }
 0x790   : > { %v6534_v17 = vadd.f32 %v10022_v6, %v6486_v47  ;;  %v6579_v14 = vadd.f32 1.0, %v8228_v33  ;;  %6633 = vperm.xlu0 %8169, %v6594_v8  }
 0x792   : > { %v8230_v61 = vpop.eup %8229  ;;  %v6550_v1 = vmul.f32 0.5, %v6534_v17  ;;  %v6595_v15 = vmul.f32 0.5, %v6579_v14 }
 0x793   : > { %v6580_v19 = vadd.f32 1.0, %v8230_v61 }
 0x794   : > { %8233 = vtanh.f32 %v6550_v1  ;;  %6636 = vperm.xlu1 %8170, %v6595_v15  }
 0x795   : > { %v6596_v4 = vmul.f32 0.5, %v6580_v19 }
 0x796   : > { %v6491_v11 = vpop.xlane.xlu1 %6490 }
 0x797   : > { %v6535_v16 = vadd.f32 %v10022_v6, %v6491_v11  ;;  %6639 = vperm.xlu0 %8169, %v6596_v4  }
 0x799   : > { %v6496_v25 = vpop.xlane.xlu0 %6495  ;;  %v8232_v60 = vpop.eup %8231  ;;  %v6551_v5 = vmul.f32 0.5, %v6535_v16 }
 0x79a   : > { %v6536_v36 = vadd.f32 %v10022_v6, %v6496_v25  ;;  %v6581_v37 = vadd.f32 1.0, %v8232_v60 }
 0x79b   : > { %8235 = vtanh.f32 %v6551_v5 }
 0x79c   : > { %v6552_v52 = vmul.f32 0.5, %v6536_v36  ;;  %v6597_v13 = vmul.f32 0.5, %v6581_v37 }
 0x79e   : > { %8237 = vtanh.f32 %v6552_v52  ;;  %v8234_v23 = vpop.eup %8233  ;;  %6642 = vperm.xlu1 %8170, %v6597_v13  }
 0x79f   : > { %v6582_v54 = vadd.f32 1.0, %v8234_v23  ;;  %8239 = vtanh.f32 %v5570_v53 }
 0x7a1   : > { %v6598_v44 = vmul.f32 0.5, %v6582_v54 }
 0x7a2   : > { %v6501_v12 = vpop.xlane.xlu1 %6500 }
 0x7a3   : > { %v6537_v63 = vadd.f32 %v10022_v6, %v6501_v12  ;;  %6645 = vperm.xlu0 %8169, %v6598_v44   ;;  %v10365_v44 = vlaneseq }
 0x7a5   : > { %v6506_v28 = vpop.xlane.xlu0 %6505  ;;  %v8236_v46 = vpop.eup %8235  ;;  %v6553_v58 = vmul.f32 0.5, %v6537_v63  ;;  %v10080_v53 = vand.u32 127, %v10365_v44 }
 0x7a6   : > { %v6538_v3 = vadd.f32 %v10022_v6, %v6506_v28  ;;  %v6583_v21 = vadd.f32 1.0, %v8236_v46 }
 0x7a7   : > { %8241 = vtanh.f32 %v6553_v58  ;;  %v5690_v12 = vadd.s32 4294967288, %v10080_v53  ;;  %v5697_v63 = vadd.s32 4294967280, %v10080_v53  ;;  %v5704_v46 = vadd.s32 4294967272, %v10080_v53 }
 0x7a8   : > { %v8238_v29 = vpop.eup %8237  ;;  %v6554_v24 = vmul.f32 0.5, %v6538_v3  ;;  %v6599_v0 = vmul.f32 0.5, %v6583_v21  ;;  %v5711_v58 = vadd.s32 4294967264, %v10080_v53  ;;  %v10366_v3 = vld [vmem:[#allocation20_spill] sm:$0xff] }
 0x7a9   : > { %v6584_v10 = vadd.f32 1.0, %v8238_v29  ;;  %v8240_v56 = vpop.eup %8239  ;;  %v10091_v21 = vsub.s32 %v5690_v12, %v10366_v3  ;;  %v5718_v29 = vadd.s32 4294967256, %v10080_v53 }
 0x7aa   : > { %8243 = vtanh.f32 %v6554_v24  ;;  %6648 = vperm.xlu1 %8170, %v6599_v0   ;;  %v5602_v9 = vadd.f32 1.0, %v8240_v56  ;;  %v10097_v24 = vsub.s32 %v5697_v63, %v10366_v3  ;;  %v5732_v56 = vadd.s32 4294967240, %v10080_v53 }
 0x7ab   : > { %v6600_v49 = vmul.f32 0.5, %v6584_v10  ;;  %8245 = vtanh.f32 %v5571_v39  ;;  %v5725_v10 = vadd.s32 4294967248, %v10080_v53  ;;  %v5788_v63 = vadd.s32 4294967176, %v10080_v53 }
 0x7ac   : > { %v5618_v7 = vmul.f32 0.5, %v5602_v9 }
 0x7ad   : > { %6651 = vperm.xlu0 %8169, %v6600_v49   ;;  %v10104_v49 = vsub.s32 %v10080_v53, %v10366_v3 }
 0x7ae   : > { %v6511_v40 = vpop.xlane.xlu1 %6510 }
 0x7af   : > { %v6539_v30 = vadd.f32 %v10022_v6, %v6511_v40  ;;  %v6516_v50 = vpop.xlane.xlu0 %6515  ;;  %v10107_v40 = vsub.s32 %v5704_v46, %v10366_v3 }
 0x7b0   : > { %v6540_v38 = vadd.f32 %v10022_v6, %v6516_v50 }
 0x7b1   : > { %v6555_v43 = vmul.f32 0.5, %v6539_v30  ;;  %v8242_v57 = vpop.eup %8241  ;;  %v10110_v30 = vsub.s32 %v5711_v58, %v10366_v3 }
 0x7b2   : > { %v6556_v20 = vmul.f32 0.5, %v6540_v38  ;;  %v6521_v45 = vpop.xlane.xlu1 %6520  ;;  %v6585_v32 = vadd.f32 1.0, %v8242_v57  ;;  %v10114_v38 = vsub.s32 %v5718_v29, %v10366_v3 }
 0x7b3   : > { %8247 = vtanh.f32 %v6555_v43  ;;  %v6541_v35 = vadd.f32 %v10022_v6, %v6521_v45  ;;  %v6526_v2 = vpop.xlane.xlu0 %6525  ;;  %v5739_v45 = vadd.s32 4294967232, %v10080_v53 }
 0x7b4   : > { %v8244_v51 = vpop.eup %8243  ;;  %8249 = vtanh.f32 %v6556_v20  ;;  %v6542_v27 = vadd.f32 %v10022_v6, %v6526_v2  ;;  %v6601_v18 = vmul.f32 0.5, %v6585_v32  ;;  %v10121_v20 = vsub.s32 %v5725_v10, %v10366_v3 }
 0x7b5   : > { %v6586_v26 = vadd.f32 1.0, %v8244_v51  ;;  %v6557_v55 = vmul.f32 0.5, %v6541_v35  ;;  %v8246_v48 = vpop.eup %8245 }
 0x7b6   : > { %v6558_v22 = vmul.f32 0.5, %v6542_v27  ;;  %6654 = vperm.xlu1 %8170, %v6601_v18   ;;  %v5603_v34 = vadd.f32 1.0, %v8246_v48  ;;  %v5641_v11 = vpop.permute.xlu1 %5640 }
 0x7b7   : > { %8251 = vtanh.f32 %v6557_v55  ;;  %v6602_v42 = vmul.f32 0.5, %v6586_v26  ;;  %v5694_v50 = vrot.slane %v5641_v11, %v10091_v21  ;;  %v10132_v26 = vsub.s32 %v5732_v56, %v10366_v3 }
 0x7b8   : > { %8253 = vtanh.f32 %v6558_v22  ;;  %v5619_v31 = vmul.f32 0.5, %v5603_v34  ;;  %v5746_v55 = vadd.s32 4294967224, %v10080_v53  ;;  %v5753_v34 = vadd.s32 4294967216, %v10080_v53 }
 0x7b9   : > { %6657 = vperm.xlu0 %8169, %v6602_v42   ;;  %v10138_v42 = vsub.s32 %v5739_v45, %v10366_v3  ;;  %v5781_v11 = vadd.s32 4294967184, %v10080_v53  ;;  %v5791_v56 = vsub.s32 %v5788_v63, %v10366_v3 }
 0x7ba   : > { %5679 = vperm.xlu1 %8170, %v5618_v7   ;;  %v5644_v16 = vpop.permute.xlu1 %5643 }
 0x7bb   : > { %v5638_v23 = vpop.permute.xlu0 %5637  ;;  %v5701_v57 = vrot.slane %v5644_v16, %v10097_v24 }
 0x7bc   : > { %v5689_v35 = vrot.slane %v5638_v23, %v10104_v49 }
 0x7bd   : > { %v8248_v62 = vpop.eup %8247 }
 0x7be   : > { %v8250_v47 = vpop.eup %8249  ;;  %v6587_v8 = vadd.f32 1.0, %v8248_v62  ;;  %5682 = vperm.xlu1 %8170, %v5619_v31   ;;  %v5647_v25 = vpop.permute.xlu1 %5646  ;;  %v5696_v27 = vsel %vm5695_vm1, %v5694_v50, %v5689_v35 }
 0x7bf   : > { %v6588_v6 = vadd.f32 1.0, %v8250_v47  ;;  %v5656_v41 = vpop.permute.xlu0 %5655  ;;  %v5708_v2 = vrot.slane %v5647_v25, %v10107_v40  ;;  %v5703_v48 = vsel %vm5702_vm2, %v5701_v57, %v5696_v27 }
 0x7c0   : > { %v6603_v33 = vmul.f32 0.5, %v6587_v8  ;;  %v5729_v22 = vrot.slane %v5656_v41, %v10121_v20 }
 0x7c1   : > { %v8252_v17 = vpop.eup %8251  ;;  %v6604_v61 = vmul.f32 0.5, %v6588_v6  ;;  %v5710_v62 = vsel %vm5709_vm3, %v5708_v2, %v5703_v48  ;;  %v10149_v6 = vsub.s32 %v5746_v55, %v10366_v3 }
 0x7c2   : > { %v6589_v14 = vadd.f32 1.0, %v8252_v17  ;;  %6660 = vperm.xlu0 %8169, %v6603_v33   ;;  %v8254_v1 = vpop.eup %8253  ;;  %v5650_v60 = vpop.permute.xlu1 %5649  ;;  %v5760_v33 = vadd.s32 4294967208, %v10080_v53 }
 0x7c3   : > { %v6590_v15 = vadd.f32 1.0, %v8254_v1  ;;  %v5715_v51 = vrot.slane %v5650_v60, %v10110_v30  ;;  %v10156_v1 = vsub.s32 %v5753_v34, %v10366_v3 }
 0x7c4   : > { %v6605_v19 = vmul.f32 0.5, %v6589_v14  ;;  %v10165_v60 = vsub.s32 %v5760_v33, %v10366_v3 }
 0x7c5   : > { %v6606_v4 = vmul.f32 0.5, %v6590_v15  ;;  %v5717_v31 = vsel %vm5716_vm4, %v5715_v51, %v5710_v62 }
 0x7c6   : > { %6663 = vperm.xlu0 %8169, %v6604_v61   ;;  %v5653_v5 = vpop.permute.xlu1 %5652 }
 0x7c7   : > { %v5722_v9 = vrot.slane %v5653_v5, %v10114_v38 }
 0x7c9   : > { %v5724_v47 = vsel %vm5723_vm5, %v5722_v9, %v5717_v31 }
 0x7ca   : > { %6666 = vperm.xlu0 %8169, %v6605_v19   ;;  %v10069_v36 = vpop.permute.xlu1 %5658  ;;  %v5731_v14 = vsel %vm5730_vm6, %v5729_v22, %v5724_v47  ;;  %v5767_v19 = vadd.s32 4294967200, %v10080_v53 }
 0x7cb   : > { %v5736_v8 = vrot.slane %v10069_v36, %v10132_v26 }
 0x7cc   : > { %v10083_v59 = vpop.permute.xlu0 %5664  ;;  %v5770_v23 = vsub.s32 %v5767_v19, %v10366_v3 }
 0x7cd   : > { %v5738_v16 = vsel %vm5737_vm7, %v5736_v8, %v5731_v14  ;;  %v5750_v25 = vrot.slane %v10083_v59, %v10149_v6 }
 0x7ce   : > { %6669 = vperm.xlu0 %8169, %v6606_v4   ;;  %v10071_v37 = vpop.permute.xlu1 %5661  ;;  %v5774_v4 = vadd.s32 4294967192, %v10080_v53 }
 0x7cf   : > { %v5743_v61 = vrot.slane %v10071_v37, %v10138_v42 }
 0x7d0   : > { %v5777_v12 = vsub.s32 %v5774_v4, %v10366_v3 }
 0x7d1   : > { %v5745_v36 = vsel %vm5744_vm8, %v5743_v61, %v5738_v16 }
 0x7d2   : > { %v5752_v29 = vsel %vm5751_vm9, %v5750_v25, %v5745_v36 }
 0x7d6   : > { %v10073_v52 = vpop.permute.xlu1 %5667 }
 0x7d7   : > { %v5757_v37 = vrot.slane %v10073_v52, %v10156_v1  ;;  %v5784_v52 = vsub.s32 %v5781_v11, %v10366_v3 }
 0x7d9   : > { %v10094_v39 = vpop.permute.xlu0 %5670 }
 0x7e2   : > { %v10075_v13 = vpop.permute.xlu1 %5673 }
 0x7e3   : > { %v5771_v53 = vrot.slane %v10075_v13, %v5770_v23 }
 0x7e6   : > { %v10077_v54 = vpop.permute.xlu1 %5676 }
 0x7f9   : > { %v10086_v28 = vpop.permute.xlu1 %6624 }
 0x7fa   : > { %v6674_v46 = vrot.slane %v10086_v28, %v10104_v49  ;;  %v5778_v49 = vrot.slane %v10077_v54, %v5777_v12 }
 0x7fe   : > { %v10117_v43 = vpop.permute.xlu0 %6627 }
 0x7ff   : > { %v6678_v41 = vrot.slane %v10117_v43, %v10091_v21  ;;  %v5764_v21 = vrot.slane %v10094_v39, %v10165_v60 }
 0x801   : > { %v6679_v28 = vsel %vm5695_vm1, %v6678_v41, %v6674_v46 }
 0x805   : > { %v10100_v0 = vpop.permute.xlu1 %6630 }
 0x806   : > { %v6683_v59 = vrot.slane %v10100_v0, %v10097_v24  ;;  %v5759_v24 = vsel %vm5758_vm10, %v5757_v37, %v5752_v29 }
 0x807   : > { %v5766_v57 = vsel %vm5765_vm11, %v5764_v21, %v5759_v24 }
 0x808   : > { %v5773_v54 = vsel %vm5772_vm12, %v5771_v53, %v5766_v57 }
 0x809   : > { %v5780_v35 = vsel %vm5779_vm13, %v5778_v49, %v5773_v54 }
 0x80f   : > { %v6634_v18 = vpop.permute.xlu0 %6633 }
 0x810   : > { %v6688_v58 = vrot.slane %v6634_v18, %v10107_v40  ;;  %v6684_v40 = vsel %vm5702_vm2, %v6683_v59, %v6679_v28 }
 0x812   : > { %v6689_v39 = vsel %vm5709_vm3, %v6688_v58, %v6684_v40 }
 0x813   : > { %v10124_v32 = vpop.permute.xlu1 %6636 }
 0x814   : > { %v6693_v10 = vrot.slane %v10124_v32, %v10110_v30 }
 0x816   : > { %v6640_v17 = vpop.permute.xlu0 %6639  ;;  %v6694_v13 = vsel %vm5716_vm4, %v6693_v10, %v6689_v39 }
 0x817   : > { %v6698_v30 = vrot.slane %v6640_v17, %v10114_v38 }
 0x819   : > { %v6699_v38 = vsel %vm5723_vm5, %v6698_v30, %v6694_v13 }
 0x81d   : > { %v10141_v7 = vpop.permute.xlu1 %6642 }
 0x81e   : > { %v6703_v45 = vrot.slane %v10141_v7, %v10121_v20 }
 0x820   : > { %v6704_v9 = vsel %vm5730_vm6, %v6703_v45, %v6699_v38 }
 0x822   : > { %v6646_v5 = vpop.permute.xlu0 %6645 }
 0x823   : > { %v6708_v51 = vrot.slane %v6646_v5, %v10132_v26 }
 0x825   : > { %v6709_v48 = vsel %vm5737_vm7, %v6708_v51, %v6704_v9 }
 0x829   : > { %v6649_v15 = vpop.permute.xlu1 %6648 }
 0x82a   : > { %v6713_v55 = vrot.slane %v6649_v15, %v10138_v42 }
 0x82c   : > { %v6652_v50 = vpop.permute.xlu0 %6651  ;;  %v6714_v34 = vsel %vm5744_vm8, %v6713_v55, %v6709_v48 }
 0x82d   : > { %v6718_v22 = vrot.slane %v6652_v50, %v10149_v6 }
 0x82f   : > { %v6719_v62 = vsel %vm5751_vm9, %v6718_v22, %v6714_v34 }
 0x835   : > { %v6655_v44 = vpop.permute.xlu1 %6654 }
 0x836   : > { %v6723_v26 = vrot.slane %v6655_v44, %v10156_v1 }
 0x838   : > { %v6658_v32 = vpop.permute.xlu0 %6657  ;;  %v6724_v42 = vsel %vm5758_vm10, %v6723_v26, %v6719_v62 }
 0x839   : > { %v5680_v0 = vpop.permute.xlu1 %5679  ;;  %v6728_v31 = vrot.slane %v6658_v32, %v10165_v60 }
 0x83a   : > { %v5785_v43 = vrot.slane %v5680_v0, %v5784_v52 }
 0x83b   : > { %v6729_v6 = vsel %vm5765_vm11, %v6728_v31, %v6724_v42 }
 0x83c   : > { %v5787_v27 = vsel %vm5786_vm14, %v5785_v43, %v5780_v35 }
 0x83d   : > { %v5683_v3 = vpop.permute.xlu1 %5682 }
 0x83e   : > { %v5792_v2 = vrot.slane %v5683_v3, %v5791_v56 }
 0x840   : > { %v5794_v18 = vsel %vm5793_vm15, %v5792_v2, %v5787_v27 }
 0x841   : > { %v6661_v20 = vpop.permute.xlu0 %6660  ;;  %5796 = vst [vmem:[%s8691_s25] sm:$0x1] %v5794_v18 }
 0x842   : > { %v6733_v47 = vrot.slane %v6661_v20, %v5770_v23 }
 0x844   : > { %v6734_v14 = vsel %vm5772_vm12, %v6733_v47, %v6729_v6 }
 0x845   : > { %v6664_v7 = vpop.permute.xlu0 %6663 }
 0x846   : > { %v6738_v33 = vrot.slane %v6664_v7, %v5777_v12 }
 0x848   : > { %v6739_v1 = vsel %vm5779_vm13, %v6738_v33, %v6734_v14 }
 0x849   : > { %v6667_v8 = vpop.permute.xlu0 %6666 }
 0x84a   : > { %v6743_v17 = vrot.slane %v6667_v8, %v5784_v52 }
 0x84c   : > { %v6744_v15 = vsel %vm5786_vm14, %v6743_v17, %v6739_v1 }
 0x84d   : > { %v6670_v61 = vpop.permute.xlu0 %6669 }
 0x84e   : > { %v6748_v19 = vrot.slane %v6670_v61, %v5791_v56 }
 0x850   : > { %v6749_v4 = vsel %vm5793_vm15, %v6748_v19, %v6744_v15 }
 0x851   : > { %6751 = vst [vmem:[%s8691_s25 + $0x1] sm:$0x1] %v6749_v4 }
 0x852   : > { %8352 = shalt.err (!%p8349_p1)
}
 0x853   : > { %s8353_s30 = scalar_lea.hbm %s10223_s16, 32  ;;  %s8357_s26 = scalar_lea.hbm %s10368_s29, 64 }
 0x854   : > { %p8354_p6 = scmp.ne.s32.totalorder %s10223_s16, %s8353_s30  ;;  %p8358_p12 = scmp.lt.u32.totalorder %s10223_s16, %s10368_s29 }
 0x855   : > { %p8359_p13 = scmp.lt.u32.totalorder %s8357_s26, %s8353_s30  ;;  %p8361_p7 = scmp.lt.u32.totalorder %s8353_s30, %s10223_s16 }
 0x856   : > { %p8355_p10 = pnand %p8354_p6, %p10369_p4 }
 0x857   : > { %p8360_p2 = por %p8359_p13, %p8358_p12 }
 0x858   : > { %p8356_p11 = pneg %p8355_p10 }
 0x859   : > { %p8362_p8 = por %p8361_p7, %p8360_p2 }
 0x85b   : > { %p8363_p9 = pnand %p8362_p8, %p8356_p11 }
 0x85d   : > { %8366 = shalt.err (!%p8363_p9)
}
 0x85e   : > { %7521 = dma.vmem_to_hbm [thread:$0]  (%p10369_p4), %s10225_s12, 32, %s10223_s16, %s6753_s14  }
 0x85f PF: > { %s10370_s24 = sld [smem:[#allocation15_spill]]  ;;  %s10371_s13 = sld [smem:[#allocation19_spill]] }
 0x865   : > { %s6778_s28 = sand.u32 1, %s10370_s24   ;;  %p10372_p0 = scmp.ne.s32.totalorder %s10371_s13, 0 }
 0x866   : > { %s6779_s17 = scalar_lea.sflag [#allocation7], %s6778_s28 }
 0x867   : > { %p7534_p3 = pnand %p6867_p5, %p10372_p0 }
 0x869   : > { %8392 = dma.done.wait (!%p7534_p3), %s6779_s17, 32  }
 0x86a   : > { %8394 = vsyncadd (!%p7534_p3), %s6779_s17, 4294967264  ;;  %s10373_s23 = sld [smem:[#allocation16_spill]]  ;;  %s10374_s19 = sld [smem:[#allocation17_spill]] }
 0x86b   : > { %s10375_s20 = smov %s8401_s21  ;;  %s10376_s21 = smov %s8405_s22 }
 0x870   : > { %p29_p1 = scmp.ge.s32.totalorder %s10373_s23, 4   ;;  %s10377_s22 = smov %s10374_s19 }
 0x872   :  { %31 = sbr.rel (!%p29_p1) target bundleno = 12 (0xc), region = 180 }
 0x879   :  { %6784 = vsyncpa [#allocation6], 1 }
 0x87a   :  { %6786 = vsyncpa [#allocation6 + $0x1], 1 }
 0x87b   :  { %6787 = vsyncpa [#allocation9], 1 }
 0x87c   :  { %6788 = vsyncpa [#allocation7], 1 }
 0x87d   :  { %6790 = vsyncpa [#allocation7 + $0x1], 1 }

</bundles_post_ra>
